<compile_context>
chip_gen: v7x
topology: tpu7x:2x2x1
jax: 0.10.0
libtpu: 0.0.40
codegen_flags: <defaults>
</compile_context>

<pallas_src>
import functools

import jax
import jax.numpy as jnp
import numpy as np
from jax.experimental import pallas as pl
from jax.experimental.pallas import tpu as pltpu

LANE = 128          # lane width: pad all matmul output widths to this
HEAD_HIDDEN = 512   # NoisyLinear hidden size in the Rainbow head


# ----------------------------------------------------------------------------
# Pallas kernels
# ----------------------------------------------------------------------------
def _matmul_bias_kernel(x_ref, w_ref, b_ref, o_ref, *, relu: bool):
    """o = x @ w + b (optional ReLU). bf16 MXU feed, f32 accumulate/epilogue."""
    x = x_ref[...].astype(jnp.bfloat16)
    w = w_ref[...].astype(jnp.bfloat16)
    acc = jnp.dot(x, w, preferred_element_type=jnp.float32) + b_ref[...]
    if relu:
        acc = jnp.maximum(acc, 0.0)
    o_ref[...] = acc.astype(o_ref.dtype)


def _pick_tile_m(M: int) -> int:
    """Row tile for the conv matmuls: big, 128-aligned, divides M; else full M."""
    for t in (512, 256, 128):
        if M >= t and M % t == 0:
            return t
    return M


def linear_pallas(x, w, b, *, relu: bool, out_dtype=jnp.float32):
    """Dense layer on the MXU, tiled over rows (M) with a parallel grid axis."""
    M, K = x.shape
    K2, N = w.shape
    assert K == K2
    tile_m = _pick_tile_m(M)
    grid_m = M // tile_m
    kernel = functools.partial(_matmul_bias_kernel, relu=relu)
    return pl.pallas_call(
        kernel,
        out_shape=jax.ShapeDtypeStruct((M, N), out_dtype),
        grid=(grid_m,),
        in_specs=[
            pl.BlockSpec((tile_m, K), lambda i: (i, 0)),
            pl.BlockSpec((K, N), lambda i: (0, 0)),
            pl.BlockSpec((1, N), lambda i: (0, 0)),
        ],
        out_specs=pl.BlockSpec((tile_m, N), lambda i: (i, 0)),
        compiler_params=pltpu.CompilerParams(dimension_semantics=("parallel",)),
    )(x, w, b.reshape(1, N))


def _head_kernel(feat_ref, w1_ref, b1_ref, q2w_ref, q2b_ref, v2w_ref, v2b_ref,
                 o_ref, *, hidden, action_num, num_atoms, atoms_pad):
    """Fused Rainbow head: [q1|v1] matmul, q2, v2, dueling combine, softmax.

    feat:(B,Kp)  w1:(Kp,2H)  q2w:(H, A*atoms_pad)  v2w:(H, atoms_pad)
    output o:(B, A*atoms_pad) — per-action 128-lane blocks, first num_atoms valid.
    """
    feat = feat_ref[...].astype(jnp.bfloat16)
    h = jnp.dot(feat, w1_ref[...], preferred_element_type=jnp.float32) + b1_ref[...]
    h = jnp.maximum(h, 0.0).astype(jnp.bfloat16)
    qh = h[:, :hidden]
    vh = h[:, hidden:]
    q = jnp.dot(qh, q2w_ref[...], preferred_element_type=jnp.float32) + q2b_ref[...]
    v = jnp.dot(vh, v2w_ref[...], preferred_element_type=jnp.float32) + v2b_ref[...]

    B = feat.shape[0]
    q_slices = [q[:, a * atoms_pad:(a + 1) * atoms_pad] for a in range(action_num)]
    q_mean = q_slices[0]
    for a in range(1, action_num):
        q_mean = q_mean + q_slices[a]
    q_mean = q_mean * (1.0 / action_num)

    valid = jax.lax.broadcasted_iota(jnp.int32, (B, atoms_pad), 1) < num_atoms
    for a in range(action_num):
        logits = q_slices[a] - q_mean + v
        logits = jnp.where(valid, logits, -1e30)
        m = jnp.max(logits, axis=-1, keepdims=True)
        e = jnp.exp(logits - m)
        s = jnp.sum(e, axis=-1, keepdims=True)
        o_ref[:, a * atoms_pad:(a + 1) * atoms_pad] = (e / s).astype(o_ref.dtype)


def head_pallas(feat, kp, action_num, num_atoms, atoms_pad=LANE):
    B, Kp = feat.shape
    H = HEAD_HIDDEN
    Nq = action_num * atoms_pad
    kernel = functools.partial(_head_kernel, hidden=H, action_num=action_num,
                               num_atoms=num_atoms, atoms_pad=atoms_pad)
    out = pl.pallas_call(
        kernel,
        out_shape=jax.ShapeDtypeStruct((B, Nq), jnp.float32),
        grid=(1,),
        in_specs=[
            pl.BlockSpec((B, Kp), lambda i: (0, 0)),
            pl.BlockSpec((Kp, 2 * H), lambda i: (0, 0)),
            pl.BlockSpec((1, 2 * H), lambda i: (0, 0)),
            pl.BlockSpec((H, Nq), lambda i: (0, 0)),
            pl.BlockSpec((1, Nq), lambda i: (0, 0)),
            pl.BlockSpec((H, atoms_pad), lambda i: (0, 0)),
            pl.BlockSpec((1, atoms_pad), lambda i: (0, 0)),
        ],
        out_specs=pl.BlockSpec((B, Nq), lambda i: (0, 0)),
    )(feat, kp["w1"], kp["b1"], kp["q2_w"], kp["q2_b"], kp["v2_w"], kp["v2_b"])
    return out.reshape(B, action_num, atoms_pad)[..., :num_atoms]


# ----------------------------------------------------------------------------
# Glue: im2col for NHWC conv (strided slicing / concatenation only)
# ----------------------------------------------------------------------------
# TODO(synk): at training batch sizes fold the kh*kw tap accumulation into the
# Pallas matmul grid (shifted-window dot with pl.when init) to avoid im2col's
# kh*kw HBM duplication; acceptable at B=2.
def im2col_nhwc(x, kh, kw, stride):
    B, H, W, C = x.shape
    OH = (H - kh) // stride + 1
    OW = (W - kw) // stride + 1
    taps = []
    for i in range(kh):
        for j in range(kw):
            taps.append(x[:, i:i + stride * OH:stride, j:j + stride * OW:stride, :])
    patches = jnp.concatenate(taps, axis=-1)          # (B, OH, OW, kh*kw*C)
    return patches.reshape(B * OH * OW, kh * kw * C), OH, OW


def conv2d_pallas(x_nhwc, wcol, b, *, kh, kw, stride):
    """Conv2d (valid padding) + ReLU via NHWC im2col + tiled MXU matmul.

    wcol is the pre-packed (kh*kw*C_in_pad, C_out_pad) bf16 weight; output stays
    NHWC with padded (zero) channels, stored in bf16 for the next layer.
    """
    B = x_nhwc.shape[0]
    cols, OH, OW = im2col_nhwc(x_nhwc, kh, kw, stride)
    N = wcol.shape[1]
    y = linear_pallas(cols, wcol, b, relu=True, out_dtype=jnp.bfloat16)
    return y.reshape(B, OH, OW, N)


# ----------------------------------------------------------------------------
# Parameter construction (deterministic, synthetic) + packing
# ----------------------------------------------------------------------------
def _noisy_f(x):
    return jnp.sign(x) * jnp.sqrt(jnp.abs(x))


def init_noisy_linear(key, in_f, out_f, sigma=0.5):
    """Training-mode NoisyLinear effective weight/bias in PyTorch (out,in) layout."""
    k1, k2, k3, k4 = jax.random.split(key, 4)
    bound = 1.0 / np.sqrt(in_f)
    mu_W = jax.random.uniform(k1, (out_f, in_f), minval=-bound, maxval=bound)
    sigma_W = jnp.full((out_f, in_f), sigma / np.sqrt(in_f), jnp.float32)
    mu_b = jax.random.uniform(k2, (out_f,), minval=-bound, maxval=bound)
    sigma_b = jnp.full((out_f,), sigma / np.sqrt(in_f), jnp.float32)
    eps_p = _noisy_f(jax.random.normal(k3, (in_f,)))
    eps_q = _noisy_f(jax.random.normal(k4, (out_f,)))
    W = mu_W + sigma_W * jnp.outer(eps_q, eps_p)
    b = mu_b + sigma_b * eps_q
    return W.astype(jnp.float32), b.astype(jnp.float32)


def init_conv(key, out_c, in_c, kh, kw):
    k1, k2 = jax.random.split(key)
    fan_in = in_c * kh * kw
    bound = 1.0 / np.sqrt(fan_in)
    w = jax.random.uniform(k1, (out_c, in_c, kh, kw), minval=-bound, maxval=bound)
    b = jax.random.uniform(k2, (out_c,), minval=-bound, maxval=bound)
    return w.astype(jnp.float32), b.astype(jnp.float32)


def _pad_axis(a, axis, target):
    pad = target - a.shape[axis]
    if pad <= 0:
        return a
    widths = [(0, 0)] * a.ndim
    widths[axis] = (0, pad)
    return jnp.pad(a, widths)


def _pack_conv(w, b, in_pad, out_pad):
    """(out,in,kh,kw) PyTorch weight -> NHWC-im2col column matrix, lane-padded."""
    out_c, in_c, kh, kw = w.shape
    wt = jnp.transpose(w, (2, 3, 1, 0))               # (kh, kw, in, out)
    wt = _pad_axis(wt, 2, in_pad)                     # pad input channels
    wcol = wt.reshape(kh * kw * in_pad, out_c)
    wcol = _pad_axis(wcol, 1, out_pad)                # pad output channels
    return wcol.astype(jnp.bfloat16), _pad_axis(b, 0, out_pad).astype(jnp.float32)


def make_params(key, c, action_num, num_atoms, feat_dim, noisy_std=0.5,
                atoms_pad=LANE, c_pad=LANE):
    ks = jax.random.split(key, 7)
    c1_w, c1_b = init_conv(ks[0], 32, c, 8, 8)
    c2_w, c2_b = init_conv(ks[1], 64, 32, 4, 4)
    c3_w, c3_b = init_conv(ks[2], 64, 64, 3, 3)
    q1_W, q1_b = init_noisy_linear(ks[3], feat_dim, HEAD_HIDDEN, noisy_std)
    q2_W, q2_b = init_noisy_linear(ks[4], HEAD_HIDDEN, action_num * num_atoms, noisy_std)
    v1_W, v1_b = init_noisy_linear(ks[5], feat_dim, HEAD_HIDDEN, noisy_std)
    v2_W, v2_b = init_noisy_linear(ks[6], HEAD_HIDDEN, num_atoms, noisy_std)

    kp = {}
    # Convs: layer-1 input channels are the real obs channels; layers 2/3 consume
    # the lane-padded (zero-filled) activation channels of the previous layer.
    kp["c1_w"], kp["c1_b"] = _pack_conv(c1_w, c1_b, in_pad=c,     out_pad=c_pad)
    kp["c2_w"], kp["c2_b"] = _pack_conv(c2_w, c2_b, in_pad=c_pad, out_pad=c_pad)
    kp["c3_w"], kp["c3_b"] = _pack_conv(c3_w, c3_b, in_pad=c_pad, out_pad=c_pad)

    # Fused head layer 1: [q1 | v1] over the lane-padded feature vector.
    q1 = _pad_axis(q1_W.T, 0, c_pad)                  # (c_pad, 512)
    v1 = _pad_axis(v1_W.T, 0, c_pad)
    kp["w1"] = jnp.concatenate([q1, v1], axis=1).astype(jnp.bfloat16)      # (c_pad, 1024)
    kp["b1"] = jnp.concatenate([q1_b, v1_b]).reshape(1, -1).astype(jnp.float32)

    # q2: re-layout columns so each action owns a 128-lane block (first 51 valid).
    q2t = q2_W.T.reshape(HEAD_HIDDEN, action_num, num_atoms)
    q2t = _pad_axis(q2t, 2, atoms_pad).reshape(HEAD_HIDDEN, action_num * atoms_pad)
    kp["q2_w"] = q2t.astype(jnp.bfloat16)
    kp["q2_b"] = _pad_axis(q2_b.reshape(action_num, num_atoms), 1, atoms_pad) \
        .reshape(1, -1).astype(jnp.float32)

    # v2: pad atoms to one 128-lane block.
    kp["v2_w"] = _pad_axis(v2_W.T, 1, atoms_pad).astype(jnp.bfloat16)       # (512, 128)
    kp["v2_b"] = _pad_axis(v2_b, 0, atoms_pad).reshape(1, -1).astype(jnp.float32)
    return kp


# ----------------------------------------------------------------------------
# Rainbow forward
# ----------------------------------------------------------------------------
def rainbow_forward(obs, kp, action_num, num_atoms):
    x = obs.astype(jnp.float32).transpose(0, 2, 3, 1)          # NCHW -> NHWC once
    x = conv2d_pallas(x, kp["c1_w"], kp["c1_b"], kh=8, kw=8, stride=4)
    x = conv2d_pallas(x, kp["c2_w"], kp["c2_b"], kh=4, kw=4, stride=2)
    x = conv2d_pallas(x, kp["c3_w"], kp["c3_b"], kh=3, kw=3, stride=1)
    B, OH, OW, C = x.shape
    # Spatial is 1x1 here, so NHWC flatten == PyTorch NCHW flatten (channel order).
    # TODO(synk): if input resolution changes so OH*OW > 1, re-order the flatten
    # (and head weight K layout) to preserve PyTorch NCHW flatten semantics.
    assert OH == 1 and OW == 1
    feat = x.reshape(B, OH * OW * C)                           # (B, 128) bf16
    return head_pallas(feat, kp, action_num, num_atoms)        # (B, A, atoms)


if __name__ == "__main__":
    # Shapes consistent with the conv stack (k8/s4, k4/s2, k3/s1):
    # 36x36 -> 8x8 -> 3x3 -> 1x1, so flattened (real) feature dim = 64.
    B, C, H, W = 2, 4, 36, 36
    action_num, num_atoms = 6, 51
    feat_dim = 64 * 1 * 1

    key = jax.random.PRNGKey(0)
    k_obs, k_par = jax.random.split(key)
    obs = jax.random.uniform(k_obs, (B, C, H, W), dtype=jnp.float32)
    params = make_params(k_par, C, action_num, num_atoms, feat_dim)

    fwd = jax.jit(functools.partial(rainbow_forward,
                                    action_num=action_num, num_atoms=num_atoms))
    probs = fwd(obs, params)
    jax.block_until_ready(probs)

    assert probs.shape == (B, action_num, num_atoms)
    assert bool(jnp.all(jnp.isfinite(probs)))
    # distributions over atoms must sum to 1
    assert bool(jnp.allclose(jnp.sum(probs, axis=-1), 1.0, atol=1e-5))
    print("KERNEL_OK")
</pallas_src>

<mosaic_0001>
module attributes {stable_mosaic.version = 11 : i64} {
  func.func @_matmul_bias_kernel(%arg0: i32, %arg1: memref<128x256xf32, #tpu.memory_space<vmem>>, %arg2: memref<256x128xbf16, #tpu.memory_space<vmem>>, %arg3: memref<1x128xf32, #tpu.memory_space<vmem>>, %arg4: memref<128x128xbf16, #tpu.memory_space<vmem>>) attributes {dimension_semantics = [#tpu.dimension_semantics<parallel>], iteration_bounds = array<i64: 1>, scalar_prefetch = 0 : i64, scratch_operands = 0 : i64, tpu.core_type = #tpu.core_type<tc>, window_params = [{transform_indices = @transform_0, window_bounds = array<i64: 128, 256>}, {pipeline_mode = #tpu.pipeline_mode<synchronous>, transform_indices = @transform_1, window_bounds = array<i64: 256, 128>}, {pipeline_mode = #tpu.pipeline_mode<synchronous>, transform_indices = @transform_2, window_bounds = array<i64: 1, 128>}, {transform_indices = @transform_3, window_bounds = array<i64: 128, 128>}]} {
    %c0 = arith.constant 0 : index
    %c0_0 = arith.constant 0 : index
    %0 = vector.load %arg1[%c0, %c0_0] : memref<128x256xf32, #tpu.memory_space<vmem>>, vector<128x256xf32>
    %1 = arith.truncf %0 : vector<128x256xf32> to vector<128x256xbf16>
    %c0_1 = arith.constant 0 : index
    %c0_2 = arith.constant 0 : index
    %2 = vector.load %arg2[%c0_1, %c0_2] : memref<256x128xbf16, #tpu.memory_space<vmem>>, vector<256x128xbf16>
    %cst = arith.constant dense<0.000000e+00> : vector<128x128xf32>
    %3 = tpu.matmul %1, %2, %cst {dimension_numbers = #tpu.dot_dimension_numbers<[1], [0], [0], [1], [0, 0, 1, 1], [], []>} : vector<128x256xbf16>, vector<256x128xbf16>, vector<128x128xf32> -> vector<128x128xf32>
    %c0_3 = arith.constant 0 : index
    %c0_4 = arith.constant 0 : index
    %4 = vector.load %arg3[%c0_3, %c0_4] : memref<1x128xf32, #tpu.memory_space<vmem>>, vector<1x128xf32>
    %5 = vector.broadcast %4 : vector<1x128xf32> to vector<128x128xf32>
    %6 = arith.addf %3, %5 : vector<128x128xf32>
    %cst_5 = arith.constant 0.000000e+00 : f32
    %7 = vector.broadcast %cst_5 : f32 to vector<128x128xf32>
    %8 = arith.maximumf %6, %7 : vector<128x128xf32>
    %9 = arith.truncf %8 : vector<128x128xf32> to vector<128x128xbf16>
    %c0_6 = arith.constant 0 : index
    %c0_7 = arith.constant 0 : index
    %10 = vector.load %arg4[%c0_6, %c0_7] : memref<128x128xbf16, #tpu.memory_space<vmem>>, vector<128x128xbf16>
    tpu.vector_store %arg4[%c0_6, %c0_7], %9 {strides = array<i32>} : memref<128x128xbf16, #tpu.memory_space<vmem>>, vector<128x128xbf16>,
    return
  }
  func.func @transform_0(%arg0: i32) -> (i32, i32) {
    %c0_i32 = arith.constant 0 : i32
    %c0_i32_0 = arith.constant 0 : i32
    return %arg0, %c0_i32 : i32, i32
  }
  func.func @transform_1(%arg0: i32) -> (i32, i32) {
    %c0_i32 = arith.constant 0 : i32
    %c0_i32_0 = arith.constant 0 : i32
    %c0_i32_1 = arith.constant 0 : i32
    return %c0_i32, %c0_i32_0 : i32, i32
  }
  func.func @transform_2(%arg0: i32) -> (i32, i32) {
    %c0_i32 = arith.constant 0 : i32
    %c0_i32_0 = arith.constant 0 : i32
    %c0_i32_1 = arith.constant 0 : i32
    return %c0_i32, %c0_i32_0 : i32, i32
  }
  func.func @transform_3(%arg0: i32) -> (i32, i32) {
    %c0_i32 = arith.constant 0 : i32
    %c0_i32_0 = arith.constant 0 : i32
    return %arg0, %c0_i32 : i32, i32
  }
}

module attributes {stable_mosaic.version = 11 : i64} {
  func.func @_matmul_bias_kernel(%arg0: i32, %arg1: memref<18x2048xbf16, #tpu.memory_space<vmem>>, %arg2: memref<2048x128xbf16, #tpu.memory_space<vmem>>, %arg3: memref<1x128xf32, #tpu.memory_space<vmem>>, %arg4: memref<18x128xbf16, #tpu.memory_space<vmem>>) attributes {dimension_semantics = [#tpu.dimension_semantics<parallel>], iteration_bounds = array<i64: 1>, scalar_prefetch = 0 : i64, scratch_operands = 0 : i64, tpu.core_type = #tpu.core_type<tc>, window_params = [{transform_indices = @transform_0, window_bounds = array<i64: 18, 2048>}, {pipeline_mode = #tpu.pipeline_mode<synchronous>, transform_indices = @transform_1, window_bounds = array<i64: 2048, 128>}, {pipeline_mode = #tpu.pipeline_mode<synchronous>, transform_indices = @transform_2, window_bounds = array<i64: 1, 128>}, {transform_indices = @transform_3, window_bounds = array<i64: 18, 128>}]} {
    %c0 = arith.constant 0 : index
    %c0_0 = arith.constant 0 : index
    %0 = vector.load %arg1[%c0, %c0_0] : memref<18x2048xbf16, #tpu.memory_space<vmem>>, vector<18x2048xbf16>
    %c0_1 = arith.constant 0 : index
    %c0_2 = arith.constant 0 : index
    %1 = vector.load %arg2[%c0_1, %c0_2] : memref<2048x128xbf16, #tpu.memory_space<vmem>>, vector<2048x128xbf16>
    %cst = arith.constant dense<0.000000e+00> : vector<18x128xf32>
    %2 = tpu.matmul %0, %1, %cst {dimension_numbers = #tpu.dot_dimension_numbers<[1], [0], [0], [1], [0, 0, 1, 1], [], []>} : vector<18x2048xbf16>, vector<2048x128xbf16>, vector<18x128xf32> -> vector<18x128xf32>
    %c0_3 = arith.constant 0 : index
    %c0_4 = arith.constant 0 : index
    %3 = vector.load %arg3[%c0_3, %c0_4] : memref<1x128xf32, #tpu.memory_space<vmem>>, vector<1x128xf32>
    %4 = vector.broadcast %3 : vector<1x128xf32> to vector<18x128xf32>
    %5 = arith.addf %2, %4 : vector<18x128xf32>
    %cst_5 = arith.constant 0.000000e+00 : f32
    %6 = vector.broadcast %cst_5 : f32 to vector<18x128xf32>
    %7 = arith.maximumf %5, %6 : vector<18x128xf32>
    %8 = arith.truncf %7 : vector<18x128xf32> to vector<18x128xbf16>
    %c0_6 = arith.constant 0 : index
    %c0_7 = arith.constant 0 : index
    %9 = vector.load %arg4[%c0_6, %c0_7] : memref<18x128xbf16, #tpu.memory_space<vmem>>, vector<18x128xbf16>
    tpu.vector_store %arg4[%c0_6, %c0_7], %8 {strides = array<i32>} : memref<18x128xbf16, #tpu.memory_space<vmem>>, vector<18x128xbf16>,
    return
  }
  func.func @transform_0(%arg0: i32) -> (i32, i32) {
    %c0_i32 = arith.constant 0 : i32
    %c0_i32_0 = arith.constant 0 : i32
    return %arg0, %c0_i32 : i32, i32
  }
  func.func @transform_1(%arg0: i32) -> (i32, i32) {
    %c0_i32 = arith.constant 0 : i32
    %c0_i32_0 = arith.constant 0 : i32
    %c0_i32_1 = arith.constant 0 : i32
    return %c0_i32, %c0_i32_0 : i32, i32
  }
  func.func @transform_2(%arg0: i32) -> (i32, i32) {
    %c0_i32 = arith.constant 0 : i32
    %c0_i32_0 = arith.constant 0 : i32
    %c0_i32_1 = arith.constant 0 : i32
    return %c0_i32, %c0_i32_0 : i32, i32
  }
  func.func @transform_3(%arg0: i32) -> (i32, i32) {
    %c0_i32 = arith.constant 0 : i32
    %c0_i32_0 = arith.constant 0 : i32
    return %arg0, %c0_i32 : i32, i32
  }
}

module attributes {stable_mosaic.version = 11 : i64} {
  func.func @_head_kernel(%arg0: i32, %arg1: memref<2x128xbf16, #tpu.memory_space<vmem>>, %arg2: memref<128x1024xbf16, #tpu.memory_space<vmem>>, %arg3: memref<1x1024xf32, #tpu.memory_space<vmem>>, %arg4: memref<512x768xbf16, #tpu.memory_space<vmem>>, %arg5: memref<1x768xf32, #tpu.memory_space<vmem>>, %arg6: memref<512x128xbf16, #tpu.memory_space<vmem>>, %arg7: memref<1x128xf32, #tpu.memory_space<vmem>>, %arg8: memref<2x768xf32, #tpu.memory_space<vmem>>) attributes {dimension_semantics = [#tpu.dimension_semantics<arbitrary>], iteration_bounds = array<i64: 1>, scalar_prefetch = 0 : i64, scratch_operands = 0 : i64, tpu.core_type = #tpu.core_type<tc>, window_params = [{pipeline_mode = #tpu.pipeline_mode<synchronous>, transform_indices = @transform_0, window_bounds = array<i64: 2, 128>}, {pipeline_mode = #tpu.pipeline_mode<synchronous>, transform_indices = @transform_1, window_bounds = array<i64: 128, 1024>}, {pipeline_mode = #tpu.pipeline_mode<synchronous>, transform_indices = @transform_2, window_bounds = array<i64: 1, 1024>}, {pipeline_mode = #tpu.pipeline_mode<synchronous>, transform_indices = @transform_3, window_bounds = array<i64: 512, 768>}, {pipeline_mode = #tpu.pipeline_mode<synchronous>, transform_indices = @transform_4, window_bounds = array<i64: 1, 768>}, {pipeline_mode = #tpu.pipeline_mode<synchronous>, transform_indices = @transform_5, window_bounds = array<i64: 512, 128>}, {pipeline_mode = #tpu.pipeline_mode<synchronous>, transform_indices = @transform_6, window_bounds = array<i64: 1, 128>}, {pipeline_mode = #tpu.pipeline_mode<synchronous>, transform_indices = @transform_7, window_bounds = array<i64: 2, 768>}]} {
    %c0 = arith.constant 0 : index
    %c0_0 = arith.constant 0 : index
    %0 = vector.load %arg1[%c0, %c0_0] : memref<2x128xbf16, #tpu.memory_space<vmem>>, vector<2x128xbf16>
    %c0_1 = arith.constant 0 : index
    %c0_2 = arith.constant 0 : index
    %1 = vector.load %arg2[%c0_1, %c0_2] : memref<128x1024xbf16, #tpu.memory_space<vmem>>, vector<128x1024xbf16>
    %cst = arith.constant dense<0.000000e+00> : vector<2x1024xf32>
    %2 = tpu.matmul %0, %1, %cst {dimension_numbers = #tpu.dot_dimension_numbers<[1], [0], [0], [1], [0, 0, 1, 1], [], []>} : vector<2x128xbf16>, vector<128x1024xbf16>, vector<2x1024xf32> -> vector<2x1024xf32>
    %c0_3 = arith.constant 0 : index
    %c0_4 = arith.constant 0 : index
    %3 = vector.load %arg3[%c0_3, %c0_4] : memref<1x1024xf32, #tpu.memory_space<vmem>>, vector<1x1024xf32>
    %4 = vector.broadcast %3 : vector<1x1024xf32> to vector<2x1024xf32>
    %5 = arith.addf %2, %4 : vector<2x1024xf32>
    %cst_5 = arith.constant 0.000000e+00 : f32
    %6 = vector.broadcast %cst_5 : f32 to vector<2x1024xf32>
    %7 = arith.maximumf %5, %6 : vector<2x1024xf32>
    %8 = arith.truncf %7 : vector<2x1024xf32> to vector<2x1024xbf16>
    %9 = vector.extract_strided_slice %8 {offsets = [0, 0], sizes = [2, 512], strides = [1, 1]} : vector<2x1024xbf16> to vector<2x512xbf16>
    %10 = vector.extract_strided_slice %8 {offsets = [0, 512], sizes = [2, 512], strides = [1, 1]} : vector<2x1024xbf16> to vector<2x512xbf16>
    %c0_6 = arith.constant 0 : index
    %c0_7 = arith.constant 0 : index
    %11 = vector.load %arg4[%c0_6, %c0_7] : memref<512x768xbf16, #tpu.memory_space<vmem>>, vector<512x768xbf16>
    %cst_8 = arith.constant dense<0.000000e+00> : vector<2x768xf32>
    %12 = tpu.matmul %9, %11, %cst_8 {dimension_numbers = #tpu.dot_dimension_numbers<[1], [0], [0], [1], [0, 0, 1, 1], [], []>} : vector<2x512xbf16>, vector<512x768xbf16>, vector<2x768xf32> -> vector<2x768xf32>
    %c0_9 = arith.constant 0 : index
    %c0_10 = arith.constant 0 : index
    %13 = vector.load %arg5[%c0_9, %c0_10] : memref<1x768xf32, #tpu.memory_space<vmem>>, vector<1x768xf32>
    %14 = vector.broadcast %13 : vector<1x768xf32> to vector<2x768xf32>
    %15 = arith.addf %12, %14 : vector<2x768xf32>
    %c0_11 = arith.constant 0 : index
    %c0_12 = arith.constant 0 : index
    %16 = vector.load %arg6[%c0_11, %c0_12] : memref<512x128xbf16, #tpu.memory_space<vmem>>, vector<512x128xbf16>
    %cst_13 = arith.constant dense<0.000000e+00> : vector<2x128xf32>
    %17 = tpu.matmul %10, %16, %cst_13 {dimension_numbers = #tpu.dot_dimension_numbers<[1], [0], [0], [1], [0, 0, 1, 1], [], []>} : vector<2x512xbf16>, vector<512x128xbf16>, vector<2x128xf32> -> vector<2x128xf32>
    %c0_14 = arith.constant 0 : index
    %c0_15 = arith.constant 0 : index
    %18 = vector.load %arg7[%c0_14, %c0_15] : memref<1x128xf32, #tpu.memory_space<vmem>>, vector<1x128xf32>
    %19 = vector.broadcast %18 : vector<1x128xf32> to vector<2x128xf32>
    %20 = arith.addf %17, %19 : vector<2x128xf32>
    %21 = vector.extract_strided_slice %15 {offsets = [0, 0], sizes = [2, 128], strides = [1, 1]} : vector<2x768xf32> to vector<2x128xf32>
    %22 = vector.extract_strided_slice %15 {offsets = [0, 128], sizes = [2, 128], strides = [1, 1]} : vector<2x768xf32> to vector<2x128xf32>
    %23 = vector.extract_strided_slice %15 {offsets = [0, 256], sizes = [2, 128], strides = [1, 1]} : vector<2x768xf32> to vector<2x128xf32>
    %24 = vector.extract_strided_slice %15 {offsets = [0, 384], sizes = [2, 128], strides = [1, 1]} : vector<2x768xf32> to vector<2x128xf32>
    %25 = vector.extract_strided_slice %15 {offsets = [0, 512], sizes = [2, 128], strides = [1, 1]} : vector<2x768xf32> to vector<2x128xf32>
    %26 = vector.extract_strided_slice %15 {offsets = [0, 640], sizes = [2, 128], strides = [1, 1]} : vector<2x768xf32> to vector<2x128xf32>
    %27 = arith.addf %21, %22 : vector<2x128xf32>
    %28 = arith.addf %27, %23 : vector<2x128xf32>
    %29 = arith.addf %28, %24 : vector<2x128xf32>
    %30 = arith.addf %29, %25 : vector<2x128xf32>
    %31 = arith.addf %30, %26 : vector<2x128xf32>
    %cst_16 = arith.constant 0.166666672 : f32
    %32 = vector.broadcast %cst_16 : f32 to vector<2x128xf32>
    %33 = arith.mulf %31, %32 : vector<2x128xf32>
    %34 = tpu.iota {dimensions = array<i32: 1>} : vector<2x128xi32>
    %c51_i32 = arith.constant 51 : i32
    %35 = vector.broadcast %c51_i32 : i32 to vector<2x128xi32>
    %36 = arith.cmpi slt, %34, %35 : vector<2x128xi32>
    %37 = arith.subf %21, %33 : vector<2x128xf32>
    %38 = arith.addf %37, %20 : vector<2x128xf32>
    %cst_17 = arith.constant -1.000000e+30 : f32
    %39 = vector.broadcast %cst_17 : f32 to vector<2x128xf32>
    %40 = arith.select %36, %38, %39 : vector<2x128xi1>, vector<2x128xf32>
    %cst_18 = arith.constant dense<0xFF800000> : vector<2xf32>
    %41 = vector.multi_reduction <maximumf>, %40, %cst_18 [1] : vector<2x128xf32> to vector<2xf32>
    %42 = vector.shape_cast %41 : vector<2xf32> to vector<2x1xf32>
    %43 = vector.broadcast %42 : vector<2x1xf32> to vector<2x128xf32>
    %44 = arith.subf %40, %43 : vector<2x128xf32>
    %45 = math.exp %44 : vector<2x128xf32>
    %cst_19 = arith.constant dense<0.000000e+00> : vector<2xf32>
    %46 = vector.multi_reduction <add>, %45, %cst_19 [1] : vector<2x128xf32> to vector<2xf32>
    %47 = vector.shape_cast %46 : vector<2xf32> to vector<2x1xf32>
    %48 = vector.broadcast %47 : vector<2x1xf32> to vector<2x128xf32>
    %49 = arith.divf %45, %48 : vector<2x128xf32>
    %c0_20 = arith.constant 0 : index
    %c0_21 = arith.constant 0 : index
    %50 = vector.load %arg8[%c0_20, %c0_21] : memref<2x768xf32, #tpu.memory_space<vmem>>, vector<2x128xf32>
    tpu.vector_store %arg8[%c0_20, %c0_21], %49 {strides = array<i32>} : memref<2x768xf32, #tpu.memory_space<vmem>>, vector<2x128xf32>,
    %51 = arith.subf %22, %33 : vector<2x128xf32>
    %52 = arith.addf %51, %20 : vector<2x128xf32>
    %cst_22 = arith.constant -1.000000e+30 : f32
    %53 = vector.broadcast %cst_22 : f32 to vector<2x128xf32>
    %54 = arith.select %36, %52, %53 : vector<2x128xi1>, vector<2x128xf32>
    %cst_23 = arith.constant dense<0xFF800000> : vector<2xf32>
    %55 = vector.multi_reduction <maximumf>, %54, %cst_23 [1] : vector<2x128xf32> to vector<2xf32>
    %56 = vector.shape_cast %55 : vector<2xf32> to vector<2x1xf32>
    %57 = vector.broadcast %56 : vector<2x1xf32> to vector<2x128xf32>
    %58 = arith.subf %54, %57 : vector<2x128xf32>
    %59 = math.exp %58 : vector<2x128xf32>
    %cst_24 = arith.constant dense<0.000000e+00> : vector<2xf32>
    %60 = vector.multi_reduction <add>, %59, %cst_24 [1] : vector<2x128xf32> to vector<2xf32>
    %61 = vector.shape_cast %60 : vector<2xf32> to vector<2x1xf32>
    %62 = vector.broadcast %61 : vector<2x1xf32> to vector<2x128xf32>
    %63 = arith.divf %59, %62 : vector<2x128xf32>
    %c0_25 = arith.constant 0 : index
    %c128 = arith.constant 128 : index
    %64 = vector.load %arg8[%c0_25, %c128] : memref<2x768xf32, #tpu.memory_space<vmem>>, vector<2x128xf32>
    tpu.vector_store %arg8[%c0_25, %c128], %63 {strides = array<i32>} : memref<2x768xf32, #tpu.memory_space<vmem>>, vector<2x128xf32>,
    %65 = arith.subf %23, %33 : vector<2x128xf32>
    %66 = arith.addf %65, %20 : vector<2x128xf32>
    %cst_26 = arith.constant -1.000000e+30 : f32
    %67 = vector.broadcast %cst_26 : f32 to vector<2x128xf32>
    %68 = arith.select %36, %66, %67 : vector<2x128xi1>, vector<2x128xf32>
    %cst_27 = arith.constant dense<0xFF800000> : vector<2xf32>
    %69 = vector.multi_reduction <maximumf>, %68, %cst_27 [1] : vector<2x128xf32> to vector<2xf32>
    %70 = vector.shape_cast %69 : vector<2xf32> to vector<2x1xf32>
    %71 = vector.broadcast %70 : vector<2x1xf32> to vector<2x128xf32>
    %72 = arith.subf %68, %71 : vector<2x128xf32>
    %73 = math.exp %72 : vector<2x128xf32>
    %cst_28 = arith.constant dense<0.000000e+00> : vector<2xf32>
    %74 = vector.multi_reduction <add>, %73, %cst_28 [1] : vector<2x128xf32> to vector<2xf32>
    %75 = vector.shape_cast %74 : vector<2xf32> to vector<2x1xf32>
    %76 = vector.broadcast %75 : vector<2x1xf32> to vector<2x128xf32>
    %77 = arith.divf %73, %76 : vector<2x128xf32>
    %c0_29 = arith.constant 0 : index
    %c256 = arith.constant 256 : index
    %78 = vector.load %arg8[%c0_29, %c256] : memref<2x768xf32, #tpu.memory_space<vmem>>, vector<2x128xf32>
    tpu.vector_store %arg8[%c0_29, %c256], %77 {strides = array<i32>} : memref<2x768xf32, #tpu.memory_space<vmem>>, vector<2x128xf32>,
    %79 = arith.subf %24, %33 : vector<2x128xf32>
    %80 = arith.addf %79, %20 : vector<2x128xf32>
    %cst_30 = arith.constant -1.000000e+30 : f32
    %81 = vector.broadcast %cst_30 : f32 to vector<2x128xf32>
    %82 = arith.select %36, %80, %81 : vector<2x128xi1>, vector<2x128xf32>
    %cst_31 = arith.constant dense<0xFF800000> : vector<2xf32>
    %83 = vector.multi_reduction <maximumf>, %82, %cst_31 [1] : vector<2x128xf32> to vector<2xf32>
    %84 = vector.shape_cast %83 : vector<2xf32> to vector<2x1xf32>
    %85 = vector.broadcast %84 : vector<2x1xf32> to vector<2x128xf32>
    %86 = arith.subf %82, %85 : vector<2x128xf32>
    %87 = math.exp %86 : vector<2x128xf32>
    %cst_32 = arith.constant dense<0.000000e+00> : vector<2xf32>
    %88 = vector.multi_reduction <add>, %87, %cst_32 [1] : vector<2x128xf32> to vector<2xf32>
    %89 = vector.shape_cast %88 : vector<2xf32> to vector<2x1xf32>
    %90 = vector.broadcast %89 : vector<2x1xf32> to vector<2x128xf32>
    %91 = arith.divf %87, %90 : vector<2x128xf32>
    %c0_33 = arith.constant 0 : index
    %c384 = arith.constant 384 : index
    %92 = vector.load %arg8[%c0_33, %c384] : memref<2x768xf32, #tpu.memory_space<vmem>>, vector<2x128xf32>
    tpu.vector_store %arg8[%c0_33, %c384], %91 {strides = array<i32>} : memref<2x768xf32, #tpu.memory_space<vmem>>, vector<2x128xf32>,
    %93 = arith.subf %25, %33 : vector<2x128xf32>
    %94 = arith.addf %93, %20 : vector<2x128xf32>
    %cst_34 = arith.constant -1.000000e+30 : f32
    %95 = vector.broadcast %cst_34 : f32 to vector<2x128xf32>
    %96 = arith.select %36, %94, %95 : vector<2x128xi1>, vector<2x128xf32>
    %cst_35 = arith.constant dense<0xFF800000> : vector<2xf32>
    %97 = vector.multi_reduction <maximumf>, %96, %cst_35 [1] : vector<2x128xf32> to vector<2xf32>
    %98 = vector.shape_cast %97 : vector<2xf32> to vector<2x1xf32>
    %99 = vector.broadcast %98 : vector<2x1xf32> to vector<2x128xf32>
    %100 = arith.subf %96, %99 : vector<2x128xf32>
    %101 = math.exp %100 : vector<2x128xf32>
    %cst_36 = arith.constant dense<0.000000e+00> : vector<2xf32>
    %102 = vector.multi_reduction <add>, %101, %cst_36 [1] : vector<2x128xf32> to vector<2xf32>
    %103 = vector.shape_cast %102 : vector<2xf32> to vector<2x1xf32>
    %104 = vector.broadcast %103 : vector<2x1xf32> to vector<2x128xf32>
    %105 = arith.divf %101, %104 : vector<2x128xf32>
    %c0_37 = arith.constant 0 : index
    %c512 = arith.constant 512 : index
    %106 = vector.load %arg8[%c0_37, %c512] : memref<2x768xf32, #tpu.memory_space<vmem>>, vector<2x128xf32>
    tpu.vector_store %arg8[%c0_37, %c512], %105 {strides = array<i32>} : memref<2x768xf32, #tpu.memory_space<vmem>>, vector<2x128xf32>,
    %107 = arith.subf %26, %33 : vector<2x128xf32>
    %108 = arith.addf %107, %20 : vector<2x128xf32>
    %cst_38 = arith.constant -1.000000e+30 : f32
    %109 = vector.broadcast %cst_38 : f32 to vector<2x128xf32>
    %110 = arith.select %36, %108, %109 : vector<2x128xi1>, vector<2x128xf32>
    %cst_39 = arith.constant dense<0xFF800000> : vector<2xf32>
    %111 = vector.multi_reduction <maximumf>, %110, %cst_39 [1] : vector<2x128xf32> to vector<2xf32>
    %112 = vector.shape_cast %111 : vector<2xf32> to vector<2x1xf32>
    %113 = vector.broadcast %112 : vector<2x1xf32> to vector<2x128xf32>
    %114 = arith.subf %110, %113 : vector<2x128xf32>
    %115 = math.exp %114 : vector<2x128xf32>
    %cst_40 = arith.constant dense<0.000000e+00> : vector<2xf32>
    %116 = vector.multi_reduction <add>, %115, %cst_40 [1] : vector<2x128xf32> to vector<2xf32>
    %117 = vector.shape_cast %116 : vector<2xf32> to vector<2x1xf32>
    %118 = vector.broadcast %117 : vector<2x1xf32> to vector<2x128xf32>
    %119 = arith.divf %115, %118 : vector<2x128xf32>
    %c0_41 = arith.constant 0 : index
    %c640 = arith.constant 640 : index
    %120 = vector.load %arg8[%c0_41, %c640] : memref<2x768xf32, #tpu.memory_space<vmem>>, vector<2x128xf32>
    tpu.vector_store %arg8[%c0_41, %c640], %119 {strides = array<i32>} : memref<2x768xf32, #tpu.memory_space<vmem>>, vector<2x128xf32>,
    return
  }
  func.func @transform_0(%arg0: i32) -> (i32, i32) {
    %c0_i32 = arith.constant 0 : i32
    %c0_i32_0 = arith.constant 0 : i32
    %c0_i32_1 = arith.constant 0 : i32
    return %c0_i32, %c0_i32_0 : i32, i32
  }
  func.func @transform_1(%arg0: i32) -> (i32, i32) {
    %c0_i32 = arith.constant 0 : i32
    %c0_i32_0 = arith.constant 0 : i32
    %c0_i32_1 = arith.constant 0 : i32
    return %c0_i32, %c0_i32_0 : i32, i32
  }
  func.func @transform_2(%arg0: i32) -> (i32, i32) {
    %c0_i32 = arith.constant 0 : i32
    %c0_i32_0 = arith.constant 0 : i32
    %c0_i32_1 = arith.constant 0 : i32
    return %c0_i32, %c0_i32_0 : i32, i32
  }
  func.func @transform_3(%arg0: i32) -> (i32, i32) {
    %c0_i32 = arith.constant 0 : i32
    %c0_i32_0 = arith.constant 0 : i32
    %c0_i32_1 = arith.constant 0 : i32
    return %c0_i32, %c0_i32_0 : i32, i32
  }
  func.func @transform_4(%arg0: i32) -> (i32, i32) {
    %c0_i32 = arith.constant 0 : i32
    %c0_i32_0 = arith.constant 0 : i32
    %c0_i32_1 = arith.constant 0 : i32
    return %c0_i32, %c0_i32_0 : i32, i32
  }
  func.func @transform_5(%arg0: i32) -> (i32, i32) {
    %c0_i32 = arith.constant 0 : i32
    %c0_i32_0 = arith.constant 0 : i32
    %c0_i32_1 = arith.constant 0 : i32
    return %c0_i32, %c0_i32_0 : i32, i32
  }
  func.func @transform_6(%arg0: i32) -> (i32, i32) {
    %c0_i32 = arith.constant 0 : i32
    %c0_i32_0 = arith.constant 0 : i32
    %c0_i32_1 = arith.constant 0 : i32
    return %c0_i32, %c0_i32_0 : i32, i32
  }
  func.func @transform_7(%arg0: i32) -> (i32, i32) {
    %c0_i32 = arith.constant 0 : i32
    %c0_i32_0 = arith.constant 0 : i32
    %c0_i32_1 = arith.constant 0 : i32
    return %c0_i32, %c0_i32_0 : i32, i32
  }
}

module attributes {stable_mosaic.version = 11 : i64} {
  func.func @_matmul_bias_kernel(%arg0: i32, %arg1: memref<2x1152xbf16, #tpu.memory_space<vmem>>, %arg2: memref<1152x128xbf16, #tpu.memory_space<vmem>>, %arg3: memref<1x128xf32, #tpu.memory_space<vmem>>, %arg4: memref<2x128xbf16, #tpu.memory_space<vmem>>) attributes {dimension_semantics = [#tpu.dimension_semantics<parallel>], iteration_bounds = array<i64: 1>, scalar_prefetch = 0 : i64, scratch_operands = 0 : i64, tpu.core_type = #tpu.core_type<tc>, window_params = [{transform_indices = @transform_0, window_bounds = array<i64: 2, 1152>}, {pipeline_mode = #tpu.pipeline_mode<synchronous>, transform_indices = @transform_1, window_bounds = array<i64: 1152, 128>}, {pipeline_mode = #tpu.pipeline_mode<synchronous>, transform_indices = @transform_2, window_bounds = array<i64: 1, 128>}, {transform_indices = @transform_3, window_bounds = array<i64: 2, 128>}]} {
    %c0 = arith.constant 0 : index
    %c0_0 = arith.constant 0 : index
    %0 = vector.load %arg1[%c0, %c0_0] : memref<2x1152xbf16, #tpu.memory_space<vmem>>, vector<2x1152xbf16>
    %c0_1 = arith.constant 0 : index
    %c0_2 = arith.constant 0 : index
    %1 = vector.load %arg2[%c0_1, %c0_2] : memref<1152x128xbf16, #tpu.memory_space<vmem>>, vector<1152x128xbf16>
    %cst = arith.constant dense<0.000000e+00> : vector<2x128xf32>
    %2 = tpu.matmul %0, %1, %cst {dimension_numbers = #tpu.dot_dimension_numbers<[1], [0], [0], [1], [0, 0, 1, 1], [], []>} : vector<2x1152xbf16>, vector<1152x128xbf16>, vector<2x128xf32> -> vector<2x128xf32>
    %c0_3 = arith.constant 0 : index
    %c0_4 = arith.constant 0 : index
    %3 = vector.load %arg3[%c0_3, %c0_4] : memref<1x128xf32, #tpu.memory_space<vmem>>, vector<1x128xf32>
    %4 = vector.broadcast %3 : vector<1x128xf32> to vector<2x128xf32>
    %5 = arith.addf %2, %4 : vector<2x128xf32>
    %cst_5 = arith.constant 0.000000e+00 : f32
    %6 = vector.broadcast %cst_5 : f32 to vector<2x128xf32>
    %7 = arith.maximumf %5, %6 : vector<2x128xf32>
    %8 = arith.truncf %7 : vector<2x128xf32> to vector<2x128xbf16>
    %c0_6 = arith.constant 0 : index
    %c0_7 = arith.constant 0 : index
    %9 = vector.load %arg4[%c0_6, %c0_7] : memref<2x128xbf16, #tpu.memory_space<vmem>>, vector<2x128xbf16>
    tpu.vector_store %arg4[%c0_6, %c0_7], %8 {strides = array<i32>} : memref<2x128xbf16, #tpu.memory_space<vmem>>, vector<2x128xbf16>,
    return
  }
  func.func @transform_0(%arg0: i32) -> (i32, i32) {
    %c0_i32 = arith.constant 0 : i32
    %c0_i32_0 = arith.constant 0 : i32
    return %arg0, %c0_i32 : i32, i32
  }
  func.func @transform_1(%arg0: i32) -> (i32, i32) {
    %c0_i32 = arith.constant 0 : i32
    %c0_i32_0 = arith.constant 0 : i32
    %c0_i32_1 = arith.constant 0 : i32
    return %c0_i32, %c0_i32_0 : i32, i32
  }
  func.func @transform_2(%arg0: i32) -> (i32, i32) {
    %c0_i32 = arith.constant 0 : i32
    %c0_i32_0 = arith.constant 0 : i32
    %c0_i32_1 = arith.constant 0 : i32
    return %c0_i32, %c0_i32_0 : i32, i32
  }
  func.func @transform_3(%arg0: i32) -> (i32, i32) {
    %c0_i32 = arith.constant 0 : i32
    %c0_i32_0 = arith.constant 0 : i32
    return %arg0, %c0_i32 : i32, i32
  }
}

</mosaic_0001>

<bundles_post_ra>
// kernel: rainbow_forward.4
= control target key start
LH: loop header
LB: loop body
LE: loop exit
PB: predicated region body
PF: predicated region fallthrough
CT: control target
= control target key end

     0   :  { %s796_s1 = inlined_call_operand.vmem [shape: bf16[256,128], index: 1, kind: input, shape index: {}]   ;;  %s797_s0 = inlined_call_operand.vmem [shape: f32[128,256], index: 0, kind: input, shape index: {}]   ;;  %s798_s2 = inlined_call_operand.vmem [shape: f32[1,128], index: 2, kind: input, shape index: {}]   ;;  %s799_s3 = inlined_call_operand.vmem [shape: bf16[128,128], index: 3, kind: output, shape index: {}]  }
   0x1   :  { %v571_v0 = vld [vmem:[%s796_s1 + $0x40] sm:$0xff]   ;;  %v573_v2 = vld [vmem:[%s796_s1 + $0x48] sm:$0xff]   ;;  %v575_v4 = vld [vmem:[%s796_s1 + $0x50] sm:$0xff]  }
   0x2   :  { %v572_v1 = vld [vmem:[%s796_s1] sm:$0xff]   ;;  %491 = vmatprep.subr.bf16.mxu0 %v571_v0  ;;  %555 = vmatprep.subr.bf16.mxu1 %v571_v0  ;;  %v574_v3 = vld [vmem:[%s796_s1 + $0x8] sm:$0xff]   ;;  %v576_v5 = vld [vmem:[%s796_s1 + $0x10] sm:$0xff]  }
   0x3   :  { %492 = vmatpush3.bf16.msra.mxu0 %v572_v1  ;;  %563 = vmatpush3.bf16.msra.mxu1 %v572_v1  ;;  %v577_v6 = vld [vmem:[%s796_s1 + $0x58] sm:$0xff]   ;;  %v579_v8 = vld [vmem:[%s796_s1 + $0x60] sm:$0xff]   ;;  %v581_v10 = vld [vmem:[%s796_s1 + $0x68] sm:$0xff]  }
   0x4   :  { %493 = vmatprep.subr.bf16.mxu0 %v573_v2  ;;  %556 = vmatprep.subr.bf16.mxu1 %v573_v2  ;;  %v578_v7 = vld [vmem:[%s796_s1 + $0x18] sm:$0xff]   ;;  %v580_v9 = vld [vmem:[%s796_s1 + $0x20] sm:$0xff]   ;;  %v16_v11 = vld [vmem:[%s797_s0 + $0x8] sm:$0xff] }
   0x5   :  { %v18_v12 = vld [vmem:[%s797_s0 + $0x18] sm:$0xff]  ;;  %v32_v13 = vld [vmem:[%s797_s0 + $0x88] sm:$0xff]  ;;  %v583_v18 = vld [vmem:[%s796_s1 + $0x70] sm:$0xff]  }
   0x6   :  { %v48_v14 = vpack.c.bf16 %v18_v12, %v16_v11  ;;  %v34_v15 = vld [vmem:[%s797_s0 + $0x98] sm:$0xff]  ;;  %v582_v17 = vld [vmem:[%s796_s1 + $0x28] sm:$0xff]   ;;  %v584_v19 = vld [vmem:[%s796_s1 + $0x30] sm:$0xff]  }
   0x7   :  { %494 = vmatpush3.bf16.msra.mxu0 %v574_v3  ;;  %564 = vmatpush3.bf16.msra.mxu1 %v574_v3  ;;  %v56_v16 = vpack.c.bf16 %v34_v15, %v32_v13  ;;  %v585_v20 = vld [vmem:[%s796_s1 + $0x78] sm:$0xff]   ;;  %v15_v22 = vld [vmem:[%s797_s0] sm:$0xff]  ;;  %v17_v23 = vld [vmem:[%s797_s0 + $0x10] sm:$0xff] }
   0x8   :  { %495 = vmatprep.subr.bf16.mxu0 %v575_v4  ;;  %557 = vmatprep.subr.bf16.mxu1 %v575_v4  ;;  %v586_v21 = vld [vmem:[%s796_s1 + $0x38] sm:$0xff]   ;;  %v31_v24 = vld [vmem:[%s797_s0 + $0x80] sm:$0xff]  ;;  %v33_v25 = vld [vmem:[%s797_s0 + $0x90] sm:$0xff]  ;;  %v47_v30 = vpack.c.bf16 %v17_v23, %v15_v22 }
   0x9   :  { %230 = vmatprep.mubr.bf16.mxu0 %v48_v14  ;;  %262 = vmatprep.mubr.bf16.mxu1 %v56_v16  ;;  %v20_v26 = vld [vmem:[%s797_s0 + $0x28] sm:$0xff]  ;;  %v22_v27 = vld [vmem:[%s797_s0 + $0x38] sm:$0xff]  ;;  %v55_v31 = vpack.c.bf16 %v33_v25, %v31_v24  ;;  %v19_v34 = vld [vmem:[%s797_s0 + $0x20] sm:$0xff] }
   0xa   :  { %v36_v28 = vld [vmem:[%s797_s0 + $0xa8] sm:$0xff]  ;;  %v38_v29 = vld [vmem:[%s797_s0 + $0xb8] sm:$0xff]  ;;  %v50_v32 = vpack.c.bf16 %v22_v27, %v20_v26  ;;  %v21_v35 = vld [vmem:[%s797_s0 + $0x30] sm:$0xff] }
   0xb   :  { %496 = vmatpush3.bf16.msra.mxu0 %v576_v5  ;;  %565 = vmatpush3.bf16.msra.mxu1 %v576_v5  ;;  %v58_v33 = vpack.c.bf16 %v38_v29, %v36_v28  ;;  %v35_v36 = vld [vmem:[%s797_s0 + $0xa0] sm:$0xff]  ;;  %v37_v37 = vld [vmem:[%s797_s0 + $0xb0] sm:$0xff]  ;;  %v24_v38 = vld [vmem:[%s797_s0 + $0x48] sm:$0xff]  ;;  %v49_v42 = vpack.c.bf16 %v21_v35, %v19_v34 }
   0xc   :  { %497 = vmatprep.subr.bf16.mxu0 %v577_v6  ;;  %558 = vmatprep.subr.bf16.mxu1 %v577_v6  ;;  %v26_v39 = vld [vmem:[%s797_s0 + $0x58] sm:$0xff]  ;;  %v40_v40 = vld [vmem:[%s797_s0 + $0xc8] sm:$0xff]  ;;  %v57_v43 = vpack.c.bf16 %v37_v37, %v35_v36  ;;  %v23_v46 = vld [vmem:[%s797_s0 + $0x40] sm:$0xff] }
   0xd   :  { %v42_v41 = vld [vmem:[%s797_s0 + $0xd8] sm:$0xff]  ;;  %v52_v44 = vpack.c.bf16 %v26_v39, %v24_v38  ;;  %v25_v47 = vld [vmem:[%s797_s0 + $0x50] sm:$0xff]  ;;  %v39_v48 = vld [vmem:[%s797_s0 + $0xc0] sm:$0xff] }
   0xe   :  { %v60_v45 = vpack.c.bf16 %v42_v41, %v40_v40  ;;  %v41_v49 = vld [vmem:[%s797_s0 + $0xd0] sm:$0xff]  ;;  %v28_v50 = vld [vmem:[%s797_s0 + $0x68] sm:$0xff]  ;;  %v30_v51 = vld [vmem:[%s797_s0 + $0x78] sm:$0xff]  ;;  %v51_v54 = vpack.c.bf16 %v25_v47, %v23_v46 }
   0xf   :  { %498 = vmatpush3.bf16.msra.mxu0 %v578_v7  ;;  %566 = vmatpush3.bf16.msra.mxu1 %v578_v7  ;;  %v44_v52 = vld [vmem:[%s797_s0 + $0xe8] sm:$0xff]  ;;  %v46_v53 = vld [vmem:[%s797_s0 + $0xf8] sm:$0xff]  ;;  %v59_v55 = vpack.c.bf16 %v41_v49, %v39_v48  ;;  %v54_v56 = vpack.c.bf16 %v30_v51, %v28_v50  ;;  %v27_v58 = vld [vmem:[%s797_s0 + $0x60] sm:$0xff] }
  0x10   :  { %499 = vmatprep.subr.bf16.mxu0 %v579_v8  ;;  %559 = vmatprep.subr.bf16.mxu1 %v579_v8  ;;  %v62_v57 = vpack.c.bf16 %v46_v53, %v44_v52  ;;  %v29_v59 = vld [vmem:[%s797_s0 + $0x70] sm:$0xff]  ;;  %v43_v60 = vld [vmem:[%s797_s0 + $0xe0] sm:$0xff] }
  0x11   :  { %v45_v61 = vld [vmem:[%s797_s0 + $0xf0] sm:$0xff]  ;;  %v53_v62 = vpack.c.bf16 %v29_v59, %v27_v58  ;;  %v754_v2 = vld [vmem:[%s798_s2] ss:$0 sm:$0xff] }
  0x12   :  { %v61_v63 = vpack.c.bf16 %v45_v61, %v43_v60 }
  0x13   :  { %500 = vmatpush3.bf16.msra.mxu0 %v580_v9  ;;  %567 = vmatpush3.bf16.msra.mxu1 %v580_v9 }
  0x14   :  { %501 = vmatprep.subr.bf16.mxu0 %v581_v10  ;;  %560 = vmatprep.subr.bf16.mxu1 %v581_v10 }
  0x17   :  { %502 = vmatpush3.bf16.msra.mxu0 %v582_v17  ;;  %568 = vmatpush3.bf16.msra.mxu1 %v582_v17 }
  0x18   :  { %503 = vmatprep.subr.bf16.mxu0 %v583_v18  ;;  %561 = vmatprep.subr.bf16.mxu1 %v583_v18 }
  0x1b   :  { %504 = vmatpush3.bf16.msra.mxu0 %v584_v19  ;;  %569 = vmatpush3.bf16.msra.mxu1 %v584_v19 }
  0x1c   :  { %505 = vmatprep.subr.bf16.mxu0 %v585_v20  ;;  %562 = vmatprep.subr.bf16.mxu1 %v585_v20 }
  0x1f   :  { %506 = vmatpush3.bf16.msra.mxu0 %v586_v21  ;;  %570 = vmatpush3.bf16.msra.mxu1 %v586_v21 }
  0x22   :  { %231 = vmatmul.mubr.bf16.vlgmr.msra.gmra.mrb[0].mxu0 %v47_v30  ;;  %263 = vmatmul.mubr.bf16.vlgmr.msra.gmra.mrb[0].mxu1 %v55_v31 }
  0x23   :  { %238 = vmatprep.mubr.bf16.mxu0 %v50_v32  ;;  %270 = vmatprep.mubr.bf16.mxu1 %v58_v33 }
  0x2a   :  { %239 = vmatmul.mubr.bf16.gmra.mrb[4].mxu0 %v49_v42  ;;  %271 = vmatmul.mubr.bf16.gmra.mrb[4].mxu1 %v57_v43 }
  0x2b   :  { %246 = vmatprep.mubr.bf16.mxu0 %v52_v44  ;;  %278 = vmatprep.mubr.bf16.mxu1 %v60_v45 }
  0x32   :  { %247 = vmatmul.mubr.bf16.gmra.mrb[8].mxu0 %v51_v54  ;;  %279 = vmatmul.mubr.bf16.gmra.mrb[8].mxu1 %v59_v55 }
  0x33   :  { %254 = vmatprep.mubr.bf16.mxu0 %v54_v56  ;;  %286 = vmatprep.mubr.bf16.mxu1 %v62_v57 }
  0x3a   :  { %255 = vmatmul.mubr.bf16.gmra.mrb[12].mxu0 %v53_v62  ;;  %287 = vmatmul.mubr.bf16.gmra.mrb[12].mxu1 %v61_v63 }
  0xf5   :  { %v507_v0 = vpop.f32.mrb[0].mxu0  ;;  %v531_v1 = vpop.f32.mrb[0].mxu1 }
  0xf6   :  { %v508_v3 = vpop.f32.mrb[1].mxu0  ;;  %v532_v4 = vpop.f32.mrb[1].mxu1 }
  0xf7   :  { %v509_v5 = vadd.f32 %v508_v3, %v507_v0  ;;  %v533_v6 = vadd.f32 %v532_v4, %v531_v1  ;;  %v510_v7 = vpop.f32.mrb[2].mxu0  ;;  %v534_v8 = vpop.f32.mrb[2].mxu1 }
  0xf8   :  { %v511_v9 = vpop.f32.mrb[3].mxu0  ;;  %v535_v10 = vpop.f32.mrb[3].mxu1 }
  0xf9   :  { %v233_v11 = vadd.f32 %v509_v5, %v754_v2  ;;  %v265_v12 = vadd.f32 %v533_v6, %v754_v2  ;;  %v512_v13 = vadd.f32 %v511_v9, %v510_v7  ;;  %v536_v14 = vadd.f32 %v535_v10, %v534_v8 }
  0xfb   :  { %v236_v15 = vadd.f32 %v512_v13, %v754_v2  ;;  %v268_v16 = vadd.f32 %v536_v14, %v754_v2  ;;  %v295_v17 = vmax.f32 %v233_v11, 0.0  ;;  %v303_v18 = vmax.f32 %v265_v12, 0.0 }
  0xfd   :  { %v296_v19 = vmax.f32 %v236_v15, 0.0  ;;  %v304_v20 = vmax.f32 %v268_v16, 0.0  ;;  %v513_v21 = vpop.f32.mrb[4].mxu0  ;;  %v537_v22 = vpop.f32.mrb[4].mxu1 }
  0xfe   :  { %v514_v23 = vpop.f32.mrb[5].mxu0  ;;  %v538_v24 = vpop.f32.mrb[5].mxu1 }
  0xff   :  { %v447_v25 = vpack.c.bf16 %v296_v19, %v295_v17  ;;  %v467_v26 = vpack.c.bf16 %v304_v20, %v303_v18  ;;  %v515_v27 = vadd.f32 %v514_v23, %v513_v21  ;;  %v539_v28 = vadd.f32 %v538_v24, %v537_v22  ;;  %v516_v29 = vpop.f32.mrb[6].mxu0  ;;  %v540_v30 = vpop.f32.mrb[6].mxu1 }
 0x100   :  { %v517_v31 = vpop.f32.mrb[7].mxu0  ;;  %v541_v32 = vpop.f32.mrb[7].mxu1 }
 0x101   :  { %448 = vst [vmem:[%s799_s3] sm:$0xff] %v447_v25   ;;  %487 = vst [vmem:[%s799_s3 + $0x20] sm:$0xff] %v467_v26   ;;  %v241_v33 = vadd.f32 %v515_v27, %v754_v2  ;;  %v273_v34 = vadd.f32 %v539_v28, %v754_v2  ;;  %v518_v35 = vadd.f32 %v517_v31, %v516_v29 }
 0x102   :  { %v542_v36 = vadd.f32 %v541_v32, %v540_v30 }
 0x103   :  { %v244_v37 = vadd.f32 %v518_v35, %v754_v2  ;;  %v297_v39 = vmax.f32 %v241_v33, 0.0  ;;  %v305_v40 = vmax.f32 %v273_v34, 0.0 }
 0x104   :  { %v276_v38 = vadd.f32 %v542_v36, %v754_v2 }
 0x105   :  { %v298_v41 = vmax.f32 %v244_v37, 0.0  ;;  %v519_v43 = vpop.f32.mrb[8].mxu0  ;;  %v543_v44 = vpop.f32.mrb[8].mxu1 }
 0x106   :  { %v306_v42 = vmax.f32 %v276_v38, 0.0  ;;  %v520_v45 = vpop.f32.mrb[9].mxu0  ;;  %v544_v46 = vpop.f32.mrb[9].mxu1 }
 0x107   :  { %v452_v47 = vpack.c.bf16 %v298_v41, %v297_v39  ;;  %v521_v49 = vadd.f32 %v520_v45, %v519_v43  ;;  %v545_v50 = vadd.f32 %v544_v46, %v543_v44  ;;  %v522_v51 = vpop.f32.mrb[10].mxu0  ;;  %v546_v52 = vpop.f32.mrb[10].mxu1 }
 0x108   :  { %v472_v48 = vpack.c.bf16 %v306_v42, %v305_v40  ;;  %v523_v53 = vpop.f32.mrb[11].mxu0  ;;  %v547_v54 = vpop.f32.mrb[11].mxu1 }
 0x109   :  { %484 = vst [vmem:[%s799_s3 + $0x8] sm:$0xff] %v452_v47   ;;  %v249_v55 = vadd.f32 %v521_v49, %v754_v2  ;;  %v281_v56 = vadd.f32 %v545_v50, %v754_v2  ;;  %v524_v57 = vadd.f32 %v523_v53, %v522_v51  ;;  %v548_v58 = vadd.f32 %v547_v54, %v546_v52 }
 0x10a   :  { %488 = vst [vmem:[%s799_s3 + $0x28] sm:$0xff] %v472_v48  }
 0x10b   :  { %v252_v59 = vadd.f32 %v524_v57, %v754_v2  ;;  %v284_v60 = vadd.f32 %v548_v58, %v754_v2  ;;  %v299_v61 = vmax.f32 %v249_v55, 0.0  ;;  %v307_v62 = vmax.f32 %v281_v56, 0.0 }
 0x10d   :  { %v300_v63 = vmax.f32 %v252_v59, 0.0  ;;  %v308_v0 = vmax.f32 %v284_v60, 0.0  ;;  %v525_v1 = vpop.f32.mrb[12].mxu0  ;;  %v549_v3 = vpop.f32.mrb[12].mxu1 }
 0x10e   :  { %v526_v4 = vpop.f32.mrb[13].mxu0  ;;  %v550_v5 = vpop.f32.mrb[13].mxu1 }
 0x10f   :  { %v457_v6 = vpack.c.bf16 %v300_v63, %v299_v61  ;;  %v477_v7 = vpack.c.bf16 %v308_v0, %v307_v62  ;;  %v527_v8 = vadd.f32 %v526_v4, %v525_v1  ;;  %v551_v9 = vadd.f32 %v550_v5, %v549_v3  ;;  %v528_v10 = vpop.f32.mrb[14].mxu0  ;;  %v552_v11 = vpop.f32.mrb[14].mxu1 }
 0x110   :  { %v529_v12 = vpop.f32.mrb[15].mxu0  ;;  %v553_v13 = vpop.f32.mrb[15].mxu1 }
 0x111   :  { %485 = vst [vmem:[%s799_s3 + $0x10] sm:$0xff] %v457_v6   ;;  %489 = vst [vmem:[%s799_s3 + $0x30] sm:$0xff] %v477_v7   ;;  %v257_v14 = vadd.f32 %v527_v8, %v754_v2  ;;  %v289_v15 = vadd.f32 %v551_v9, %v754_v2  ;;  %v530_v16 = vadd.f32 %v529_v12, %v528_v10 }
 0x112   :  { %v554_v17 = vadd.f32 %v553_v13, %v552_v11 }
 0x113   :  { %v260_v18 = vadd.f32 %v530_v16, %v754_v2  ;;  %v301_v20 = vmax.f32 %v257_v14, 0.0  ;;  %v309_v21 = vmax.f32 %v289_v15, 0.0 }
 0x114   :  { %v292_v19 = vadd.f32 %v554_v17, %v754_v2 }
 0x115   :  { %v302_v22 = vmax.f32 %v260_v18, 0.0 }
 0x116   :  { %v310_v23 = vmax.f32 %v292_v19, 0.0 }
 0x117   :  { %v462_v24 = vpack.c.bf16 %v302_v22, %v301_v20 }
 0x118   :  { %v482_v25 = vpack.c.bf16 %v310_v23, %v309_v21 }
 0x119   :  { %486 = vst [vmem:[%s799_s3 + $0x18] sm:$0xff] %v462_v24  }
 0x11a   :  { %490 = vst [vmem:[%s799_s3 + $0x38] sm:$0xff] %v482_v25  }

// kernel: rainbow_forward.6
= control target key start
LH: loop header
LB: loop body
LE: loop exit
PB: predicated region body
PF: predicated region fallthrough
CT: control target
= control target key end

     0   :  { %v1148_v21 = vmov 1966171168   ;;  %v174_v23 = vlaneseq  ;;  %vm1150_vm0 = vmmov 0   ;;  %s1413_s1 = inlined_call_operand.vmem [shape: bf16[1152,128], index: 1, kind: input, shape index: {}]   ;;  %s1414_s0 = inlined_call_operand.vmem [shape: bf16[2,1152], index: 0, kind: input, shape index: {}]   ;;  %s1415_s2 = inlined_call_operand.vmem [shape: f32[1,128], index: 2, kind: input, shape index: {}]   ;;  %s1416_s3 = inlined_call_operand.vmem [shape: bf16[2,128], index: 3, kind: output, shape index: {}]  }
   0x1   :  { %v1075_v0 = vld [vmem:[%s1413_s1 + $0x40] sm:$0xff]   ;;  %v1079_v4 = vld [vmem:[%s1413_s1 + $0x48] sm:$0xff]   ;;  %v1083_v8 = vld [vmem:[%s1413_s1 + $0x50] sm:$0xff]   ;;  %v172_v22 = vunpack.c.l.s4 %v1148_v21 }
   0x2   :  { %v1076_v1 = vld [vmem:[%s1413_s1] sm:$0xff]   ;;  %955 = vmatprep.subr.bf16.mxu0 %v1075_v0  ;;  %v1080_v5 = vld [vmem:[%s1413_s1 + $0x8] sm:$0xff]   ;;  %v1084_v9 = vld [vmem:[%s1413_s1 + $0x10] sm:$0xff]   ;;  %v175_v29 = vshrl.u32 %v174_v23, 7 }
   0x3   :  { %v1077_v2 = vld [vmem:[%s1413_s1 + $0xc0] sm:$0xff]   ;;  %956 = vmatpush3.bf16.msra.mxu0 %v1076_v1  ;;  %v1081_v6 = vld [vmem:[%s1413_s1 + $0xc8] sm:$0xff]   ;;  %v1085_v10 = vld [vmem:[%s1413_s1 + $0xd0] sm:$0xff]   ;;  %v173_v28 = vunpack.c.0.s8 %v172_v22 }
   0x4   :  { %v1078_v3 = vld [vmem:[%s1413_s1 + $0x80] sm:$0xff]   ;;  %977 = vmatprep.subr.bf16.mxu1 %v1077_v2  ;;  %957 = vmatprep.subr.bf16.mxu0 %v1079_v4  ;;  %v1082_v7 = vld [vmem:[%s1413_s1 + $0x88] sm:$0xff]   ;;  %v1086_v11 = vld [vmem:[%s1413_s1 + $0x90] sm:$0xff]  }
   0x5   :  { %978 = vmatpush3.bf16.msra.mxu1 %v1078_v3  ;;  %v1087_v12 = vld [vmem:[%s1413_s1 + $0x58] sm:$0xff]   ;;  %v1091_v16 = vld [vmem:[%s1413_s1 + $0x60] sm:$0xff]   ;;  %v1095_v20 = vld [vmem:[%s1413_s1 + $0x68] sm:$0xff]   ;;  %v1258_v34 = vsub.s32 %v173_v28, %v175_v29 }
   0x6   :  { %979 = vmatprep.subr.bf16.mxu1 %v1081_v6  ;;  %v1088_v13 = vld [vmem:[%s1413_s1 + $0x18] sm:$0xff]   ;;  %v1092_v17 = vld [vmem:[%s1413_s1 + $0x20] sm:$0xff]   ;;  %v1096_v24 = vld [vmem:[%s1413_s1 + $0x28] sm:$0xff]  }
   0x7   :  { %958 = vmatpush3.bf16.msra.mxu0 %v1080_v5  ;;  %v1089_v14 = vld [vmem:[%s1413_s1 + $0xd8] sm:$0xff]   ;;  %v1093_v18 = vld [vmem:[%s1413_s1 + $0xe0] sm:$0xff]   ;;  %v1097_v25 = vld [vmem:[%s1413_s1 + $0xe8] sm:$0xff]  }
   0x8   :  { %959 = vmatprep.subr.bf16.mxu0 %v1083_v8  ;;  %v1090_v15 = vld [vmem:[%s1413_s1 + $0x98] sm:$0xff]   ;;  %v1094_v19 = vld [vmem:[%s1413_s1 + $0xa0] sm:$0xff]   ;;  %v1098_v26 = vld [vmem:[%s1413_s1 + $0xa8] sm:$0xff]  }
   0x9   :  { %980 = vmatpush3.bf16.msra.mxu1 %v1082_v7  ;;  %v1099_v27 = vld [vmem:[%s1413_s1 + $0x70] sm:$0xff]   ;;  %v1103_v33 = vld [vmem:[%s1413_s1 + $0x78] sm:$0xff]   ;;  %v15_v37 = vld [vmem:[%s1414_s0] sm:$0xff] }
   0xa   :  { %981 = vmatprep.subr.bf16.mxu1 %v1085_v10  ;;  %v1100_v30 = vld [vmem:[%s1413_s1 + $0x30] sm:$0xff]   ;;  %v1104_v35 = vld [vmem:[%s1413_s1 + $0x38] sm:$0xff]   ;;  %v170_v38 = vcombine.high %v15_v37, %v15_v37  ;;  %v177_v39 = vrot.slane %v15_v37, %v1258_v34  ;;  %v1108_v41 = vld [vmem:[%s1413_s1 + $0x140] sm:$0xff]  }
   0xb   :  { %960 = vmatpush3.bf16.msra.mxu0 %v1084_v9  ;;  %v1101_v31 = vld [vmem:[%s1413_s1 + $0xf0] sm:$0xff]   ;;  %v1105_v36 = vld [vmem:[%s1413_s1 + $0xf8] sm:$0xff]   ;;  %v1110_v45 = vld [vmem:[%s1413_s1 + $0x1c0] sm:$0xff]  }
   0xc   :  { %961 = vmatprep.subr.bf16.mxu0 %v1087_v12  ;;  %v1102_v32 = vld [vmem:[%s1413_s1 + $0xb0] sm:$0xff]   ;;  %v1107_v40 = vld [vmem:[%s1413_s1 + $0xb8] sm:$0xff]   ;;  %v185_v42 = vcombine.high %v177_v39, %v177_v39  ;;  %v193_v43 = vrot.slane %v177_v39, %v1258_v34  ;;  %v1278_v44 = vrot.slane %v170_v38, %v1258_v34  ;;  %v1109_v47 = vld [vmem:[%s1413_s1 + $0x100] sm:$0xff]  }
   0xd   :  { %982 = vmatpush3.bf16.msra.mxu1 %v1086_v11  ;;  %v1112_v50 = vld [vmem:[%s1413_s1 + $0x148] sm:$0xff]   ;;  %v1111_v52 = vld [vmem:[%s1413_s1 + $0x180] sm:$0xff]   ;;  %v1116_v57 = vld [vmem:[%s1413_s1 + $0x150] sm:$0xff]  }
   0xe   :  { %983 = vmatprep.subr.bf16.mxu1 %v1089_v14  ;;  %v207_v46 = vrot.slane %v185_v42, %v1258_v34  ;;  %v186_v48 = vcombine.high %v1278_v44, %v1278_v44  ;;  %v215_v49 = vcombine.high %v193_v43, %v193_v43  ;;  %v1114_v54 = vld [vmem:[%s1413_s1 + $0x1c8] sm:$0xff]   ;;  %v1118_v59 = vld [vmem:[%s1413_s1 + $0x1d0] sm:$0xff]   ;;  %v1120_v61 = vld [vmem:[%s1413_s1 + $0x158] sm:$0xff]  }
   0xf   :  { %962 = vmatpush3.bf16.msra.mxu0 %v1088_v13  ;;  %v1113_v55 = vld [vmem:[%s1413_s1 + $0x108] sm:$0xff]   ;;  %v1117_v60 = vld [vmem:[%s1413_s1 + $0x110] sm:$0xff]   ;;  %v1122_v63 = vld [vmem:[%s1413_s1 + $0x1d8] sm:$0xff]  }
  0x10   :  { %963 = vmatprep.subr.bf16.mxu0 %v1091_v16  ;;  %706 = vmatprep.mubr.bf16.mxu0 %v207_v46  ;;  %v217_v51 = vcombine.high %v207_v46, %v207_v46  ;;  %v214_v53 = vrot.slane %v186_v48, %v1258_v34  ;;  %v1115_v58 = vld [vmem:[%s1413_s1 + $0x188] sm:$0xff]   ;;  %v1119_v62 = vld [vmem:[%s1413_s1 + $0x190] sm:$0xff]   ;;  %v1121_v0 = vld [vmem:[%s1413_s1 + $0x118] sm:$0xff]  }
  0x11   :  { %984 = vmatpush3.bf16.msra.mxu1 %v1090_v15  ;;  %v1124_v1 = vld [vmem:[%s1413_s1 + $0x160] sm:$0xff]   ;;  %v1123_v2 = vld [vmem:[%s1413_s1 + $0x198] sm:$0xff]   ;;  %v1128_v5 = vld [vmem:[%s1413_s1 + $0x168] sm:$0xff]  }
  0x12   :  { %985 = vmatprep.subr.bf16.mxu1 %v1093_v18  ;;  %746 = vmatprep.mubr.bf16.mxu1 %v217_v51  ;;  %v218_v56 = vcombine.high %v214_v53, %v214_v53  ;;  %v1126_v3 = vld [vmem:[%s1413_s1 + $0x1e0] sm:$0xff]   ;;  %v1130_v7 = vld [vmem:[%s1413_s1 + $0x1e8] sm:$0xff]   ;;  %v1132_v9 = vld [vmem:[%s1413_s1 + $0x170] sm:$0xff]  }
  0x13   :  { %964 = vmatpush3.bf16.msra.mxu0 %v1092_v17  ;;  %v1125_v4 = vld [vmem:[%s1413_s1 + $0x120] sm:$0xff]   ;;  %v1129_v8 = vld [vmem:[%s1413_s1 + $0x128] sm:$0xff]   ;;  %v1134_v11 = vld [vmem:[%s1413_s1 + $0x1f0] sm:$0xff]   ;;  %v200_v17 = vrot.slane %v1278_v44, %v1258_v34 }
  0x14   :  { %965 = vmatprep.subr.bf16.mxu0 %v1095_v20  ;;  %v1127_v6 = vld [vmem:[%s1413_s1 + $0x1a0] sm:$0xff]   ;;  %v1131_v10 = vld [vmem:[%s1413_s1 + $0x1a8] sm:$0xff]   ;;  %v1133_v12 = vld [vmem:[%s1413_s1 + $0x130] sm:$0xff]   ;;  %v1149_v20 = vmov 0.0  }
  0x15   :  { %986 = vmatpush3.bf16.msra.mxu1 %v1094_v19  ;;  %v1136_v13 = vld [vmem:[%s1413_s1 + $0x178] sm:$0xff]   ;;  %v1135_v14 = vld [vmem:[%s1413_s1 + $0x1b0] sm:$0xff]   ;;  %v1140_v19 = vld [vmem:[%s1413_s1 + $0x200] sm:$0xff]   ;;  %v216_v21 = vcombine.high %v200_v17, %v200_v17 }
  0x16   :  { %987 = vmatprep.subr.bf16.mxu1 %v1097_v25  ;;  %v1138_v15 = vld [vmem:[%s1413_s1 + $0x1f8] sm:$0xff]   ;;  %v1141_v22 = vld [vmem:[%s1413_s1 + $0x208] sm:$0xff]   ;;  %v1142_v25 = vld [vmem:[%s1413_s1 + $0x210] sm:$0xff]  }
  0x17   :  { %966 = vmatpush3.bf16.msra.mxu0 %v1096_v24  ;;  %v1137_v16 = vld [vmem:[%s1413_s1 + $0x138] sm:$0xff]   ;;  %v882_v23 = vld.sshfl [vmem:[%s1414_s0 + $0x8] sm:$0x1 pattern:$0x75316420]  ;;  %v1146_v29 = vld [vmem:[%s1413_s1 + $0x230] sm:$0xff]  }
  0x18   :  { %967 = vmatprep.subr.bf16.mxu0 %v1099_v27  ;;  %v1139_v18 = vld [vmem:[%s1413_s1 + $0x1b8] sm:$0xff]   ;;  %v232_v24 = vrot.slane %v882_v23, %v1258_v34  ;;  %v1144_v27 = vld [vmem:[%s1413_s1 + $0x220] sm:$0xff]   ;;  %v1145_v28 = vld [vmem:[%s1413_s1 + $0x228] sm:$0xff]  }
  0x19   :  { %988 = vmatpush3.bf16.msra.mxu1 %v1098_v26  ;;  %v1143_v26 = vld [vmem:[%s1413_s1 + $0x218] sm:$0xff]  }
  0x1a   :  { %989 = vmatprep.subr.bf16.mxu1 %v1101_v31 }
  0x1b   :  { %968 = vmatpush3.bf16.msra.mxu0 %v1100_v30  ;;  %v1147_v30 = vld [vmem:[%s1413_s1 + $0x238] sm:$0xff]  }
  0x1c   :  { %969 = vmatprep.subr.bf16.mxu0 %v1103_v33 }
  0x1d   :  { %990 = vmatpush3.bf16.msra.mxu1 %v1102_v32  ;;  %v881_v32 = vld [vmem:[%s1415_s2] ss:$0 sm:$0xff] }
  0x1e   :  { %991 = vmatprep.subr.bf16.mxu1 %v1105_v36 }
  0x1f   :  { %970 = vmatpush3.bf16.msra.mxu0 %v1104_v35 }
  0x20   :  { %999 = vmatprep.subr.bf16.mxu0 %v1108_v41 }
  0x21   :  { %992 = vmatpush3.bf16.msra.mxu1 %v1107_v40 }
  0x22   :  { %1021 = vmatprep.subr.bf16.mxu1 %v1110_v45  ;;  %707 = vmatmul.mubr.bf16.vlgmr.msra.gmra.mrb[0].mxu0 %v193_v43 }
  0x23   :  { %1000 = vmatpush3.bf16.msra.mxu0 %v1109_v47  ;;  %786 = vmatprep.mubr.bf16.mxu0 %v214_v53 }
  0x24   :  { %747 = vmatmul.mubr.bf16.vlgmr.msra.gmra.mrb[0].mxu1 %v215_v49  ;;  %1001 = vmatprep.subr.bf16.mxu0 %v1112_v50 }
  0x25   :  { %1022 = vmatpush3.bf16.msra.mxu1 %v1111_v52  ;;  %826 = vmatprep.mubr.bf16.mxu1 %v218_v56 }
  0x26   :  { %1023 = vmatprep.subr.bf16.mxu1 %v1114_v54 }
  0x27   :  { %1002 = vmatpush3.bf16.msra.mxu0 %v1113_v55 }
  0x28   :  { %1003 = vmatprep.subr.bf16.mxu0 %v1116_v57 }
  0x29   :  { %1024 = vmatpush3.bf16.msra.mxu1 %v1115_v58 }
  0x2a   :  { %1025 = vmatprep.subr.bf16.mxu1 %v1118_v59 }
  0x2b   :  { %1004 = vmatpush3.bf16.msra.mxu0 %v1117_v60 }
  0x2c   :  { %1005 = vmatprep.subr.bf16.mxu0 %v1120_v61 }
  0x2d   :  { %1026 = vmatpush3.bf16.msra.mxu1 %v1119_v62 }
  0x2e   :  { %1027 = vmatprep.subr.bf16.mxu1 %v1122_v63 }
  0x2f   :  { %1006 = vmatpush3.bf16.msra.mxu0 %v1121_v0 }
  0x30   :  { %1007 = vmatprep.subr.bf16.mxu0 %v1124_v1 }
  0x31   :  { %1028 = vmatpush3.bf16.msra.mxu1 %v1123_v2 }
  0x32   :  { %1029 = vmatprep.subr.bf16.mxu1 %v1126_v3 }
  0x33   :  { %1008 = vmatpush3.bf16.msra.mxu0 %v1125_v4 }
  0x34   :  { %1009 = vmatprep.subr.bf16.mxu0 %v1128_v5 }
  0x35   :  { %1030 = vmatpush3.bf16.msra.mxu1 %v1127_v6 }
  0x36   :  { %1031 = vmatprep.subr.bf16.mxu1 %v1130_v7 }
  0x37   :  { %1010 = vmatpush3.bf16.msra.mxu0 %v1129_v8 }
  0x38   :  { %1011 = vmatprep.subr.bf16.mxu0 %v1132_v9 }
  0x39   :  { %1032 = vmatpush3.bf16.msra.mxu1 %v1131_v10 }
  0x3a   :  { %1033 = vmatprep.subr.bf16.mxu1 %v1134_v11 }
  0x3b   :  { %1012 = vmatpush3.bf16.msra.mxu0 %v1133_v12 }
  0x3c   :  { %1013 = vmatprep.subr.bf16.mxu0 %v1136_v13 }
  0x3d   :  { %1034 = vmatpush3.bf16.msra.mxu1 %v1135_v14 }
  0x3e   :  { %1035 = vmatprep.subr.bf16.mxu1 %v1138_v15 }
  0x3f   :  { %1014 = vmatpush3.bf16.msra.mxu0 %v1137_v16 }
  0x40   :  { %1052 = vmatprep.subr.bf16.mxu0 %v1149_v20 }
  0x41   :  { %1036 = vmatpush3.bf16.msra.mxu1 %v1139_v18 }
  0x42   :  { %787 = vmatmul.mubr.bf16.vlgmr.msra.gmra.mrb[4].mxu0 %v200_v17 }
  0x43   :  { %1053 = vmatpush3.bf16.msra.mxu0 %v1140_v19  ;;  %1068 = vmatprep.mubr.msk.bf16.mxu0 %vm1150_vm0, %v1149_v20 }
  0x44   :  { %827 = vmatmul.mubr.bf16.vlgmr.msra.gmra.mrb[4].mxu1 %v216_v21  ;;  %1054 = vmatprep.subr.bf16.mxu0 %v1149_v20 }
  0x47   :  { %1055 = vmatpush3.bf16.msra.mxu0 %v1141_v22 }
  0x48   :  { %1056 = vmatprep.subr.bf16.mxu0 %v1149_v20 }
  0x4b   :  { %1057 = vmatpush3.bf16.msra.mxu0 %v1142_v25 }
  0x4c   :  { %1058 = vmatprep.subr.bf16.mxu0 %v1149_v20 }
  0x4f   :  { %1059 = vmatpush3.bf16.msra.mxu0 %v1143_v26 }
  0x50   :  { %1060 = vmatprep.subr.bf16.mxu0 %v1149_v20 }
  0x53   :  { %1061 = vmatpush3.bf16.msra.mxu0 %v1144_v27 }
  0x54   :  { %1062 = vmatprep.subr.bf16.mxu0 %v1149_v20 }
  0x57   :  { %1063 = vmatpush3.bf16.msra.mxu0 %v1145_v28 }
  0x58   :  { %1064 = vmatprep.subr.bf16.mxu0 %v1149_v20 }
  0x5b   :  { %1065 = vmatpush3.bf16.msra.mxu0 %v1146_v29 }
  0x5c   :  { %1066 = vmatprep.subr.bf16.mxu0 %v1149_v20 }
  0x5f   :  { %1067 = vmatpush3.bf16.msra.mxu0 %v1147_v30 }
  0x62   :  { %1069 = vmatmul.mubr.bf16.vlgmr.msra.gmra.mrb[8].mxu0 %v232_v24 }
  0xf5   :  { %v971_v31 = vpop.f32.mrb[0].mxu0 }
  0xf6   :  { %v972_v33 = vpop.f32.mrb[1].mxu0 }
  0xf7   :  { %v973_v34 = vadd.f32 %v972_v33, %v971_v31  ;;  %v974_v35 = vpop.f32.mrb[2].mxu0  ;;  %v993_v36 = vpop.f32.mrb[0].mxu1 }
  0xf8   :  { %v975_v37 = vpop.f32.mrb[3].mxu0  ;;  %v994_v38 = vpop.f32.mrb[1].mxu1 }
  0xf9   :  { %v709_v39 = vadd.f32 %v973_v34, %v881_v32  ;;  %v995_v40 = vadd.f32 %v994_v38, %v993_v36  ;;  %v996_v41 = vpop.f32.mrb[2].mxu1 }
  0xfa   :  { %v997_v42 = vpop.f32.mrb[3].mxu1 }
  0xfb   :  { %v749_v43 = vadd.f32 %v995_v40, %v709_v39 }
 0x115   :  { %v1015_v44 = vpop.f32.mrb[4].mxu0 }
 0x116   :  { %v1016_v45 = vpop.f32.mrb[5].mxu0 }
 0x117   :  { %v1017_v46 = vadd.f32 %v1016_v45, %v1015_v44  ;;  %v1018_v47 = vpop.f32.mrb[6].mxu0  ;;  %v1037_v48 = vpop.f32.mrb[4].mxu1 }
 0x118   :  { %v1019_v49 = vpop.f32.mrb[7].mxu0  ;;  %v1038_v50 = vpop.f32.mrb[5].mxu1 }
 0x119   :  { %v789_v51 = vadd.f32 %v1017_v46, %v749_v43  ;;  %v1039_v52 = vadd.f32 %v1038_v50, %v1037_v48  ;;  %v1040_v53 = vpop.f32.mrb[6].mxu1 }
 0x11a   :  { %v1041_v54 = vpop.f32.mrb[7].mxu1 }
 0x11b   :  { %v829_v55 = vadd.f32 %v1039_v52, %v789_v51 }
 0x135   :  { %v868_v56 = vpop.f32.mrb[8].mxu0 }
 0x136   :  { %v869_v57 = vadd.f32 %v868_v56, %v829_v55  ;;  %v1070_v58 = vpop.f32.mrb[9].mxu0 }
 0x137   :  { %v871_v59 = vpop.f32.mrb[10].mxu0 }
 0x138   :  { %v874_v60 = vmax.f32 %v869_v57, 0.0  ;;  %v1071_v61 = vpop.f32.mrb[11].mxu0 }
 0x13a   :  { %v875_v62 = vpack.c.bf16 %v874_v60, %v874_v60 }
 0x13c   :  { %876 = vst [vmem:[%s1416_s3] sm:$0x1] %v875_v62 }

// kernel: rainbow_forward.5
= control target key start
LH: loop header
LB: loop body
LE: loop exit
PB: predicated region body
PF: predicated region fallthrough
CT: control target
= control target key end

     0   :  { %s2638_s1 = inlined_call_operand.vmem [shape: bf16[2048,128], index: 1, kind: input, shape index: {}]   ;;  %s2639_s0 = inlined_call_operand.vmem [shape: bf16[18,2048], index: 0, kind: input, shape index: {}]   ;;  %s2640_s2 = inlined_call_operand.vmem [shape: f32[1,128], index: 2, kind: input, shape index: {}]   ;;  %s2641_s3 = inlined_call_operand.vmem [shape: bf16[18,128], index: 3, kind: output, shape index: {}]  }
   0x1   :  { %v2009_v0 = vld [vmem:[%s2638_s1 + $0x40] sm:$0xff]   ;;  %v2013_v4 = vld [vmem:[%s2638_s1 + $0x48] sm:$0xff]   ;;  %v2017_v8 = vld [vmem:[%s2638_s1 + $0x50] sm:$0xff]  }
   0x2   :  { %v2010_v1 = vld [vmem:[%s2638_s1 + $0xc0] sm:$0xff]   ;;  %1785 = vmatprep.subr.bf16.mxu0 %v2009_v0  ;;  %v2014_v5 = vld [vmem:[%s2638_s1 + $0xc8] sm:$0xff]   ;;  %v2018_v9 = vld [vmem:[%s2638_s1 + $0xd0] sm:$0xff]  }
   0x3   :  { %v2011_v2 = vld [vmem:[%s2638_s1] sm:$0xff]   ;;  %1813 = vmatprep.subr.bf16.mxu1 %v2010_v1  ;;  %v2015_v6 = vld [vmem:[%s2638_s1 + $0x8] sm:$0xff]   ;;  %v2019_v10 = vld [vmem:[%s2638_s1 + $0x10] sm:$0xff]  }
   0x4   :  { %v2012_v3 = vld [vmem:[%s2638_s1 + $0x80] sm:$0xff]   ;;  %1786 = vmatpush3.bf16.msra.mxu0 %v2011_v2  ;;  %v2016_v7 = vld [vmem:[%s2638_s1 + $0x88] sm:$0xff]   ;;  %v2020_v11 = vld [vmem:[%s2638_s1 + $0x90] sm:$0xff]  }
   0x5   :  { %1814 = vmatpush3.bf16.msra.mxu1 %v2012_v3  ;;  %1787 = vmatprep.subr.bf16.mxu0 %v2013_v4  ;;  %v2021_v12 = vld [vmem:[%s2638_s1 + $0x58] sm:$0xff]   ;;  %v2025_v16 = vld [vmem:[%s2638_s1 + $0x60] sm:$0xff]   ;;  %v2029_v20 = vld [vmem:[%s2638_s1 + $0x68] sm:$0xff]  }
   0x6   :  { %1815 = vmatprep.subr.bf16.mxu1 %v2014_v5  ;;  %v2022_v13 = vld [vmem:[%s2638_s1 + $0xd8] sm:$0xff]   ;;  %v2026_v17 = vld [vmem:[%s2638_s1 + $0xe0] sm:$0xff]   ;;  %v2030_v21 = vld [vmem:[%s2638_s1 + $0xe8] sm:$0xff]  }
   0x7   :  { %v2023_v14 = vld [vmem:[%s2638_s1 + $0x18] sm:$0xff]   ;;  %v2027_v18 = vld [vmem:[%s2638_s1 + $0x20] sm:$0xff]   ;;  %v2031_v22 = vld [vmem:[%s2638_s1 + $0x28] sm:$0xff]  }
   0x8   :  { %1788 = vmatpush3.bf16.msra.mxu0 %v2015_v6  ;;  %v2024_v15 = vld [vmem:[%s2638_s1 + $0x98] sm:$0xff]   ;;  %v2028_v19 = vld [vmem:[%s2638_s1 + $0xa0] sm:$0xff]   ;;  %v2032_v23 = vld [vmem:[%s2638_s1 + $0xa8] sm:$0xff]  }
   0x9   :  { %1816 = vmatpush3.bf16.msra.mxu1 %v2016_v7  ;;  %1789 = vmatprep.subr.bf16.mxu0 %v2017_v8  ;;  %v2033_v24 = vld [vmem:[%s2638_s1 + $0x70] sm:$0xff]   ;;  %v2037_v28 = vld [vmem:[%s2638_s1 + $0x78] sm:$0xff]   ;;  %v15_v32 = vld [vmem:[%s2639_s0] sm:$0xff] }
   0xa   :  { %1817 = vmatprep.subr.bf16.mxu1 %v2018_v9  ;;  %v2034_v25 = vld [vmem:[%s2638_s1 + $0xf0] sm:$0xff]   ;;  %v2038_v29 = vld [vmem:[%s2638_s1 + $0xf8] sm:$0xff]   ;;  %v23_v33 = vld [vmem:[%s2639_s0 + $0x40] sm:$0xff] }
   0xb   :  { %v2035_v26 = vld [vmem:[%s2638_s1 + $0x30] sm:$0xff]   ;;  %v2039_v30 = vld [vmem:[%s2638_s1 + $0x38] sm:$0xff]   ;;  %v16_v34 = vld [vmem:[%s2639_s0 + $0x8] sm:$0xff]  ;;  %v1614_v35 = vcombine.low %v15_v32, %v23_v33  ;;  %v1615_v36 = vcombine.high %v15_v32, %v23_v33 }
   0xc   :  { %1790 = vmatpush3.bf16.msra.mxu0 %v2019_v10  ;;  %v2036_v27 = vld [vmem:[%s2638_s1 + $0xb0] sm:$0xff]   ;;  %v2040_v31 = vld [vmem:[%s2638_s1 + $0xb8] sm:$0xff]   ;;  %v24_v37 = vld [vmem:[%s2639_s0 + $0x48] sm:$0xff] }
   0xd   :  { %1818 = vmatpush3.bf16.msra.mxu1 %v2020_v11  ;;  %1791 = vmatprep.subr.bf16.mxu0 %v2021_v12  ;;  %v1616_v38 = vcombine.low %v16_v34, %v24_v37  ;;  %v1617_v39 = vcombine.high %v16_v34, %v24_v37  ;;  %v2041_v40 = vld [vmem:[%s2638_s1 + $0x140] sm:$0xff]   ;;  %v2045_v44 = vld [vmem:[%s2638_s1 + $0x148] sm:$0xff]   ;;  %v2049_v48 = vld [vmem:[%s2638_s1 + $0x150] sm:$0xff]  }
   0xe   :  { %1819 = vmatprep.subr.bf16.mxu1 %v2022_v13  ;;  %1238 = vmatprep.mubr.bf16.mxu0 %v1615_v36  ;;  %v2042_v41 = vld [vmem:[%s2638_s1 + $0x1c0] sm:$0xff]   ;;  %v2046_v45 = vld [vmem:[%s2638_s1 + $0x1c8] sm:$0xff]   ;;  %v2050_v49 = vld [vmem:[%s2638_s1 + $0x1d0] sm:$0xff]  }
   0xf   :  { %1286 = vmatprep.mubr.bf16.mxu1 %v1617_v39  ;;  %v2043_v42 = vld [vmem:[%s2638_s1 + $0x100] sm:$0xff]   ;;  %v2047_v46 = vld [vmem:[%s2638_s1 + $0x108] sm:$0xff]   ;;  %v2051_v50 = vld [vmem:[%s2638_s1 + $0x110] sm:$0xff]  }
  0x10   :  { %1792 = vmatpush3.bf16.msra.mxu0 %v2023_v14  ;;  %v2044_v43 = vld [vmem:[%s2638_s1 + $0x180] sm:$0xff]   ;;  %v2048_v47 = vld [vmem:[%s2638_s1 + $0x188] sm:$0xff]   ;;  %v2052_v51 = vld [vmem:[%s2638_s1 + $0x190] sm:$0xff]  }
  0x11   :  { %1820 = vmatpush3.bf16.msra.mxu1 %v2024_v15  ;;  %1793 = vmatprep.subr.bf16.mxu0 %v2025_v16  ;;  %v2053_v52 = vld [vmem:[%s2638_s1 + $0x158] sm:$0xff]   ;;  %v2057_v56 = vld [vmem:[%s2638_s1 + $0x160] sm:$0xff]   ;;  %v2061_v60 = vld [vmem:[%s2638_s1 + $0x168] sm:$0xff]  }
  0x12   :  { %1821 = vmatprep.subr.bf16.mxu1 %v2026_v17  ;;  %v2054_v53 = vld [vmem:[%s2638_s1 + $0x1d8] sm:$0xff]   ;;  %v2058_v57 = vld [vmem:[%s2638_s1 + $0x1e0] sm:$0xff]   ;;  %v2062_v61 = vld [vmem:[%s2638_s1 + $0x1e8] sm:$0xff]  }
  0x13   :  { %v2055_v54 = vld [vmem:[%s2638_s1 + $0x118] sm:$0xff]   ;;  %v2059_v58 = vld [vmem:[%s2638_s1 + $0x120] sm:$0xff]   ;;  %v2064_v0 = vld [vmem:[%s2638_s1 + $0x128] sm:$0xff]  }
  0x14   :  { %1794 = vmatpush3.bf16.msra.mxu0 %v2027_v18  ;;  %v2056_v55 = vld [vmem:[%s2638_s1 + $0x198] sm:$0xff]   ;;  %v2060_v59 = vld [vmem:[%s2638_s1 + $0x1a0] sm:$0xff]   ;;  %v2065_v2 = vld [vmem:[%s2638_s1 + $0x1a8] sm:$0xff]  }
  0x15   :  { %1822 = vmatpush3.bf16.msra.mxu1 %v2028_v19  ;;  %1795 = vmatprep.subr.bf16.mxu0 %v2029_v20  ;;  %v31_v62 = vld [vmem:[%s2639_s0 + $0x80] sm:$0x11]  ;;  %v32_v3 = vld [vmem:[%s2639_s0 + $0x88] sm:$0x11]  ;;  %v2069_v6 = vld [vmem:[%s2638_s1 + $0x170] sm:$0xff]  }
  0x16   :  { %1823 = vmatprep.subr.bf16.mxu1 %v2030_v21  ;;  %v1631_v63 = vcombine.high %v31_v62, %v31_v62  ;;  %v1630_v1 = vcombine.low %v31_v62, %v31_v62  ;;  %v1633_v4 = vcombine.high %v32_v3, %v32_v3  ;;  %v1632_v5 = vcombine.low %v32_v3, %v32_v3  ;;  %v2070_v7 = vld [vmem:[%s2638_s1 + $0x1f0] sm:$0xff]   ;;  %v2073_v10 = vld [vmem:[%s2638_s1 + $0x178] sm:$0xff]   ;;  %v20_v62 = vld [vmem:[%s2639_s0 + $0x28] sm:$0xff] }
  0x17   :  { %v2071_v8 = vld [vmem:[%s2638_s1 + $0x130] sm:$0xff]   ;;  %v2074_v11 = vld [vmem:[%s2638_s1 + $0x1f8] sm:$0xff]  }
  0x18   :  { %1796 = vmatpush3.bf16.msra.mxu0 %v2031_v22  ;;  %v2072_v9 = vld [vmem:[%s2638_s1 + $0x1b0] sm:$0xff]   ;;  %v2075_v12 = vld [vmem:[%s2638_s1 + $0x138] sm:$0xff]   ;;  %v2077_v22 = vld [vmem:[%s2638_s1 + $0x240] sm:$0xff]  }
  0x19   :  { %1824 = vmatpush3.bf16.msra.mxu1 %v2032_v23  ;;  %1797 = vmatprep.subr.bf16.mxu0 %v2033_v24  ;;  %v2076_v13 = vld [vmem:[%s2638_s1 + $0x1b8] sm:$0xff]   ;;  %v17_v14 = vld [vmem:[%s2639_s0 + $0x10] sm:$0xff]  ;;  %v2078_v23 = vld [vmem:[%s2638_s1 + $0x2c0] sm:$0xff]  }
  0x1a   :  { %1825 = vmatprep.subr.bf16.mxu1 %v2034_v25  ;;  %v25_v15 = vld [vmem:[%s2639_s0 + $0x50] sm:$0xff]  ;;  %v18_v16 = vld [vmem:[%s2639_s0 + $0x18] sm:$0xff]  ;;  %v2079_v24 = vld [vmem:[%s2638_s1 + $0x200] sm:$0xff]  }
  0x1b   :  { %v1618_v17 = vcombine.low %v17_v14, %v25_v15  ;;  %v1619_v18 = vcombine.high %v17_v14, %v25_v15  ;;  %v26_v19 = vld [vmem:[%s2639_s0 + $0x58] sm:$0xff]  ;;  %v2080_v25 = vld [vmem:[%s2638_s1 + $0x280] sm:$0xff]   ;;  %v2087_v33 = vld [vmem:[%s2638_s1 + $0x250] sm:$0xff]  }
  0x1c   :  { %1798 = vmatpush3.bf16.msra.mxu0 %v2035_v26  ;;  %v1620_v20 = vcombine.low %v18_v16, %v26_v19  ;;  %v1621_v21 = vcombine.high %v18_v16, %v26_v19  ;;  %v2081_v26 = vld [vmem:[%s2638_s1 + $0x248] sm:$0xff]   ;;  %v2088_v34 = vld [vmem:[%s2638_s1 + $0x2d0] sm:$0xff]  }
  0x1d   :  { %1826 = vmatpush3.bf16.msra.mxu1 %v2036_v27  ;;  %1799 = vmatprep.subr.bf16.mxu0 %v2037_v28  ;;  %v2082_v27 = vld [vmem:[%s2638_s1 + $0x2c8] sm:$0xff]   ;;  %v2090_v37 = vld [vmem:[%s2638_s1 + $0x210] sm:$0xff]  }
  0x1e   :  { %1827 = vmatprep.subr.bf16.mxu1 %v2038_v29  ;;  %v2083_v28 = vld [vmem:[%s2638_s1 + $0x208] sm:$0xff]   ;;  %v2091_v39 = vld [vmem:[%s2638_s1 + $0x290] sm:$0xff]  }
  0x1f   :  { %v2084_v29 = vld [vmem:[%s2638_s1 + $0x288] sm:$0xff]   ;;  %v2123_v15 = vld [vmem:[%s2638_s1 + $0x350] sm:$0xff]  }
  0x20   :  { %1800 = vmatpush3.bf16.msra.mxu0 %v2039_v30  ;;  %v33_v30 = vld [vmem:[%s2639_s0 + $0x90] sm:$0x11] }
  0x21   :  { %1828 = vmatpush3.bf16.msra.mxu1 %v2040_v31  ;;  %1841 = vmatprep.subr.bf16.mxu0 %v2041_v40  ;;  %v1635_v31 = vcombine.high %v33_v30, %v33_v30  ;;  %v1634_v32 = vcombine.low %v33_v30, %v33_v30  ;;  %v2093_v40 = vld [vmem:[%s2638_s1 + $0x258] sm:$0xff]   ;;  %v2124_v16 = vld [vmem:[%s2638_s1 + $0x3d0] sm:$0xff]   ;;  %v2137_v30 = vld [vmem:[%s2638_s1 + $0x368] sm:$0xff]  }
  0x22   :  { %1869 = vmatprep.subr.bf16.mxu1 %v2042_v41  ;;  %v2094_v41 = vld [vmem:[%s2638_s1 + $0x2d8] sm:$0xff]   ;;  %v2126_v19 = vld [vmem:[%s2638_s1 + $0x310] sm:$0xff]  }
  0x23   :  { %1239 = vmatmul.mubr.bf16.vlgmr.msra.gmra.mrb[0].mxu0 %v1614_v35  ;;  %v34_v35 = vld [vmem:[%s2639_s0 + $0x98] sm:$0x11] }
  0x24   :  { %1287 = vmatmul.mubr.bf16.vlgmr.msra.gmra.mrb[0].mxu1 %v1616_v38  ;;  %1842 = vmatpush3.bf16.msra.mxu0 %v2043_v42  ;;  %v1637_v36 = vcombine.high %v34_v35, %v34_v35  ;;  %v1636_v38 = vcombine.low %v34_v35, %v34_v35  ;;  %v2095_v42 = vld [vmem:[%s2638_s1 + $0x218] sm:$0xff]   ;;  %v2142_v35 = vld [vmem:[%s2638_s1 + $0x3f0] sm:$0xff]  }
  0x25   :  { %1870 = vmatpush3.bf16.msra.mxu1 %v2044_v43  ;;  %1843 = vmatprep.subr.bf16.mxu0 %v2045_v44  ;;  %v2096_v43 = vld [vmem:[%s2638_s1 + $0x298] sm:$0xff]   ;;  %v2097_v44 = vld [vmem:[%s2638_s1 + $0x260] sm:$0xff]  }
  0x26   :  { %1871 = vmatprep.subr.bf16.mxu1 %v2046_v45  ;;  %1246 = vmatprep.mubr.bf16.mxu0 %v1631_v63  ;;  %v2098_v45 = vld [vmem:[%s2638_s1 + $0x2e0] sm:$0xff]  }
  0x27   :  { %1294 = vmatprep.mubr.bf16.mxu1 %v1633_v4  ;;  %v2113_v4 = vld [vmem:[%s2638_s1 + $0x340] sm:$0xff]  }
  0x28   :  { %1844 = vmatpush3.bf16.msra.mxu0 %v2047_v46  ;;  %v2099_v46 = vld [vmem:[%s2638_s1 + $0x220] sm:$0xff]  }
  0x29   :  { %1872 = vmatpush3.bf16.msra.mxu1 %v2048_v47  ;;  %1845 = vmatprep.subr.bf16.mxu0 %v2049_v48  ;;  %v2100_v47 = vld [vmem:[%s2638_s1 + $0x2a0] sm:$0xff]   ;;  %v2101_v48 = vld [vmem:[%s2638_s1 + $0x268] sm:$0xff]  }
  0x2a   :  { %1873 = vmatprep.subr.bf16.mxu1 %v2050_v49  ;;  %v2102_v49 = vld [vmem:[%s2638_s1 + $0x2e8] sm:$0xff]  }
  0x2b   :  { %1247 = vmatmul.mubr.bf16.gmra.mrb[4].mxu0 %v1630_v1  ;;  %v28_v1 = vld [vmem:[%s2639_s0 + $0x68] sm:$0xff] }
  0x2c   :  { %1846 = vmatpush3.bf16.msra.mxu0 %v2051_v50  ;;  %1295 = vmatmul.mubr.bf16.gmra.mrb[4].mxu1 %v1632_v5  ;;  %v2103_v50 = vld [vmem:[%s2638_s1 + $0x228] sm:$0xff]   ;;  %v1625_v3 = vcombine.high %v20_v62, %v28_v1  ;;  %v2114_v5 = vld [vmem:[%s2638_s1 + $0x3c0] sm:$0xff]  }
  0x2d   :  { %1874 = vmatpush3.bf16.msra.mxu1 %v2052_v51  ;;  %1847 = vmatprep.subr.bf16.mxu0 %v2053_v52  ;;  %v2104_v51 = vld [vmem:[%s2638_s1 + $0x2a8] sm:$0xff]   ;;  %v2105_v52 = vld [vmem:[%s2638_s1 + $0x270] sm:$0xff]  }
  0x2e   :  { %1875 = vmatprep.subr.bf16.mxu1 %v2054_v53  ;;  %1334 = vmatprep.mubr.bf16.mxu0 %v1619_v18  ;;  %v2106_v53 = vld [vmem:[%s2638_s1 + $0x2f0] sm:$0xff]  }
  0x2f   :  { %1382 = vmatprep.mubr.bf16.mxu1 %v1621_v21  ;;  %v2127_v21 = vld [vmem:[%s2638_s1 + $0x390] sm:$0xff]  }
  0x30   :  { %1848 = vmatpush3.bf16.msra.mxu0 %v2055_v54  ;;  %v2107_v54 = vld [vmem:[%s2638_s1 + $0x230] sm:$0xff]  }
  0x31   :  { %1876 = vmatpush3.bf16.msra.mxu1 %v2056_v55  ;;  %1849 = vmatprep.subr.bf16.mxu0 %v2057_v56  ;;  %v2108_v55 = vld [vmem:[%s2638_s1 + $0x2b0] sm:$0xff]   ;;  %v2109_v56 = vld [vmem:[%s2638_s1 + $0x278] sm:$0xff]  }
  0x32   :  { %1877 = vmatprep.subr.bf16.mxu1 %v2058_v57  ;;  %v2110_v57 = vld [vmem:[%s2638_s1 + $0x2f8] sm:$0xff]  }
  0x34   :  { %1850 = vmatpush3.bf16.msra.mxu0 %v2059_v58  ;;  %v2111_v58 = vld [vmem:[%s2638_s1 + $0x238] sm:$0xff]  }
  0x35   :  { %1878 = vmatpush3.bf16.msra.mxu1 %v2060_v59  ;;  %1851 = vmatprep.subr.bf16.mxu0 %v2061_v60  ;;  %v2112_v59 = vld [vmem:[%s2638_s1 + $0x2b8] sm:$0xff]   ;;  %v19_v60 = vld [vmem:[%s2639_s0 + $0x20] sm:$0xff] }
  0x36   :  { %1879 = vmatprep.subr.bf16.mxu1 %v2062_v61  ;;  %v27_v61 = vld [vmem:[%s2639_s0 + $0x60] sm:$0xff] }
  0x37   :  { %v1622_v63 = vcombine.low %v19_v60, %v27_v61 }
  0x38   :  { %1852 = vmatpush3.bf16.msra.mxu0 %v2064_v0  ;;  %v1623_v0 = vcombine.high %v19_v60, %v27_v61 }
  0x39   :  { %1880 = vmatpush3.bf16.msra.mxu1 %v2065_v2  ;;  %1853 = vmatprep.subr.bf16.mxu0 %v2069_v6  ;;  %v1624_v2 = vcombine.low %v20_v62, %v28_v1  ;;  %v2115_v6 = vld [vmem:[%s2638_s1 + $0x300] sm:$0xff]  }
  0x3a   :  { %1881 = vmatprep.subr.bf16.mxu1 %v2070_v7  ;;  %v2116_v7 = vld [vmem:[%s2638_s1 + $0x380] sm:$0xff]  }
  0x3c   :  { %1854 = vmatpush3.bf16.msra.mxu0 %v2071_v8  ;;  %v2117_v8 = vld [vmem:[%s2638_s1 + $0x348] sm:$0xff]  }
  0x3d   :  { %1882 = vmatpush3.bf16.msra.mxu1 %v2072_v9  ;;  %1855 = vmatprep.subr.bf16.mxu0 %v2073_v10  ;;  %v2118_v9 = vld [vmem:[%s2638_s1 + $0x3c8] sm:$0xff]  }
  0x3e   :  { %1883 = vmatprep.subr.bf16.mxu1 %v2074_v11  ;;  %v2119_v10 = vld [vmem:[%s2638_s1 + $0x308] sm:$0xff]  }
  0x3f   :  { %v2120_v11 = vld [vmem:[%s2638_s1 + $0x388] sm:$0xff]  }
  0x40   :  { %1856 = vmatpush3.bf16.msra.mxu0 %v2075_v12  ;;  %v35_v12 = vld [vmem:[%s2639_s0 + $0xa0] sm:$0x11] }
  0x41   :  { %1884 = vmatpush3.bf16.msra.mxu1 %v2076_v13  ;;  %1897 = vmatprep.subr.bf16.mxu0 %v2077_v22  ;;  %v1639_v13 = vcombine.high %v35_v12, %v35_v12  ;;  %v1638_v14 = vcombine.low %v35_v12, %v35_v12  ;;  %v2129_v22 = vld [vmem:[%s2638_s1 + $0x358] sm:$0xff]  }
  0x42   :  { %1925 = vmatprep.subr.bf16.mxu1 %v2078_v23  ;;  %v2130_v23 = vld [vmem:[%s2638_s1 + $0x3d8] sm:$0xff]  }
  0x43   :  { %1335 = vmatmul.mubr.bf16.vlgmr.msra.gmra.mrb[8].mxu0 %v1618_v17  ;;  %v36_v17 = vld [vmem:[%s2639_s0 + $0xa8] sm:$0x11] }
  0x44   :  { %1383 = vmatmul.mubr.bf16.vlgmr.msra.gmra.mrb[8].mxu1 %v1620_v20  ;;  %1898 = vmatpush3.bf16.msra.mxu0 %v2079_v24  ;;  %v1641_v18 = vcombine.high %v36_v17, %v36_v17  ;;  %v1640_v20 = vcombine.low %v36_v17, %v36_v17  ;;  %v2131_v24 = vld [vmem:[%s2638_s1 + $0x318] sm:$0xff]  }
  0x45   :  { %1926 = vmatpush3.bf16.msra.mxu1 %v2080_v25  ;;  %1899 = vmatprep.subr.bf16.mxu0 %v2081_v26  ;;  %v2132_v25 = vld [vmem:[%s2638_s1 + $0x398] sm:$0xff]   ;;  %v2133_v26 = vld [vmem:[%s2638_s1 + $0x360] sm:$0xff]  }
  0x46   :  { %1927 = vmatprep.subr.bf16.mxu1 %v2082_v27  ;;  %1342 = vmatprep.mubr.bf16.mxu0 %v1635_v31  ;;  %v2134_v27 = vld [vmem:[%s2638_s1 + $0x3e0] sm:$0xff]   ;;  %v2138_v31 = vld [vmem:[%s2638_s1 + $0x3e8] sm:$0xff]  }
  0x47   :  { %1390 = vmatprep.mubr.bf16.mxu1 %v1637_v36  ;;  %v2143_v36 = vld [vmem:[%s2638_s1 + $0x330] sm:$0xff]  }
  0x48   :  { %1900 = vmatpush3.bf16.msra.mxu0 %v2083_v28  ;;  %v2135_v28 = vld [vmem:[%s2638_s1 + $0x320] sm:$0xff]  }
  0x49   :  { %1928 = vmatpush3.bf16.msra.mxu1 %v2084_v29  ;;  %1901 = vmatprep.subr.bf16.mxu0 %v2087_v33  ;;  %v2136_v29 = vld [vmem:[%s2638_s1 + $0x3a0] sm:$0xff]   ;;  %v2140_v33 = vld [vmem:[%s2638_s1 + $0x3a8] sm:$0xff]  }
  0x4a   :  { %1929 = vmatprep.subr.bf16.mxu1 %v2088_v34  ;;  %v2141_v34 = vld [vmem:[%s2638_s1 + $0x370] sm:$0xff]  }
  0x4b   :  { %1343 = vmatmul.mubr.bf16.gmra.mrb[12].mxu0 %v1634_v32  ;;  %v2139_v32 = vld [vmem:[%s2638_s1 + $0x328] sm:$0xff]  }
  0x4c   :  { %1902 = vmatpush3.bf16.msra.mxu0 %v2090_v37  ;;  %1391 = vmatmul.mubr.bf16.gmra.mrb[12].mxu1 %v1636_v38  ;;  %v2144_v37 = vld [vmem:[%s2638_s1 + $0x3b0] sm:$0xff]   ;;  %v2145_v38 = vld [vmem:[%s2638_s1 + $0x378] sm:$0xff]  }
  0x4d   :  { %1930 = vmatpush3.bf16.msra.mxu1 %v2091_v39  ;;  %1903 = vmatprep.subr.bf16.mxu0 %v2093_v40  ;;  %v2146_v39 = vld [vmem:[%s2638_s1 + $0x3f8] sm:$0xff]  }
  0x4e   :  { %1931 = vmatprep.subr.bf16.mxu1 %v2094_v41  ;;  %1430 = vmatprep.mubr.bf16.mxu0 %v1623_v0  ;;  %v2147_v40 = vld [vmem:[%s2638_s1 + $0x338] sm:$0xff]  }
  0x4f   :  { %1478 = vmatprep.mubr.bf16.mxu1 %v1625_v3  ;;  %v2148_v41 = vld [vmem:[%s2638_s1 + $0x3b8] sm:$0xff]  }
  0x50   :  { %1904 = vmatpush3.bf16.msra.mxu0 %v2095_v42  ;;  %v21_v42 = vld [vmem:[%s2639_s0 + $0x30] sm:$0xff] }
  0x51   :  { %1932 = vmatpush3.bf16.msra.mxu1 %v2096_v43  ;;  %1905 = vmatprep.subr.bf16.mxu0 %v2097_v44  ;;  %v29_v43 = vld [vmem:[%s2639_s0 + $0x70] sm:$0xff]  ;;  %v22_v44 = vld [vmem:[%s2639_s0 + $0x38] sm:$0xff] }
  0x52   :  { %1933 = vmatprep.subr.bf16.mxu1 %v2098_v45  ;;  %v1626_v45 = vcombine.low %v21_v42, %v29_v43 }
  0x54   :  { %1906 = vmatpush3.bf16.msra.mxu0 %v2099_v46  ;;  %v1627_v46 = vcombine.high %v21_v42, %v29_v43 }
  0x55   :  { %1934 = vmatpush3.bf16.msra.mxu1 %v2100_v47  ;;  %1907 = vmatprep.subr.bf16.mxu0 %v2101_v48  ;;  %v30_v47 = vld [vmem:[%s2639_s0 + $0x78] sm:$0xff]  ;;  %v37_v48 = vld [vmem:[%s2639_s0 + $0xb0] sm:$0x11] }
  0x56   :  { %1935 = vmatprep.subr.bf16.mxu1 %v2102_v49  ;;  %v38_v49 = vld [vmem:[%s2639_s0 + $0xb8] sm:$0x11] }
  0x58   :  { %1908 = vmatpush3.bf16.msra.mxu0 %v2103_v50  ;;  %v1628_v50 = vcombine.low %v22_v44, %v30_v47 }
  0x59   :  { %1936 = vmatpush3.bf16.msra.mxu1 %v2104_v51  ;;  %1909 = vmatprep.subr.bf16.mxu0 %v2105_v52  ;;  %v1629_v51 = vcombine.high %v22_v44, %v30_v47  ;;  %v1643_v52 = vcombine.high %v37_v48, %v37_v48 }
  0x5a   :  { %1937 = vmatprep.subr.bf16.mxu1 %v2106_v53  ;;  %v1645_v53 = vcombine.high %v38_v49, %v38_v49 }
  0x5c   :  { %1910 = vmatpush3.bf16.msra.mxu0 %v2107_v54  ;;  %v1642_v54 = vcombine.low %v37_v48, %v37_v48 }
  0x5d   :  { %1938 = vmatpush3.bf16.msra.mxu1 %v2108_v55  ;;  %1911 = vmatprep.subr.bf16.mxu0 %v2109_v56  ;;  %v1644_v55 = vcombine.low %v38_v49, %v38_v49 }
  0x5e   :  { %1939 = vmatprep.subr.bf16.mxu1 %v2110_v57 }
  0x60   :  { %1912 = vmatpush3.bf16.msra.mxu0 %v2111_v58  ;;  %v1613_v58 = vld [vmem:[%s2640_s2] ss:$0 sm:$0xff] }
  0x61   :  { %1940 = vmatpush3.bf16.msra.mxu1 %v2112_v59  ;;  %1953 = vmatprep.subr.bf16.mxu0 %v2113_v4 }
  0x62   :  { %1981 = vmatprep.subr.bf16.mxu1 %v2114_v5 }
  0x63   :  { %1431 = vmatmul.mubr.bf16.vlgmr.msra.gmra.mrb[16].mxu0 %v1622_v63 }
  0x64   :  { %1479 = vmatmul.mubr.bf16.vlgmr.msra.gmra.mrb[16].mxu1 %v1624_v2  ;;  %1954 = vmatpush3.bf16.msra.mxu0 %v2115_v6 }
  0x65   :  { %1982 = vmatpush3.bf16.msra.mxu1 %v2116_v7  ;;  %1955 = vmatprep.subr.bf16.mxu0 %v2117_v8 }
  0x66   :  { %1983 = vmatprep.subr.bf16.mxu1 %v2118_v9  ;;  %1438 = vmatprep.mubr.bf16.mxu0 %v1639_v13 }
  0x67   :  { %1486 = vmatprep.mubr.bf16.mxu1 %v1641_v18 }
  0x68   :  { %1956 = vmatpush3.bf16.msra.mxu0 %v2119_v10 }
  0x69   :  { %1984 = vmatpush3.bf16.msra.mxu1 %v2120_v11  ;;  %1957 = vmatprep.subr.bf16.mxu0 %v2123_v15 }
  0x6a   :  { %1985 = vmatprep.subr.bf16.mxu1 %v2124_v16 }
  0x6b   :  { %1439 = vmatmul.mubr.bf16.gmra.mrb[20].mxu0 %v1638_v14 }
  0x6c   :  { %1958 = vmatpush3.bf16.msra.mxu0 %v2126_v19  ;;  %1487 = vmatmul.mubr.bf16.gmra.mrb[20].mxu1 %v1640_v20 }
  0x6d   :  { %1986 = vmatpush3.bf16.msra.mxu1 %v2127_v21  ;;  %1959 = vmatprep.subr.bf16.mxu0 %v2129_v22 }
  0x6e   :  { %1987 = vmatprep.subr.bf16.mxu1 %v2130_v23  ;;  %1526 = vmatprep.mubr.bf16.mxu0 %v1627_v46 }
  0x6f   :  { %1574 = vmatprep.mubr.bf16.mxu1 %v1629_v51 }
  0x70   :  { %1960 = vmatpush3.bf16.msra.mxu0 %v2131_v24 }
  0x71   :  { %1988 = vmatpush3.bf16.msra.mxu1 %v2132_v25  ;;  %1961 = vmatprep.subr.bf16.mxu0 %v2133_v26 }
  0x72   :  { %1989 = vmatprep.subr.bf16.mxu1 %v2134_v27 }
  0x74   :  { %1962 = vmatpush3.bf16.msra.mxu0 %v2135_v28 }
  0x75   :  { %1990 = vmatpush3.bf16.msra.mxu1 %v2136_v29  ;;  %1963 = vmatprep.subr.bf16.mxu0 %v2137_v30 }
  0x76   :  { %1991 = vmatprep.subr.bf16.mxu1 %v2138_v31 }
  0x78   :  { %1964 = vmatpush3.bf16.msra.mxu0 %v2139_v32 }
  0x79   :  { %1992 = vmatpush3.bf16.msra.mxu1 %v2140_v33  ;;  %1965 = vmatprep.subr.bf16.mxu0 %v2141_v34 }
  0x7a   :  { %1993 = vmatprep.subr.bf16.mxu1 %v2142_v35 }
  0x7c   :  { %1966 = vmatpush3.bf16.msra.mxu0 %v2143_v36 }
  0x7d   :  { %1994 = vmatpush3.bf16.msra.mxu1 %v2144_v37  ;;  %1967 = vmatprep.subr.bf16.mxu0 %v2145_v38 }
  0x7e   :  { %1995 = vmatprep.subr.bf16.mxu1 %v2146_v39 }
  0x80   :  { %1968 = vmatpush3.bf16.msra.mxu0 %v2147_v40 }
  0x81   :  { %1996 = vmatpush3.bf16.msra.mxu1 %v2148_v41 }
  0x83   :  { %1527 = vmatmul.mubr.bf16.vlgmr.msra.gmra.mrb[24].mxu0 %v1626_v45 }
  0x84   :  { %1575 = vmatmul.mubr.bf16.vlgmr.msra.gmra.mrb[24].mxu1 %v1628_v50  ;;  %1534 = vmatprep.mubr.bf16.mxu0 %v1643_v52 }
  0x85   :  { %1582 = vmatprep.mubr.bf16.mxu1 %v1645_v53 }
  0x8b   :  { %1535 = vmatmul.mubr.bf16.gmra.mrb[28].mxu0 %v1642_v54 }
  0x8c   :  { %1583 = vmatmul.mubr.bf16.gmra.mrb[28].mxu1 %v1644_v55 }
  0xf6   :  { %v1801_v56 = vpop.f32.mrb[0].mxu0 }
  0xf7   :  { %v1829_v57 = vpop.f32.mrb[0].mxu1  ;;  %v1802_v59 = vpop.f32.mrb[1].mxu0 }
  0xf8   :  { %v1803_v60 = vadd.f32 %v1802_v59, %v1801_v56  ;;  %v1830_v61 = vpop.f32.mrb[1].mxu1  ;;  %v1804_v62 = vpop.f32.mrb[2].mxu0 }
  0xf9   :  { %v1831_v63 = vadd.f32 %v1830_v61, %v1829_v57  ;;  %v1832_v0 = vpop.f32.mrb[2].mxu1  ;;  %v1805_v1 = vpop.f32.mrb[3].mxu0 }
  0xfa   :  { %v1241_v2 = vadd.f32 %v1803_v60, %v1613_v58  ;;  %v1806_v3 = vadd.f32 %v1805_v1, %v1804_v62  ;;  %v1833_v4 = vpop.f32.mrb[3].mxu1 }
  0xfb   :  { %v1834_v5 = vadd.f32 %v1833_v4, %v1832_v0 }
  0xfc   :  { %v1289_v6 = vadd.f32 %v1831_v63, %v1241_v2  ;;  %v1244_v7 = vadd.f32 %v1806_v3, %v1613_v58 }
  0xfe   :  { %v1292_v8 = vadd.f32 %v1834_v5, %v1244_v7  ;;  %v1807_v9 = vpop.f32.mrb[4].mxu0 }
  0xff   :  { %v1808_v10 = vpop.f32.mrb[5].mxu0  ;;  %v1835_v13 = vpop.f32.mrb[4].mxu1 }
 0x100   :  { %v1809_v11 = vadd.f32 %v1808_v10, %v1807_v9  ;;  %v1810_v12 = vpop.f32.mrb[6].mxu0  ;;  %v1836_v15 = vpop.f32.mrb[5].mxu1 }
 0x101   :  { %v1811_v14 = vpop.f32.mrb[7].mxu0  ;;  %v1837_v17 = vadd.f32 %v1836_v15, %v1835_v13  ;;  %v1838_v18 = vpop.f32.mrb[6].mxu1 }
 0x102   :  { %v1249_v16 = vadd.f32 %v1809_v11, %v1613_v58  ;;  %v1839_v19 = vpop.f32.mrb[7].mxu1 }
 0x104   :  { %v1297_v20 = vadd.f32 %v1837_v17, %v1249_v16 }
 0x116   :  { %v1857_v21 = vpop.f32.mrb[8].mxu0 }
 0x117   :  { %v1885_v22 = vpop.f32.mrb[8].mxu1  ;;  %v1858_v23 = vpop.f32.mrb[9].mxu0 }
 0x118   :  { %v1859_v24 = vadd.f32 %v1858_v23, %v1857_v21  ;;  %v1886_v25 = vpop.f32.mrb[9].mxu1  ;;  %v1860_v26 = vpop.f32.mrb[10].mxu0 }
 0x119   :  { %v1887_v27 = vadd.f32 %v1886_v25, %v1885_v22  ;;  %v1888_v28 = vpop.f32.mrb[10].mxu1  ;;  %v1861_v29 = vpop.f32.mrb[11].mxu0 }
 0x11a   :  { %v1337_v30 = vadd.f32 %v1859_v24, %v1289_v6  ;;  %v1862_v31 = vadd.f32 %v1861_v29, %v1860_v26  ;;  %v1889_v32 = vpop.f32.mrb[11].mxu1 }
 0x11b   :  { %v1890_v33 = vadd.f32 %v1889_v32, %v1888_v28 }
 0x11c   :  { %v1385_v34 = vadd.f32 %v1887_v27, %v1337_v30  ;;  %v1340_v35 = vadd.f32 %v1862_v31, %v1292_v8 }
 0x11e   :  { %v1388_v36 = vadd.f32 %v1890_v33, %v1340_v35  ;;  %v1863_v37 = vpop.f32.mrb[12].mxu0 }
 0x11f   :  { %v1864_v38 = vpop.f32.mrb[13].mxu0  ;;  %v1891_v41 = vpop.f32.mrb[12].mxu1 }
 0x120   :  { %v1865_v39 = vadd.f32 %v1864_v38, %v1863_v37  ;;  %v1866_v40 = vpop.f32.mrb[14].mxu0  ;;  %v1892_v44 = vpop.f32.mrb[13].mxu1 }
 0x121   :  { %v1867_v42 = vpop.f32.mrb[15].mxu0  ;;  %v1893_v45 = vadd.f32 %v1892_v44, %v1891_v41  ;;  %v1894_v46 = vpop.f32.mrb[14].mxu1 }
 0x122   :  { %v1345_v43 = vadd.f32 %v1865_v39, %v1297_v20  ;;  %v1895_v47 = vpop.f32.mrb[15].mxu1 }
 0x124   :  { %v1393_v48 = vadd.f32 %v1893_v45, %v1345_v43 }
 0x136   :  { %v1913_v49 = vpop.f32.mrb[16].mxu0 }
 0x137   :  { %v1941_v50 = vpop.f32.mrb[16].mxu1  ;;  %v1914_v51 = vpop.f32.mrb[17].mxu0 }
 0x138   :  { %v1915_v52 = vadd.f32 %v1914_v51, %v1913_v49  ;;  %v1942_v53 = vpop.f32.mrb[17].mxu1  ;;  %v1916_v54 = vpop.f32.mrb[18].mxu0 }
 0x139   :  { %v1943_v55 = vadd.f32 %v1942_v53, %v1941_v50  ;;  %v1944_v56 = vpop.f32.mrb[18].mxu1  ;;  %v1917_v57 = vpop.f32.mrb[19].mxu0 }
 0x13a   :  { %v1433_v58 = vadd.f32 %v1915_v52, %v1385_v34  ;;  %v1918_v59 = vadd.f32 %v1917_v57, %v1916_v54  ;;  %v1945_v60 = vpop.f32.mrb[19].mxu1 }
 0x13b   :  { %v1946_v61 = vadd.f32 %v1945_v60, %v1944_v56 }
 0x13c   :  { %v1481_v62 = vadd.f32 %v1943_v55, %v1433_v58  ;;  %v1436_v63 = vadd.f32 %v1918_v59, %v1388_v36 }
 0x13e   :  { %v1484_v0 = vadd.f32 %v1946_v61, %v1436_v63  ;;  %v1919_v1 = vpop.f32.mrb[20].mxu0 }
 0x13f   :  { %v1920_v2 = vpop.f32.mrb[21].mxu0  ;;  %v1947_v5 = vpop.f32.mrb[20].mxu1 }
 0x140   :  { %v1921_v3 = vadd.f32 %v1920_v2, %v1919_v1  ;;  %v1922_v4 = vpop.f32.mrb[22].mxu0  ;;  %v1948_v8 = vpop.f32.mrb[21].mxu1 }
 0x141   :  { %v1923_v6 = vpop.f32.mrb[23].mxu0  ;;  %v1949_v9 = vadd.f32 %v1948_v8, %v1947_v5  ;;  %v1950_v10 = vpop.f32.mrb[22].mxu1 }
 0x142   :  { %v1441_v7 = vadd.f32 %v1921_v3, %v1393_v48  ;;  %v1951_v11 = vpop.f32.mrb[23].mxu1 }
 0x144   :  { %v1489_v12 = vadd.f32 %v1949_v9, %v1441_v7 }
 0x156   :  { %v1969_v13 = vpop.f32.mrb[24].mxu0 }
 0x157   :  { %v1997_v14 = vpop.f32.mrb[24].mxu1  ;;  %v1970_v15 = vpop.f32.mrb[25].mxu0 }
 0x158   :  { %v1971_v16 = vadd.f32 %v1970_v15, %v1969_v13  ;;  %v1998_v17 = vpop.f32.mrb[25].mxu1  ;;  %v1972_v18 = vpop.f32.mrb[26].mxu0 }
 0x159   :  { %v1999_v19 = vadd.f32 %v1998_v17, %v1997_v14  ;;  %v2000_v20 = vpop.f32.mrb[26].mxu1  ;;  %v1973_v21 = vpop.f32.mrb[27].mxu0 }
 0x15a   :  { %v1529_v22 = vadd.f32 %v1971_v16, %v1481_v62  ;;  %v1974_v23 = vadd.f32 %v1973_v21, %v1972_v18  ;;  %v2001_v24 = vpop.f32.mrb[27].mxu1 }
 0x15b   :  { %v2002_v25 = vadd.f32 %v2001_v24, %v2000_v20 }
 0x15c   :  { %v1577_v26 = vadd.f32 %v1999_v19, %v1529_v22  ;;  %v1532_v27 = vadd.f32 %v1974_v23, %v1484_v0 }
 0x15e   :  { %v1580_v28 = vadd.f32 %v2002_v25, %v1532_v27  ;;  %v1975_v29 = vpop.f32.mrb[28].mxu0  ;;  %v1590_v32 = vmax.f32 %v1577_v26, 0.0 }
 0x15f   :  { %v2003_v30 = vpop.f32.mrb[28].mxu1  ;;  %v1976_v31 = vpop.f32.mrb[29].mxu0 }
 0x160   :  { %v1591_v33 = vmax.f32 %v1580_v28, 0.0  ;;  %v1977_v34 = vadd.f32 %v1976_v31, %v1975_v29  ;;  %v2004_v35 = vpop.f32.mrb[29].mxu1  ;;  %v1978_v36 = vpop.f32.mrb[30].mxu0 }
 0x161   :  { %v2005_v37 = vadd.f32 %v2004_v35, %v2003_v30  ;;  %v2006_v38 = vpop.f32.mrb[30].mxu1  ;;  %v1979_v39 = vpop.f32.mrb[31].mxu0 }
 0x162   :  { %v1783_v40 = vpack.c.bf16 %v1591_v33, %v1590_v32  ;;  %v1537_v41 = vadd.f32 %v1977_v34, %v1489_v12  ;;  %v2007_v42 = vpop.f32.mrb[31].mxu1 }
 0x164   :  { %v1585_v43 = vadd.f32 %v2005_v37, %v1537_v41  ;;  %1784 = vst [vmem:[%s2641_s3] sm:$0xff] %v1783_v40  }
 0x166   :  { %v1592_v44 = vmax.f32 %v1585_v43, 0.0 }
 0x168   :  { %v1779_v45 = vpack.c.bf16 %v1592_v44, %v1592_v44 }
 0x16a   :  { %1608 = vst [vmem:[%s2641_s3 + $0x8] sm:$0x1] %v1779_v45 }

// kernel: rainbow_forward.7
= control target key start
LH: loop header
LB: loop body
LE: loop exit
PB: predicated region body
PF: predicated region fallthrough
CT: control target
= control target key end

     0   :  { %v3207_v3 = vmov 0   ;;  %vm2419_vm1 = vcmask 1041408   ;;  %s4251_s1 = inlined_call_operand.vmem [shape: bf16[128,1024], index: 1, kind: input, shape index: {}]   ;;  %s4252_s3 = inlined_call_operand.vmem [shape: bf16[512,768], index: 3, kind: input, shape index: {}]   ;;  %s4253_s0 = inlined_call_operand.vmem [shape: bf16[2,128], index: 0, kind: input, shape index: {}]   ;;  %s4254_s5 = inlined_call_operand.vmem [shape: bf16[512,128], index: 5, kind: input, shape index: {}]   ;;  %s4255_s2 = inlined_call_operand.vmem [shape: f32[1,1024], index: 2, kind: input, shape index: {}]   ;;  %s4256_s4 = inlined_call_operand.vmem [shape: f32[1,768], index: 4, kind: input, shape index: {}]   ;;  %s4257_s6 = inlined_call_operand.vmem [shape: f32[1,128], index: 6, kind: input, shape index: {}]   ;;  %s4258_s7 = inlined_call_operand.vmem [shape: f32[2,768], index: 7, kind: output, shape index: {}]  }
   0x1   :  { %v28_v0 = vld [vmem:[%s4251_s1] sm:$0xff]  ;;  %486 = vmatprep.mubr.bf16.mxu1 %v3207_v3  ;;  %568 = vmatprep.mubr.bf16.mxu0 %v3207_v3  ;;  %v30_v18 = vld [vmem:[%s4251_s1 + $0x10] sm:$0xff]  ;;  %v29_v53 = vld [vmem:[%s4251_s1 + $0x8] sm:$0xff] }
   0x2   :  { %v32_v1 = vld [vmem:[%s4251_s1 + $0x20] sm:$0xff]  ;;  %v34_v19 = vld [vmem:[%s4251_s1 + $0x30] sm:$0xff]  ;;  %v33_v54 = vld [vmem:[%s4251_s1 + $0x28] sm:$0xff] }
   0x3   :  { %v36_v2 = vld [vmem:[%s4251_s1 + $0x40] sm:$0xff]  ;;  %v2512_v4 = vcombine.high %v28_v0, %v32_v1  ;;  %v2511_v5 = vcombine.low %v28_v0, %v32_v1  ;;  %v38_v20 = vld [vmem:[%s4251_s1 + $0x50] sm:$0xff]  ;;  %v2516_v22 = vcombine.high %v30_v18, %v34_v19  ;;  %v2515_v23 = vcombine.low %v30_v18, %v34_v19  ;;  %v37_v59 = vld [vmem:[%s4251_s1 + $0x48] sm:$0xff] }
   0x4   :  { %v40_v6 = vld [vmem:[%s4251_s1 + $0x60] sm:$0xff]  ;;  %v42_v24 = vld [vmem:[%s4251_s1 + $0x70] sm:$0xff]  ;;  %v2514_v58 = vcombine.high %v29_v53, %v33_v54  ;;  %v41_v60 = vld [vmem:[%s4251_s1 + $0x68] sm:$0xff]  ;;  %v2513_v1 = vcombine.low %v29_v53, %v33_v54 }
   0x5   :  { %v2520_v7 = vcombine.high %v36_v2, %v40_v6  ;;  %v44_v8 = vld [vmem:[%s4251_s1 + $0x80] sm:$0xff]  ;;  %454 = vmatprep.subr.bf16.mxu1 %v2512_v4  ;;  %v2519_v10 = vcombine.low %v36_v2, %v40_v6  ;;  %v2524_v26 = vcombine.high %v38_v20, %v42_v24  ;;  %v46_v27 = vld [vmem:[%s4251_s1 + $0x90] sm:$0xff]  ;;  %536 = vmatprep.subr.bf16.mxu0 %v2516_v22  ;;  %v61_v19 = vld [vmem:[%s4251_s1 + $0x108] sm:$0xff] }
   0x6   :  { %v48_v9 = vld [vmem:[%s4251_s1 + $0xa0] sm:$0xff]  ;;  %455 = vmatpush1.bf16.msra.mxu1 %v2511_v5  ;;  %v50_v28 = vld [vmem:[%s4251_s1 + $0xb0] sm:$0xff]  ;;  %537 = vmatpush1.bf16.msra.mxu0 %v2515_v23  ;;  %v2523_v31 = vcombine.low %v38_v20, %v42_v24  ;;  %v2522_v2 = vcombine.high %v37_v59, %v41_v60  ;;  %v65_v20 = vld [vmem:[%s4251_s1 + $0x128] sm:$0xff] }
   0x7   :  { %456 = vmatprep.subr.bf16.mxu1 %v2520_v7  ;;  %v2528_v11 = vcombine.high %v44_v8, %v48_v9  ;;  %v52_v12 = vld [vmem:[%s4251_s1 + $0xc0] sm:$0xff]  ;;  %v2527_v14 = vcombine.low %v44_v8, %v48_v9  ;;  %538 = vmatprep.subr.bf16.mxu0 %v2524_v26  ;;  %v2532_v33 = vcombine.high %v46_v27, %v50_v28  ;;  %v54_v35 = vld [vmem:[%s4251_s1 + $0xd0] sm:$0xff]  ;;  %v45_v7 = vld [vmem:[%s4251_s1 + $0x88] sm:$0xff] }
   0x8   :  { %v56_v13 = vld [vmem:[%s4251_s1 + $0xe0] sm:$0xff]  ;;  %v58_v36 = vld [vmem:[%s4251_s1 + $0xf0] sm:$0xff]  ;;  %v2531_v39 = vcombine.low %v46_v27, %v50_v28  ;;  %v49_v8 = vld [vmem:[%s4251_s1 + $0xa8] sm:$0xff]  ;;  %v2546_v24 = vcombine.high %v61_v19, %v65_v20  ;;  %v2545_v28 = vcombine.low %v61_v19, %v65_v20 }
   0x9   :  { %v2536_v15 = vcombine.high %v52_v12, %v56_v13  ;;  %v60_v16 = vld [vmem:[%s4251_s1 + $0x100] sm:$0xff]  ;;  %v2535_v21 = vcombine.low %v52_v12, %v56_v13  ;;  %v2540_v41 = vcombine.high %v54_v35, %v58_v36  ;;  %v62_v43 = vld [vmem:[%s4251_s1 + $0x110] sm:$0xff]  ;;  %v2539_v47 = vcombine.low %v54_v35, %v58_v36  ;;  %v53_v13 = vld [vmem:[%s4251_s1 + $0xc8] sm:$0xff] }
   0xa   :  { %457 = vmatpush1.bf16.msra.mxu1 %v2519_v10  ;;  %v64_v17 = vld [vmem:[%s4251_s1 + $0x120] sm:$0xff]  ;;  %539 = vmatpush1.bf16.msra.mxu0 %v2523_v31  ;;  %v66_v44 = vld [vmem:[%s4251_s1 + $0x130] sm:$0xff]  ;;  %v2521_v10 = vcombine.low %v37_v59, %v41_v60  ;;  %v2530_v12 = vcombine.high %v45_v7, %v49_v8  ;;  %v73_v26 = vld [vmem:[%s4251_s1 + $0x168] sm:$0xff] }
   0xb   :  { %458 = vmatprep.subr.bf16.mxu1 %v2528_v11  ;;  %v2544_v25 = vcombine.high %v60_v16, %v64_v17  ;;  %v68_v29 = vld [vmem:[%s4251_s1 + $0x140] sm:$0xff]  ;;  %v2543_v32 = vcombine.low %v60_v16, %v64_v17  ;;  %540 = vmatprep.subr.bf16.mxu0 %v2532_v33  ;;  %v2548_v49 = vcombine.high %v62_v43, %v66_v44  ;;  %v70_v51 = vld [vmem:[%s4251_s1 + $0x150] sm:$0xff]  ;;  %v77_v31 = vld [vmem:[%s4251_s1 + $0x188] sm:$0xff] }
   0xc   :  { %v72_v30 = vld [vmem:[%s4251_s1 + $0x160] sm:$0xff]  ;;  %v74_v52 = vld [vmem:[%s4251_s1 + $0x170] sm:$0xff]  ;;  %v2547_v55 = vcombine.low %v62_v43, %v66_v44  ;;  %v2529_v16 = vcombine.low %v45_v7, %v49_v8  ;;  %v31_v43 = vld [vmem:[%s4251_s1 + $0x18] sm:$0xff] }
   0xd   :  { %v2552_v34 = vcombine.high %v68_v29, %v72_v30  ;;  %v76_v37 = vld [vmem:[%s4251_s1 + $0x180] sm:$0xff]  ;;  %v2551_v40 = vcombine.low %v68_v29, %v72_v30  ;;  %v2556_v57 = vcombine.high %v70_v51, %v74_v52  ;;  %v78_v61 = vld [vmem:[%s4251_s1 + $0x190] sm:$0xff]  ;;  %v2555_v63 = vcombine.low %v70_v51, %v74_v52  ;;  %v35_v44 = vld [vmem:[%s4251_s1 + $0x38] sm:$0xff] }
   0xe   :  { %459 = vmatpush1.bf16.msra.mxu1 %v2527_v14  ;;  %v80_v38 = vld [vmem:[%s4251_s1 + $0x1a0] sm:$0xff]  ;;  %541 = vmatpush1.bf16.msra.mxu0 %v2531_v39  ;;  %v82_v62 = vld [vmem:[%s4251_s1 + $0x1b0] sm:$0xff]  ;;  %v57_v14 = vld [vmem:[%s4251_s1 + $0xe8] sm:$0xff]  ;;  %v2517_v53 = vcombine.low %v31_v43, %v35_v44 }
   0xf   :  { %460 = vmatprep.subr.bf16.mxu1 %v2536_v15  ;;  %v2560_v42 = vcombine.high %v76_v37, %v80_v38  ;;  %v84_v45 = vld [vmem:[%s4251_s1 + $0x1c0] sm:$0xff]  ;;  %v2559_v48 = vcombine.low %v76_v37, %v80_v38  ;;  %542 = vmatprep.subr.bf16.mxu0 %v2540_v41  ;;  %v2564_v4 = vcombine.high %v78_v61, %v82_v62  ;;  %v86_v5 = vld [vmem:[%s4251_s1 + $0x1d0] sm:$0xff]  ;;  %v85_v37 = vld [vmem:[%s4251_s1 + $0x1c8] sm:$0xff] }
  0x10   :  { %v88_v46 = vld [vmem:[%s4251_s1 + $0x1e0] sm:$0xff]  ;;  %v90_v6 = vld [vmem:[%s4251_s1 + $0x1f0] sm:$0xff]  ;;  %v2563_v9 = vcombine.low %v78_v61, %v82_v62  ;;  %v2538_v18 = vcombine.high %v53_v13, %v57_v14  ;;  %v2537_v22 = vcombine.low %v53_v13, %v57_v14  ;;  %v89_v38 = vld [vmem:[%s4251_s1 + $0x1e8] sm:$0xff] }
  0x11   :  { %v2568_v50 = vcombine.high %v84_v45, %v88_v46  ;;  %v2567_v56 = vcombine.low %v84_v45, %v88_v46  ;;  %v3355_v0 = vld [vmem:[%s4253_s0] sm:$0x1]  ;;  %v2572_v11 = vcombine.high %v86_v5, %v90_v6  ;;  %v2571_v15 = vcombine.low %v86_v5, %v90_v6  ;;  %v2865_v17 = vld [vmem:[%s4252_s3 + $0x4] ss:$24 sps:$4 sm:$0xff]   ;;  %v2871_v23 = vld [vmem:[%s4252_s3 + $0x34] ss:$24 sps:$4 sm:$0xff]  }
  0x12   :  { %461 = vmatpush1.bf16.msra.mxu1 %v2535_v21  ;;  %543 = vmatpush1.bf16.msra.mxu0 %v2539_v47  ;;  %v2863_v21 = vld [vmem:[%s4252_s3] ss:$24 sps:$4 sm:$0xff]   ;;  %v2869_v27 = vld [vmem:[%s4252_s3 + $0x30] ss:$24 sps:$4 sm:$0xff]   ;;  %v2877_v29 = vld [vmem:[%s4252_s3 + $0x64] ss:$24 sps:$4 sm:$0xff]   ;;  %v2569_v47 = vcombine.low %v85_v37, %v89_v38 }
  0x13   :  { %462 = vmatprep.subr.bf16.mxu1 %v2544_v25  ;;  %544 = vmatprep.subr.bf16.mxu0 %v2548_v49  ;;  %v69_v25 = vld [vmem:[%s4251_s1 + $0x148] sm:$0xff]  ;;  %v2875_v33 = vld [vmem:[%s4252_s3 + $0x60] ss:$24 sps:$4 sm:$0xff]   ;;  %v2889_v41 = vld [vmem:[%s4252_s3 + $0xc4] ss:$24 sps:$4 sm:$0xff]  }
  0x14   :  { %v2554_v30 = vcombine.high %v69_v25, %v73_v26  ;;  %v2883_v35 = vld [vmem:[%s4252_s3 + $0x94] ss:$24 sps:$4 sm:$0xff]   ;;  %v2881_v39 = vld [vmem:[%s4252_s3 + $0x90] ss:$24 sps:$4 sm:$0xff]   ;;  %v2887_v45 = vld [vmem:[%s4252_s3 + $0xc0] ss:$24 sps:$4 sm:$0xff]  }
  0x15   :  { %v2895_v46 = vld [vmem:[%s4252_s3 + $0xf4] ss:$24 sps:$4 sm:$0xff]   ;;  %v43_v49 = vld [vmem:[%s4251_s1 + $0x78] sm:$0xff]  ;;  %v2893_v51 = vld [vmem:[%s4252_s3 + $0xf0] ss:$24 sps:$4 sm:$0xff]  }
  0x16   :  { %463 = vmatpush1.bf16.msra.mxu1 %v2543_v32  ;;  %545 = vmatpush1.bf16.msra.mxu0 %v2547_v55  ;;  %v81_v32 = vld [vmem:[%s4251_s1 + $0x1a8] sm:$0xff]  ;;  %v2901_v52 = vld [vmem:[%s4252_s3 + $0x124] ss:$24 sps:$4 sm:$0xff]   ;;  %v2911_v6 = vld [vmem:[%s4252_s3 + $0x180] ss:$24 sps:$4 sm:$0xff]  }
  0x17   :  { %464 = vmatprep.subr.bf16.mxu1 %v2552_v34  ;;  %546 = vmatprep.subr.bf16.mxu0 %v2556_v57  ;;  %v2553_v34 = vcombine.low %v69_v25, %v73_v26  ;;  %v2562_v36 = vcombine.high %v77_v31, %v81_v32  ;;  %v47_v54 = vld [vmem:[%s4251_s1 + $0x98] sm:$0xff]  ;;  %v2919_v7 = vld [vmem:[%s4252_s3 + $0x1b4] ss:$24 sps:$4 sm:$0xff]  }
  0x18   :  { %v51_v55 = vld [vmem:[%s4251_s1 + $0xb8] sm:$0xff]  ;;  %v2931_v19 = vld [vmem:[%s4252_s3 + $0x214] ss:$24 sps:$4 sm:$0xff]  }
  0x19   :  { %v2899_v57 = vld [vmem:[%s4252_s3 + $0x120] ss:$24 sps:$4 sm:$0xff]   ;;  %v2534_v62 = vcombine.high %v47_v54, %v51_v55  ;;  %v2925_v13 = vld [vmem:[%s4252_s3 + $0x1e4] ss:$24 sps:$4 sm:$0xff]  }
  0x1a   :  { %465 = vmatpush1.bf16.msra.mxu1 %v2551_v40  ;;  %547 = vmatpush1.bf16.msra.mxu0 %v2555_v63  ;;  %v2561_v40 = vcombine.low %v77_v31, %v81_v32  ;;  %v55_v60 = vld [vmem:[%s4251_s1 + $0xd8] sm:$0xff]  ;;  %v2905_v63 = vld [vmem:[%s4252_s3 + $0x150] ss:$24 sps:$4 sm:$0xff]  }
  0x1b   :  { %466 = vmatprep.subr.bf16.mxu1 %v2560_v42  ;;  %548 = vmatprep.subr.bf16.mxu0 %v2564_v4  ;;  %v2570_v42 = vcombine.high %v85_v37, %v89_v38  ;;  %v59_v61 = vld [vmem:[%s4251_s1 + $0xf8] sm:$0xff]  ;;  %v2941_v32 = vld [vmem:[%s4252_s3 + $0x270] ss:$24 sps:$4 sm:$0xff]  }
  0x1c   :  { %v63_v4 = vld [vmem:[%s4251_s1 + $0x118] sm:$0xff]  ;;  %v2542_v5 = vcombine.high %v55_v60, %v59_v61  ;;  %v2541_v8 = vcombine.low %v55_v60, %v59_v61  ;;  %v2878_v37 = vld [vmem:[%s4252_s3 + $0x68] ss:$24 sps:$4 sm:$0xff]   ;;  %v2940_v60 = vld [vmem:[%s4252_s3 + $0x24c] ss:$24 sps:$4 sm:$0xff]  }
  0x1d   :  { %v2937_v25 = vld [vmem:[%s4252_s3 + $0x244] ss:$24 sps:$4 sm:$0xff]   ;;  %v2938_v61 = vld [vmem:[%s4252_s3 + $0x248] ss:$24 sps:$4 sm:$0xff]  }
  0x1e   :  { %467 = vmatpush1.bf16.msra.mxu1 %v2559_v48  ;;  %549 = vmatpush1.bf16.msra.mxu0 %v2563_v9  ;;  %v39_v48 = vld [vmem:[%s4251_s1 + $0x58] sm:$0xff] }
  0x1f   :  { %468 = vmatprep.subr.bf16.mxu1 %v2568_v50  ;;  %550 = vmatprep.subr.bf16.mxu0 %v2572_v11  ;;  %v2518_v50 = vcombine.high %v31_v43, %v35_v44  ;;  %v2525_v59 = vcombine.low %v39_v48, %v43_v49  ;;  %v71_v9 = vld [vmem:[%s4251_s1 + $0x158] sm:$0xff]  ;;  %v2904_v44 = vld [vmem:[%s4252_s3 + $0x12c] ss:$24 sps:$4 sm:$0xff]  }
  0x20   :  { %v2886_v38 = vld [vmem:[%s4252_s3 + $0x9c] ss:$24 sps:$4 sm:$0xff]  }
  0x21   :  { %v2949_v43 = vld [vmem:[%s4252_s3 + $0x2a4] ss:$24 sps:$4 sm:$0xff]  }
  0x22   :  { %469 = vmatpush1.bf16.msra.mxu1 %v2567_v56  ;;  %551 = vmatpush1.bf16.msra.mxu0 %v2571_v15  ;;  %v2526_v56 = vcombine.high %v39_v48, %v43_v49  ;;  %v79_v15 = vld [vmem:[%s4251_s1 + $0x198] sm:$0xff]  ;;  %v2953_v49 = vld [vmem:[%s4252_s3 + $0x2d0] ss:$24 sps:$4 sm:$0xff]  }
  0x23   :  { %495 = vmatprep.subr.bf16.mxu1 %v2514_v58  ;;  %1818 = vmatprep.subr.bf16.mxu0 %v2865_v17  ;;  %v2907_v58 = vld [vmem:[%s4252_s3 + $0x154] ss:$24 sps:$4 sm:$0xff]  }
  0x24   :  { %v2910_v48 = vld [vmem:[%s4252_s3 + $0x15c] ss:$24 sps:$4 sm:$0xff]  }
  0x25   :  { %487 = vmatmul.mubr.bf16.vlgmr.msra.gmra.mrb[0].mxu1 %v3355_v0  ;;  %569 = vmatmul.mubr.bf16.vlgmr.msra.gmra.mrb[0].mxu0 %v3355_v0 }
  0x26   :  { %496 = vmatpush1.bf16.msra.mxu1 %v2513_v1  ;;  %527 = vmatprep.mubr.bf16.mxu1 %v3207_v3  ;;  %v2913_v1 = vld [vmem:[%s4252_s3 + $0x184] ss:$24 sps:$4 sm:$0xff]  }
  0x27   :  { %497 = vmatprep.subr.bf16.mxu1 %v2522_v2  ;;  %1819 = vmatpush1.bf16.msra.mxu0 %v2863_v21  ;;  %v2533_v2 = vcombine.low %v47_v54, %v51_v55  ;;  %v87_v21 = vld [vmem:[%s4251_s1 + $0x1d8] sm:$0xff] }
  0x28   :  { %1820 = vmatprep.subr.bf16.mxu0 %v2871_v23  ;;  %v2922_v54 = vld [vmem:[%s4252_s3 + $0x1bc] ss:$24 sps:$4 sm:$0xff]   ;;  %v2920_v55 = vld [vmem:[%s4252_s3 + $0x1b8] ss:$24 sps:$4 sm:$0xff]  }
  0x2a   :  { %498 = vmatpush1.bf16.msra.mxu1 %v2521_v10  ;;  %v75_v10 = vld [vmem:[%s4251_s1 + $0x178] sm:$0xff] }
  0x2b   :  { %499 = vmatprep.subr.bf16.mxu1 %v2530_v12  ;;  %1821 = vmatpush1.bf16.msra.mxu0 %v2869_v27  ;;  %v2917_v12 = vld [vmem:[%s4252_s3 + $0x1b0] ss:$24 sps:$4 sm:$0xff]   ;;  %v2558_v17 = vcombine.high %v71_v9, %v75_v10  ;;  %v2557_v20 = vcombine.low %v71_v9, %v75_v10  ;;  %v3658_v9 = vld [vmem:[%s4255_s2] sm:$0xff] }
  0x2c   :  { %1822 = vmatprep.subr.bf16.mxu0 %v2877_v29  ;;  %v2943_v29 = vld [vmem:[%s4252_s3 + $0x274] ss:$24 sps:$4 sm:$0xff]  }
  0x2e   :  { %500 = vmatpush1.bf16.msra.mxu1 %v2529_v16  ;;  %v83_v16 = vld [vmem:[%s4251_s1 + $0x1b8] sm:$0xff] }
  0x2f   :  { %501 = vmatprep.subr.bf16.mxu1 %v2538_v18  ;;  %1823 = vmatpush1.bf16.msra.mxu0 %v2875_v33  ;;  %v2923_v18 = vld [vmem:[%s4252_s3 + $0x1e0] ss:$24 sps:$4 sm:$0xff]   ;;  %v2566_v23 = vcombine.high %v79_v15, %v83_v16  ;;  %v2565_v26 = vcombine.low %v79_v15, %v83_v16 }
  0x30   :  { %1824 = vmatprep.subr.bf16.mxu0 %v2883_v35  ;;  %v2866_v33 = vld [vmem:[%s4252_s3 + $0x8] ss:$24 sps:$4 sm:$0xff]   ;;  %v2872_v35 = vld [vmem:[%s4252_s3 + $0x38] ss:$24 sps:$4 sm:$0xff]  }
  0x32   :  { %502 = vmatpush1.bf16.msra.mxu1 %v2537_v22  ;;  %v91_v22 = vld [vmem:[%s4251_s1 + $0x1f8] sm:$0xff] }
  0x33   :  { %503 = vmatprep.subr.bf16.mxu1 %v2546_v24  ;;  %1825 = vmatpush1.bf16.msra.mxu0 %v2881_v39  ;;  %v2929_v24 = vld [vmem:[%s4252_s3 + $0x210] ss:$24 sps:$4 sm:$0xff]   ;;  %v2574_v27 = vcombine.high %v87_v21, %v91_v22  ;;  %v2573_v31 = vcombine.low %v87_v21, %v91_v22  ;;  %v2892_v39 = vld [vmem:[%s4252_s3 + $0xcc] ss:$24 sps:$4 sm:$0xff]   ;;  %v2959_v22 = vld [vmem:[%s4252_s3 + $0x300] ss:$24 sps:$4 sm:$0xff]  }
  0x34   :  { %1826 = vmatprep.subr.bf16.mxu0 %v2889_v41  ;;  %v2898_v41 = vld [vmem:[%s4252_s3 + $0xfc] ss:$24 sps:$4 sm:$0xff]  }
  0x36   :  { %504 = vmatpush1.bf16.msra.mxu1 %v2545_v28  ;;  %v2935_v28 = vld [vmem:[%s4252_s3 + $0x240] ss:$24 sps:$4 sm:$0xff]  }
  0x37   :  { %505 = vmatprep.subr.bf16.mxu1 %v2554_v30  ;;  %1827 = vmatpush1.bf16.msra.mxu0 %v2887_v45  ;;  %v2868_v30 = vld [vmem:[%s4252_s3 + $0xc] ss:$24 sps:$4 sm:$0xff]   ;;  %v2947_v45 = vld [vmem:[%s4252_s3 + $0x2a0] ss:$24 sps:$4 sm:$0xff]  }
  0x38   :  { %1828 = vmatprep.subr.bf16.mxu0 %v2895_v46  ;;  %v2902_v46 = vld [vmem:[%s4252_s3 + $0x128] ss:$24 sps:$4 sm:$0xff]  }
  0x3a   :  { %506 = vmatpush1.bf16.msra.mxu1 %v2553_v34  ;;  %v2874_v34 = vld [vmem:[%s4252_s3 + $0x3c] ss:$24 sps:$4 sm:$0xff]  }
  0x3b   :  { %507 = vmatprep.subr.bf16.mxu1 %v2562_v36  ;;  %1829 = vmatpush1.bf16.msra.mxu0 %v2893_v51  ;;  %v2880_v36 = vld [vmem:[%s4252_s3 + $0x6c] ss:$24 sps:$4 sm:$0xff]  }
  0x3c   :  { %1830 = vmatprep.subr.bf16.mxu0 %v2901_v52  ;;  %v2961_v51 = vld [vmem:[%s4252_s3 + $0x304] ss:$24 sps:$4 sm:$0xff]  }
  0x3d   :  { %v2916_v52 = vld [vmem:[%s4252_s3 + $0x18c] ss:$24 sps:$4 sm:$0xff]  }
  0x3e   :  { %508 = vmatpush1.bf16.msra.mxu1 %v2561_v40  ;;  %v2890_v40 = vld [vmem:[%s4252_s3 + $0xc8] ss:$24 sps:$4 sm:$0xff]  }
  0x3f   :  { %509 = vmatprep.subr.bf16.mxu1 %v2570_v42  ;;  %1831 = vmatpush1.bf16.msra.mxu0 %v2899_v57  ;;  %v2896_v42 = vld [vmem:[%s4252_s3 + $0xf8] ss:$24 sps:$4 sm:$0xff]   ;;  %v2926_v57 = vld [vmem:[%s4252_s3 + $0x1e8] ss:$24 sps:$4 sm:$0xff]  }
  0x40   :  { %1832 = vmatprep.subr.bf16.mxu0 %v2907_v58  ;;  %v2934_v58 = vld [vmem:[%s4252_s3 + $0x21c] ss:$24 sps:$4 sm:$0xff]  }
  0x42   :  { %510 = vmatpush1.bf16.msra.mxu1 %v2569_v47  ;;  %v2955_v47 = vld [vmem:[%s4252_s3 + $0x2d4] ss:$24 sps:$4 sm:$0xff]  }
  0x43   :  { %577 = vmatprep.subr.bf16.mxu1 %v2518_v50  ;;  %1833 = vmatpush1.bf16.msra.mxu0 %v2905_v63  ;;  %v2908_v50 = vld [vmem:[%s4252_s3 + $0x158] ss:$24 sps:$4 sm:$0xff]  }
  0x44   :  { %1834 = vmatprep.subr.bf16.mxu0 %v2913_v1  ;;  %v2944_v63 = vld [vmem:[%s4252_s3 + $0x278] ss:$24 sps:$4 sm:$0xff]   ;;  %v2952_v1 = vld [vmem:[%s4252_s3 + $0x2ac] ss:$24 sps:$4 sm:$0xff]  }
  0x45   :  { %528 = vmatmul.mubr.bf16.vlgmr.msra.gmra.mrb[4].mxu1 %v3355_v0 }
  0x46   :  { %578 = vmatpush1.bf16.msra.mxu1 %v2517_v53  ;;  %609 = vmatprep.mubr.bf16.mxu1 %v3207_v3  ;;  %v67_v3 = vld [vmem:[%s4251_s1 + $0x138] sm:$0xff]  ;;  %v2914_v53 = vld [vmem:[%s4252_s3 + $0x188] ss:$24 sps:$4 sm:$0xff]  }
  0x47   :  { %579 = vmatprep.subr.bf16.mxu1 %v2526_v56  ;;  %v2550_v11 = vcombine.high %v63_v4, %v67_v3  ;;  %1835 = vmatpush1.bf16.msra.mxu0 %v2911_v6  ;;  %v2549_v14 = vcombine.low %v63_v4, %v67_v3  ;;  %v2928_v56 = vld [vmem:[%s4252_s3 + $0x1ec] ss:$24 sps:$4 sm:$0xff]   ;;  %v2958_v4 = vld [vmem:[%s4252_s3 + $0x2dc] ss:$24 sps:$4 sm:$0xff]   ;;  %v2956_v3 = vld [vmem:[%s4252_s3 + $0x2d8] ss:$24 sps:$4 sm:$0xff]   ;;  %v94_v6 = vlaneseq }
  0x48   :  { %1836 = vmatprep.subr.bf16.mxu0 %v2919_v7 }
  0x49   :  { %v3652_v7 = vshrl.u32 %v94_v6, 7 }
  0x4a   :  { %580 = vmatpush1.bf16.msra.mxu1 %v2525_v59  ;;  %v2932_v59 = vld [vmem:[%s4252_s3 + $0x218] ss:$24 sps:$4 sm:$0xff]  }
  0x4b   :  { %581 = vmatprep.subr.bf16.mxu1 %v2534_v62  ;;  %1837 = vmatpush1.bf16.msra.mxu0 %v2917_v12  ;;  %v2946_v62 = vld [vmem:[%s4252_s3 + $0x27c] ss:$24 sps:$4 sm:$0xff]   ;;  %v100_v10 = vsub.s32 1, %v3652_v7 }
  0x4c   :  { %1838 = vmatprep.subr.bf16.mxu0 %v2925_v13 }
  0x4d   :  { %v101_v12 = vrot.slane %v3658_v9, %v100_v10 }
  0x4e   :  { %582 = vmatpush1.bf16.msra.mxu1 %v2533_v2  ;;  %v2950_v2 = vld [vmem:[%s4252_s3 + $0x2a8] ss:$24 sps:$4 sm:$0xff]  }
  0x4f   :  { %583 = vmatprep.subr.bf16.mxu1 %v2542_v5  ;;  %1839 = vmatpush1.bf16.msra.mxu0 %v2923_v18  ;;  %v2964_v5 = vld [vmem:[%s4252_s3 + $0x30c] ss:$24 sps:$4 sm:$0xff]  }
  0x50   :  { %1840 = vmatprep.subr.bf16.mxu0 %v2931_v19 }
  0x52   :  { %584 = vmatpush1.bf16.msra.mxu1 %v2541_v8  ;;  %v96_v8 = vsub.s32 0, %v3652_v7 }
  0x53   :  { %585 = vmatprep.subr.bf16.mxu1 %v2550_v11  ;;  %1841 = vmatpush1.bf16.msra.mxu0 %v2929_v24 }
  0x54   :  { %1842 = vmatprep.subr.bf16.mxu0 %v2937_v25  ;;  %v97_v11 = vrot.slane %v3658_v9, %v96_v8  ;;  %v2967_v25 = vld [vmem:[%s4252_s3 + $0x334] ss:$24 sps:$4 sm:$0xff]  }
  0x56   :  { %586 = vmatpush1.bf16.msra.mxu1 %v2549_v14 }
  0x57   :  { %587 = vmatprep.subr.bf16.mxu1 %v2558_v17  ;;  %1843 = vmatpush1.bf16.msra.mxu0 %v2935_v28  ;;  %v2968_v28 = vld [vmem:[%s4252_s3 + $0x338] ss:$24 sps:$4 sm:$0xff]  }
  0x58   :  { %1844 = vmatprep.subr.bf16.mxu0 %v2943_v29  ;;  %v2973_v29 = vld [vmem:[%s4252_s3 + $0x364] ss:$24 sps:$4 sm:$0xff]  }
  0x5a   :  { %588 = vmatpush1.bf16.msra.mxu1 %v2557_v20 }
  0x5b   :  { %589 = vmatprep.subr.bf16.mxu1 %v2566_v23  ;;  %1845 = vmatpush1.bf16.msra.mxu0 %v2941_v32  ;;  %v2962_v23 = vld [vmem:[%s4252_s3 + $0x308] ss:$24 sps:$4 sm:$0xff]  }
  0x5c   :  { %1846 = vmatprep.subr.bf16.mxu0 %v2949_v43  ;;  %v2986_v43 = vld [vmem:[%s4252_s3 + $0x3c8] ss:$24 sps:$4 sm:$0xff]  }
  0x5e   :  { %590 = vmatpush1.bf16.msra.mxu1 %v2565_v26  ;;  %v2970_v26 = vld [vmem:[%s4252_s3 + $0x33c] ss:$24 sps:$4 sm:$0xff]  }
  0x5f   :  { %591 = vmatprep.subr.bf16.mxu1 %v2574_v27  ;;  %1847 = vmatpush1.bf16.msra.mxu0 %v2947_v45  ;;  %v2965_v27 = vld [vmem:[%s4252_s3 + $0x330] ss:$24 sps:$4 sm:$0xff]   ;;  %v2994_v45 = vld [vmem:[%s4252_s3 + $0x3fc] ss:$24 sps:$4 sm:$0xff]  }
  0x60   :  { %1848 = vmatprep.subr.bf16.mxu0 %v2955_v47  ;;  %v2992_v47 = vld [vmem:[%s4252_s3 + $0x3f8] ss:$24 sps:$4 sm:$0xff]  }
  0x62   :  { %592 = vmatpush1.bf16.msra.mxu1 %v2573_v31 }
  0x63   :  { %1900 = vmatprep.subr.bf16.mxu1 %v2868_v30  ;;  %1849 = vmatpush1.bf16.msra.mxu0 %v2953_v49  ;;  %v2976_v30 = vld [vmem:[%s4252_s3 + $0x36c] ss:$24 sps:$4 sm:$0xff]  }
  0x64   :  { %1859 = vmatprep.subr.bf16.mxu0 %v2961_v51  ;;  %v2997_v49 = vld [vmem:[%s4252_s3 + $0x424] ss:$24 sps:$4 sm:$0xff]   ;;  %v2995_v51 = vld [vmem:[%s4252_s3 + $0x420] ss:$24 sps:$4 sm:$0xff]  }
  0x65   :  { %610 = vmatmul.mubr.bf16.vlgmr.msra.gmra.mrb[8].mxu1 %v3355_v0  ;;  %v2884_v0 = vld [vmem:[%s4252_s3 + $0x98] ss:$24 sps:$4 sm:$0xff]  }
  0x66   :  { %1901 = vmatpush1.bf16.msra.mxu1 %v2866_v33 }
  0x67   :  { %1902 = vmatprep.subr.bf16.mxu1 %v2874_v34  ;;  %v2971_v34 = vld [vmem:[%s4252_s3 + $0x360] ss:$24 sps:$4 sm:$0xff]  }
  0x6a   :  { %1903 = vmatpush1.bf16.msra.mxu1 %v2872_v35  ;;  %v2974_v35 = vld [vmem:[%s4252_s3 + $0x368] ss:$24 sps:$4 sm:$0xff]  }
  0x6b   :  { %1904 = vmatprep.subr.bf16.mxu1 %v2880_v36 }
  0x6e   :  { %1905 = vmatpush1.bf16.msra.mxu1 %v2878_v37  ;;  %v2979_v37 = vld [vmem:[%s4252_s3 + $0x394] ss:$24 sps:$4 sm:$0xff]  }
  0x6f   :  { %1906 = vmatprep.subr.bf16.mxu1 %v2886_v38  ;;  %v2982_v38 = vld [vmem:[%s4252_s3 + $0x39c] ss:$24 sps:$4 sm:$0xff]  }
  0x72   :  { %1907 = vmatpush1.bf16.msra.mxu1 %v2884_v0  ;;  %v2977_v0 = vld [vmem:[%s4252_s3 + $0x390] ss:$24 sps:$4 sm:$0xff]  }
  0x73   :  { %1908 = vmatprep.subr.bf16.mxu1 %v2892_v39  ;;  %v2980_v39 = vld [vmem:[%s4252_s3 + $0x398] ss:$24 sps:$4 sm:$0xff]  }
  0x76   :  { %1909 = vmatpush1.bf16.msra.mxu1 %v2890_v40  ;;  %v2985_v40 = vld [vmem:[%s4252_s3 + $0x3c4] ss:$24 sps:$4 sm:$0xff]  }
  0x77   :  { %1910 = vmatprep.subr.bf16.mxu1 %v2898_v41  ;;  %v2988_v41 = vld [vmem:[%s4252_s3 + $0x3cc] ss:$24 sps:$4 sm:$0xff]  }
  0x7a   :  { %1911 = vmatpush1.bf16.msra.mxu1 %v2896_v42  ;;  %v2983_v42 = vld [vmem:[%s4252_s3 + $0x3c0] ss:$24 sps:$4 sm:$0xff]  }
  0x7b   :  { %1912 = vmatprep.subr.bf16.mxu1 %v2904_v44  ;;  %v2991_v44 = vld [vmem:[%s4252_s3 + $0x3f4] ss:$24 sps:$4 sm:$0xff]  }
  0x7e   :  { %1913 = vmatpush1.bf16.msra.mxu1 %v2902_v46  ;;  %v2989_v46 = vld [vmem:[%s4252_s3 + $0x3f0] ss:$24 sps:$4 sm:$0xff]  }
  0x7f   :  { %1914 = vmatprep.subr.bf16.mxu1 %v2910_v48  ;;  %v108_v48 = vsub.s32 3, %v3652_v7 }
  0x82   :  { %1915 = vmatpush1.bf16.msra.mxu1 %v2908_v50  ;;  %v3000_v50 = vld [vmem:[%s4252_s3 + $0x42c] ss:$24 sps:$4 sm:$0xff]  }
  0x83   :  { %1916 = vmatprep.subr.bf16.mxu1 %v2916_v52  ;;  %v2998_v52 = vld [vmem:[%s4252_s3 + $0x428] ss:$24 sps:$4 sm:$0xff]  }
  0x86   :  { %1917 = vmatpush1.bf16.msra.mxu1 %v2914_v53  ;;  %v109_v53 = vrot.slane %v3658_v9, %v108_v48 }
  0x87   :  { %1918 = vmatprep.subr.bf16.mxu1 %v2922_v54  ;;  %v3003_v54 = vld [vmem:[%s4252_s3 + $0x454] ss:$24 sps:$4 sm:$0xff]  }
  0x8a   :  { %1919 = vmatpush1.bf16.msra.mxu1 %v2920_v55  ;;  %v3006_v55 = vld [vmem:[%s4252_s3 + $0x45c] ss:$24 sps:$4 sm:$0xff]  }
  0x8b   :  { %1920 = vmatprep.subr.bf16.mxu1 %v2928_v56 }
  0x8e   :  { %1921 = vmatpush1.bf16.msra.mxu1 %v2926_v57 }
  0x8f   :  { %1922 = vmatprep.subr.bf16.mxu1 %v2934_v58  ;;  %v3001_v58 = vld [vmem:[%s4252_s3 + $0x450] ss:$24 sps:$4 sm:$0xff]  }
  0x92   :  { %1923 = vmatpush1.bf16.msra.mxu1 %v2932_v59  ;;  %v3004_v59 = vld [vmem:[%s4252_s3 + $0x458] ss:$24 sps:$4 sm:$0xff]  }
  0x93   :  { %1924 = vmatprep.subr.bf16.mxu1 %v2940_v60 }
  0x96   :  { %1925 = vmatpush1.bf16.msra.mxu1 %v2938_v61 }
  0x97   :  { %1926 = vmatprep.subr.bf16.mxu1 %v2946_v62  ;;  %v3009_v62 = vld [vmem:[%s4252_s3 + $0x484] ss:$24 sps:$4 sm:$0xff]  }
  0x9a   :  { %1927 = vmatpush1.bf16.msra.mxu1 %v2944_v63  ;;  %v3012_v63 = vld [vmem:[%s4252_s3 + $0x48c] ss:$24 sps:$4 sm:$0xff]  }
  0x9b   :  { %1928 = vmatprep.subr.bf16.mxu1 %v2952_v1 }
  0x9e   :  { %1929 = vmatpush1.bf16.msra.mxu1 %v2950_v2 }
  0x9f   :  { %1930 = vmatprep.subr.bf16.mxu1 %v2958_v4  ;;  %v3007_v4 = vld [vmem:[%s4252_s3 + $0x480] ss:$24 sps:$4 sm:$0xff]  }
  0xa2   :  { %1931 = vmatpush1.bf16.msra.mxu1 %v2956_v3  ;;  %v3010_v3 = vld [vmem:[%s4252_s3 + $0x488] ss:$24 sps:$4 sm:$0xff]  }
  0xa3   :  { %1941 = vmatprep.subr.bf16.mxu1 %v2964_v5 }
  0xf8   :  { %v488_v13 = vpop.f32.mrb[0].mxu1  ;;  %v3699_v31 = vpop.f32.mrb[0].mxu0 }
  0xf9   :  { %v489_v14 = vadd.f32 %v488_v13, %v97_v11  ;;  %v490_v15 = vpop.f32.mrb[1].mxu1  ;;  %v3701_v32 = vpop.f32.mrb[1].mxu0  ;;  %v3015_v11 = vld [vmem:[%s4252_s3 + $0x4b4] ss:$24 sps:$4 sm:$0xff]   ;;  %v3013_v13 = vld [vmem:[%s4252_s3 + $0x4b0] ss:$24 sps:$4 sm:$0xff]  }
  0xfa   :  { %v491_v16 = vadd.f32 %v490_v15, %v101_v12  ;;  %v492_v17 = vpop.f32.mrb[2].mxu1  ;;  %v574_v33 = vpop.f32.mrb[2].mxu0  ;;  %v3018_v12 = vld [vmem:[%s4252_s3 + $0x4bc] ss:$24 sps:$4 sm:$0xff]  }
  0xfb   :  { %v618_v18 = vmax.f32 %v489_v14, 0.0  ;;  %v493_v19 = vpop.f32.mrb[3].mxu1  ;;  %v575_v36 = vpop.f32.mrb[3].mxu0  ;;  %v3016_v14 = vld [vmem:[%s4252_s3 + $0x4b8] ss:$24 sps:$4 sm:$0xff]  }
  0xfc   :  { %v619_v20 = vmax.f32 %v491_v16, 0.0  ;;  %v3021_v15 = vld [vmem:[%s4252_s3 + $0x4e4] ss:$24 sps:$4 sm:$0xff]   ;;  %v3019_v17 = vld [vmem:[%s4252_s3 + $0x4e0] ss:$24 sps:$4 sm:$0xff]  }
  0xfd   :  { %v3675_v24 = vpack.c.bf16 %v618_v18, %v618_v18  ;;  %v3024_v16 = vld [vmem:[%s4252_s3 + $0x4ec] ss:$24 sps:$4 sm:$0xff]   ;;  %v3022_v18 = vld [vmem:[%s4252_s3 + $0x4e8] ss:$24 sps:$4 sm:$0xff]   ;;  %v3042_v33 = vld [vmem:[%s4252_s3 + $0x57c] ss:$24 sps:$4 sm:$0xff]  }
  0xfe   :  { %v3667_v21 = vpack.c.bf16 %v619_v20, %v619_v20  ;;  %v3027_v19 = vld [vmem:[%s4252_s3 + $0x514] ss:$24 sps:$4 sm:$0xff]   ;;  %v3037_v36 = vld [vmem:[%s4252_s3 + $0x570] ss:$24 sps:$4 sm:$0xff]  }
  0xff   :  { %v3030_v20 = vld [vmem:[%s4252_s3 + $0x51c] ss:$24 sps:$4 sm:$0xff]  }
 0x100   :  { %1850 = vmatprep.mubr.bf16.mxu0 %v3667_v21  ;;  %1932 = vmatprep.mubr.bf16.mxu1 %v3667_v21 }
 0x101   :  { %1851 = vmatmul.mubr.bf16.vlgmr.msra.gmra.mrb[4].mxu0 %v3675_v24  ;;  %1933 = vmatmul.mubr.bf16.vlgmr.msra.gmra.mrb[12].mxu1 %v3675_v24 }
 0x102   :  { %1860 = vmatpush1.bf16.msra.mxu0 %v2959_v22  ;;  %1942 = vmatpush1.bf16.msra.mxu1 %v2962_v23  ;;  %v3025_v22 = vld [vmem:[%s4252_s3 + $0x510] ss:$24 sps:$4 sm:$0xff]  }
 0x103   :  { %1861 = vmatprep.subr.bf16.mxu0 %v2967_v25  ;;  %1943 = vmatprep.subr.bf16.mxu1 %v2970_v26  ;;  %v3028_v23 = vld [vmem:[%s4252_s3 + $0x518] ss:$24 sps:$4 sm:$0xff]   ;;  %v3033_v25 = vld [vmem:[%s4252_s3 + $0x544] ss:$24 sps:$4 sm:$0xff]  }
 0x104   :  { %v3036_v26 = vld [vmem:[%s4252_s3 + $0x54c] ss:$24 sps:$4 sm:$0xff]  }
 0x106   :  { %1862 = vmatpush1.bf16.msra.mxu0 %v2965_v27  ;;  %1944 = vmatpush1.bf16.msra.mxu1 %v2968_v28  ;;  %v104_v27 = vsub.s32 2, %v3652_v7  ;;  %v3031_v28 = vld [vmem:[%s4252_s3 + $0x540] ss:$24 sps:$4 sm:$0xff]  }
 0x107   :  { %1863 = vmatprep.subr.bf16.mxu0 %v2973_v29  ;;  %1945 = vmatprep.subr.bf16.mxu1 %v2976_v30  ;;  %v3034_v29 = vld [vmem:[%s4252_s3 + $0x548] ss:$24 sps:$4 sm:$0xff]   ;;  %v3039_v30 = vld [vmem:[%s4252_s3 + $0x574] ss:$24 sps:$4 sm:$0xff]  }
 0x10a   :  { %1864 = vmatpush1.bf16.msra.mxu0 %v2971_v34  ;;  %1946 = vmatpush1.bf16.msra.mxu1 %v2974_v35  ;;  %v116_v34 = vsub.s32 5, %v3652_v7  ;;  %v105_v35 = vrot.slane %v3658_v9, %v104_v27 }
 0x10b   :  { %1865 = vmatprep.subr.bf16.mxu0 %v2979_v37  ;;  %1947 = vmatprep.subr.bf16.mxu1 %v2982_v38  ;;  %v3040_v37 = vld [vmem:[%s4252_s3 + $0x578] ss:$24 sps:$4 sm:$0xff]   ;;  %v3045_v38 = vld [vmem:[%s4252_s3 + $0x5a4] ss:$24 sps:$4 sm:$0xff]  }
 0x10e   :  { %1866 = vmatpush1.bf16.msra.mxu0 %v2977_v0  ;;  %1948 = vmatpush1.bf16.msra.mxu1 %v2980_v39  ;;  %v3048_v0 = vld [vmem:[%s4252_s3 + $0x5ac] ss:$24 sps:$4 sm:$0xff]   ;;  %v117_v39 = vrot.slane %v3658_v9, %v116_v34 }
 0x10f   :  { %1867 = vmatprep.subr.bf16.mxu0 %v2985_v40  ;;  %1949 = vmatprep.subr.bf16.mxu1 %v2988_v41  ;;  %v3043_v41 = vld [vmem:[%s4252_s3 + $0x5a0] ss:$24 sps:$4 sm:$0xff]  }
 0x112   :  { %1868 = vmatpush1.bf16.msra.mxu0 %v2983_v42  ;;  %1950 = vmatpush1.bf16.msra.mxu1 %v2986_v43  ;;  %v3046_v42 = vld [vmem:[%s4252_s3 + $0x5a8] ss:$24 sps:$4 sm:$0xff]   ;;  %v3051_v43 = vld [vmem:[%s4252_s3 + $0x5d4] ss:$24 sps:$4 sm:$0xff]  }
 0x113   :  { %1869 = vmatprep.subr.bf16.mxu0 %v2991_v44  ;;  %1951 = vmatprep.subr.bf16.mxu1 %v2994_v45  ;;  %v3054_v44 = vld [vmem:[%s4252_s3 + $0x5dc] ss:$24 sps:$4 sm:$0xff]   ;;  %v573_v45 = vadd.f32 %v3701_v32, %v117_v39 }
 0x114   :  { %v3057_v32 = vld [vmem:[%s4252_s3 + $0x14] ss:$24 sps:$4 sm:$0xff]  }
 0x116   :  { %1870 = vmatpush1.bf16.msra.mxu0 %v2989_v46  ;;  %1952 = vmatpush1.bf16.msra.mxu1 %v2992_v47 }
 0x117   :  { %1871 = vmatprep.subr.bf16.mxu0 %v2997_v49  ;;  %1953 = vmatprep.subr.bf16.mxu1 %v3000_v50  ;;  %v3049_v50 = vld [vmem:[%s4252_s3 + $0x5d0] ss:$24 sps:$4 sm:$0xff]  }
 0x118   :  { %v3767_v56 = vpop.f32.mrb[4].mxu1 }
 0x119   :  { %v531_v57 = vpop.f32.mrb[5].mxu1  ;;  %v530_v40 = vadd.f32 %v3767_v56, %v105_v35 }
 0x11a   :  { %1872 = vmatpush1.bf16.msra.mxu0 %v2995_v51  ;;  %1954 = vmatpush1.bf16.msra.mxu1 %v2998_v52  ;;  %v532_v60 = vadd.f32 %v531_v57, %v109_v53  ;;  %v533_v61 = vpop.f32.mrb[6].mxu1  ;;  %v3052_v51 = vld [vmem:[%s4252_s3 + $0x5d8] ss:$24 sps:$4 sm:$0xff]   ;;  %v3079_v53 = vld [vmem:[%s4254_s5 + $0x40] sm:$0xff]  }
 0x11b   :  { %1873 = vmatprep.subr.bf16.mxu0 %v3003_v54  ;;  %1955 = vmatprep.subr.bf16.mxu1 %v3006_v55  ;;  %v534_v1 = vpop.f32.mrb[7].mxu1  ;;  %v620_v47 = vmax.f32 %v530_v40, 0.0  ;;  %v623_v55 = vmax.f32 %v573_v45, 0.0  ;;  %v3055_v57 = vld [vmem:[%s4252_s3 + $0x10] ss:$24 sps:$4 sm:$0xff]  }
 0x11c   :  { %v621_v2 = vmax.f32 %v532_v60, 0.0  ;;  %v3084_v60 = vld [vmem:[%s4254_s5 + $0x48] sm:$0xff]  }
 0x11d   :  { %v3895_v56 = vpack.c.bf16 %v620_v47, %v620_v47  ;;  %v631_v61 = vpack.c.bf16 %v623_v55, %v623_v55  ;;  %v3085_v1 = vld [vmem:[%s4254_s5 + $0x8] sm:$0xff]   ;;  %v3088_v47 = vld [vmem:[%s4252_s3 + $0x1c4] ss:$24 sps:$4 sm:$0xff]  }
 0x11e   :  { %1874 = vmatpush1.bf16.msra.mxu0 %v3001_v58  ;;  %1956 = vmatpush1.bf16.msra.mxu1 %v3004_v59  ;;  %v3787_v5 = vpack.c.bf16 %v621_v2, %v621_v2  ;;  %v3060_v58 = vld [vmem:[%s4252_s3 + $0x44] ss:$24 sps:$4 sm:$0xff]   ;;  %v3089_v2 = vld [vmem:[%s4254_s5 + $0x50] sm:$0xff]  }
 0x11f   :  { %1875 = vmatprep.subr.bf16.mxu0 %v3009_v62  ;;  %1957 = vmatprep.subr.bf16.mxu1 %v3012_v63  ;;  %v3080_v59 = vld [vmem:[%s4254_s5] sm:$0xff]   ;;  %v3063_v63 = vld [vmem:[%s4252_s3 + $0x74] ss:$24 sps:$4 sm:$0xff]   ;;  %v3091_v55 = vld [vmem:[%s4252_s3 + $0x1f0] ss:$24 sps:$4 sm:$0xff]  }
 0x120   :  { %1891 = vmatprep.mubr.bf16.mxu0 %v3787_v5  ;;  %1973 = vmatprep.mubr.bf16.mxu1 %v3787_v5  ;;  %v3058_v62 = vld [vmem:[%s4252_s3 + $0x40] ss:$24 sps:$4 sm:$0xff]   ;;  %v3083_v40 = vld [vmem:[%s4252_s3 + $0x194] ss:$24 sps:$4 sm:$0xff]  }
 0x122   :  { %1876 = vmatpush1.bf16.msra.mxu0 %v3007_v4  ;;  %1958 = vmatpush1.bf16.msra.mxu1 %v3010_v3  ;;  %v3066_v4 = vld [vmem:[%s4252_s3 + $0xa4] ss:$24 sps:$4 sm:$0xff]   ;;  %v3090_v3 = vld [vmem:[%s4254_s5 + $0x10] sm:$0xff]  }
 0x123   :  { %1877 = vmatprep.subr.bf16.mxu0 %v3015_v11  ;;  %1959 = vmatprep.subr.bf16.mxu1 %v3018_v12  ;;  %v3094_v11 = vld [vmem:[%s4254_s5 + $0x58] sm:$0xff]  }
 0x124   :  { %v3064_v12 = vld [vmem:[%s4252_s3 + $0xa0] ss:$24 sps:$4 sm:$0xff]  }
 0x126   :  { %1878 = vmatpush1.bf16.msra.mxu0 %v3013_v13  ;;  %1960 = vmatpush1.bf16.msra.mxu1 %v3016_v14  ;;  %v3069_v13 = vld [vmem:[%s4252_s3 + $0xd4] ss:$24 sps:$4 sm:$0xff]   ;;  %v3095_v14 = vld [vmem:[%s4254_s5 + $0x18] sm:$0xff]  }
 0x127   :  { %1879 = vmatprep.subr.bf16.mxu0 %v3021_v15  ;;  %1961 = vmatprep.subr.bf16.mxu1 %v3024_v16  ;;  %v3099_v15 = vld [vmem:[%s4254_s5 + $0x60] sm:$0xff]   ;;  %v3067_v16 = vld [vmem:[%s4252_s3 + $0xd0] ss:$24 sps:$4 sm:$0xff]  }
 0x12a   :  { %1880 = vmatpush1.bf16.msra.mxu0 %v3019_v17  ;;  %1962 = vmatpush1.bf16.msra.mxu1 %v3022_v18  ;;  %v112_v17 = vsub.s32 4, %v3652_v7  ;;  %v3072_v18 = vld [vmem:[%s4252_s3 + $0x104] ss:$24 sps:$4 sm:$0xff]  }
 0x12b   :  { %1881 = vmatprep.subr.bf16.mxu0 %v3027_v19  ;;  %1963 = vmatprep.subr.bf16.mxu1 %v3030_v20  ;;  %v3100_v19 = vld [vmem:[%s4254_s5 + $0x20] sm:$0xff]   ;;  %v3104_v20 = vld [vmem:[%s4254_s5 + $0x68] sm:$0xff]  }
 0x12e   :  { %1882 = vmatpush1.bf16.msra.mxu0 %v3025_v22  ;;  %1964 = vmatpush1.bf16.msra.mxu1 %v3028_v23  ;;  %v124_v22 = vsub.s32 7, %v3652_v7  ;;  %v3070_v23 = vld [vmem:[%s4252_s3 + $0x100] ss:$24 sps:$4 sm:$0xff]  }
 0x12f   :  { %1883 = vmatprep.subr.bf16.mxu0 %v3033_v25  ;;  %1965 = vmatprep.subr.bf16.mxu1 %v3036_v26  ;;  %v113_v25 = vrot.slane %v3658_v9, %v112_v17  ;;  %v3075_v26 = vld [vmem:[%s4252_s3 + $0x134] ss:$24 sps:$4 sm:$0xff]  }
 0x131   :  { %v571_v35 = vadd.f32 %v3699_v31, %v113_v25  ;;  %v3076_v31 = vld [vmem:[%s4252_s3 + $0x160] ss:$24 sps:$4 sm:$0xff]  }
 0x132   :  { %1884 = vmatpush1.bf16.msra.mxu0 %v3031_v28  ;;  %1966 = vmatpush1.bf16.msra.mxu1 %v3034_v29  ;;  %v3105_v28 = vld [vmem:[%s4254_s5 + $0x28] sm:$0xff]   ;;  %v3109_v29 = vld [vmem:[%s4254_s5 + $0x70] sm:$0xff]   ;;  %v3155_v25 = vld [vmem:[%s4254_s5 + $0xb8] sm:$0xff]  }
 0x133   :  { %1885 = vmatprep.subr.bf16.mxu0 %v3039_v30  ;;  %1967 = vmatprep.subr.bf16.mxu1 %v3042_v33  ;;  %v125_v30 = vrot.slane %v3658_v9, %v124_v22  ;;  %v3073_v33 = vld [vmem:[%s4252_s3 + $0x130] ss:$24 sps:$4 sm:$0xff]   ;;  %v622_v39 = vmax.f32 %v571_v35, 0.0  ;;  %v3116_v22 = vld [vmem:[%s4252_s3 + $0x2e0] ss:$24 sps:$4 sm:$0xff]  }
 0x134   :  { %v3131_v35 = vld [vmem:[%s4252_s3 + $0x370] ss:$24 sps:$4 sm:$0xff]  }
 0x135   :  { %v630_v45 = vpack.c.bf16 %v622_v39, %v622_v39  ;;  %v3151_v39 = vld [vmem:[%s4252_s3 + $0x430] ss:$24 sps:$4 sm:$0xff]  }
 0x136   :  { %1886 = vmatpush1.bf16.msra.mxu0 %v3037_v36  ;;  %1968 = vmatpush1.bf16.msra.mxu1 %v3040_v37  ;;  %v3078_v36 = vld [vmem:[%s4252_s3 + $0x164] ss:$24 sps:$4 sm:$0xff]   ;;  %v3110_v37 = vld [vmem:[%s4254_s5 + $0x30] sm:$0xff]  }
 0x137   :  { %1887 = vmatprep.subr.bf16.mxu0 %v3045_v38  ;;  %1969 = vmatprep.subr.bf16.mxu1 %v3048_v0  ;;  %v3114_v38 = vld [vmem:[%s4254_s5 + $0x78] sm:$0xff]  }
 0x138   :  { %v3879_v46 = vpop.f32.mrb[8].mxu1 }
 0x139   :  { %v3881_v49 = vpop.f32.mrb[9].mxu1 }
 0x13a   :  { %1888 = vmatpush1.bf16.msra.mxu0 %v3043_v41  ;;  %1970 = vmatpush1.bf16.msra.mxu1 %v3046_v42  ;;  %v615_v52 = vpop.f32.mrb[10].mxu1  ;;  %v614_v0 = vadd.f32 %v3881_v49, %v125_v30  ;;  %v3115_v41 = vld [vmem:[%s4254_s5 + $0x38] sm:$0xff]   ;;  %v3119_v42 = vld [vmem:[%s4254_s5 + $0xc0] sm:$0xff]  }
 0x13b   :  { %1889 = vmatprep.subr.bf16.mxu0 %v3051_v43  ;;  %1971 = vmatprep.subr.bf16.mxu1 %v3054_v44  ;;  %v616_v54 = vpop.f32.mrb[11].mxu1  ;;  %v3081_v44 = vld [vmem:[%s4252_s3 + $0x190] ss:$24 sps:$4 sm:$0xff]   ;;  %v3120_v49 = vld [vmem:[%s4254_s5 + $0x80] sm:$0xff]  }
 0x13c   :  { %v625_v43 = vmax.f32 %v614_v0, 0.0  ;;  %v3086_v52 = vld [vmem:[%s4252_s3 + $0x1c0] ss:$24 sps:$4 sm:$0xff]   ;;  %v3129_v54 = vld [vmem:[%s4254_s5 + $0xd0] sm:$0xff]  }
 0x13d   :  { %v3126_v30 = vld [vmem:[%s4252_s3 + $0x340] ss:$24 sps:$4 sm:$0xff]  }
 0x13e   :  { %1890 = vmatpush1.bf16.msra.mxu0 %v3049_v50  ;;  %1972 = vmatpush1.bf16.msra.mxu1 %v3052_v51  ;;  %v3124_v50 = vld [vmem:[%s4254_s5 + $0xc8] sm:$0xff]   ;;  %v633_v51 = vpack.c.bf16 %v625_v43, %v625_v43  ;;  %v3146_v0 = vld [vmem:[%s4252_s3 + $0x400] ss:$24 sps:$4 sm:$0xff]  }
 0x13f   :  { %1982 = vmatprep.subr.bf16.mxu0 %v3057_v32  ;;  %2800 = vmatprep.subr.bf16.mxu1 %v3079_v53  ;;  %v3093_v32 = vld [vmem:[%s4252_s3 + $0x1f4] ss:$24 sps:$4 sm:$0xff]   ;;  %v3159_v43 = vld [vmem:[%s4252_s3 + $0x490] ss:$24 sps:$4 sm:$0xff]  }
 0x140   :  { %v3125_v53 = vld [vmem:[%s4254_s5 + $0x88] sm:$0xff]  }
 0x141   :  { %1892 = vmatmul.mubr.bf16.vlgmr.msra.gmra.mrb[4].mxu0 %v3895_v56  ;;  %1974 = vmatmul.mubr.bf16.vlgmr.msra.gmra.mrb[12].mxu1 %v3895_v56 }
 0x142   :  { %1983 = vmatpush1.bf16.msra.mxu0 %v3055_v57  ;;  %2014 = vmatprep.mubr.bf16.mxu0 %v3667_v21  ;;  %v3061_v21 = vld [vmem:[%s4252_s3 + $0x70] ss:$24 sps:$4 sm:$0xff]   ;;  %v3098_v57 = vld [vmem:[%s4252_s3 + $0x224] ss:$24 sps:$4 sm:$0xff]  }
 0x143   :  { %1984 = vmatprep.subr.bf16.mxu0 %v3060_v58  ;;  %2801 = vmatpush3.bf16.msra.mxu1 %v3080_v59  ;;  %v3130_v58 = vld [vmem:[%s4254_s5 + $0x90] sm:$0xff]   ;;  %v3134_v59 = vld [vmem:[%s4254_s5 + $0xd8] sm:$0xff]  }
 0x144   :  { %2802 = vmatprep.subr.bf16.mxu1 %v3084_v60  ;;  %2359 = vmatprep.mubr.bf16.mxu1 %v631_v61  ;;  %v3096_v60 = vld [vmem:[%s4252_s3 + $0x220] ss:$24 sps:$4 sm:$0xff]   ;;  %v3103_v61 = vld [vmem:[%s4252_s3 + $0x254] ss:$24 sps:$4 sm:$0xff]  }
 0x146   :  { %1985 = vmatpush1.bf16.msra.mxu0 %v3058_v62  ;;  %v3135_v62 = vld [vmem:[%s4254_s5 + $0x98] sm:$0xff]  }
 0x147   :  { %1986 = vmatprep.subr.bf16.mxu0 %v3063_v63  ;;  %2803 = vmatpush3.bf16.msra.mxu1 %v3085_v1  ;;  %v3139_v63 = vld [vmem:[%s4254_s5 + $0xe0] sm:$0xff]   ;;  %v3101_v1 = vld [vmem:[%s4252_s3 + $0x250] ss:$24 sps:$4 sm:$0xff]  }
 0x148   :  { %2804 = vmatprep.subr.bf16.mxu1 %v3089_v2  ;;  %v3108_v2 = vld [vmem:[%s4252_s3 + $0x284] ss:$24 sps:$4 sm:$0xff]  }
 0x14a   :  { %1987 = vmatpush1.bf16.msra.mxu0 %v3061_v21  ;;  %v3140_v21 = vld [vmem:[%s4254_s5 + $0xa0] sm:$0xff]  }
 0x14b   :  { %1988 = vmatprep.subr.bf16.mxu0 %v3066_v4  ;;  %2805 = vmatpush3.bf16.msra.mxu1 %v3090_v3  ;;  %v120_v4 = vsub.s32 6, %v3652_v7  ;;  %v3144_v3 = vld [vmem:[%s4254_s5 + $0xe8] sm:$0xff]  }
 0x14c   :  { %2806 = vmatprep.subr.bf16.mxu1 %v3094_v11  ;;  %v3106_v11 = vld [vmem:[%s4252_s3 + $0x280] ss:$24 sps:$4 sm:$0xff]  }
 0x14e   :  { %1989 = vmatpush1.bf16.msra.mxu0 %v3064_v12  ;;  %v3113_v12 = vld [vmem:[%s4252_s3 + $0x2b4] ss:$24 sps:$4 sm:$0xff]  }
 0x14f   :  { %1990 = vmatprep.subr.bf16.mxu0 %v3069_v13  ;;  %2807 = vmatpush3.bf16.msra.mxu1 %v3095_v14  ;;  %v3145_v13 = vld [vmem:[%s4254_s5 + $0xa8] sm:$0xff]   ;;  %v121_v14 = vrot.slane %v3658_v9, %v120_v4  ;;  %v3150_v9 = vld [vmem:[%s4254_s5 + $0xb0] sm:$0xff]  }
 0x150   :  { %2808 = vmatprep.subr.bf16.mxu1 %v3099_v15  ;;  %v3149_v15 = vld [vmem:[%s4254_s5 + $0xf0] sm:$0xff]  }
 0x152   :  { %1991 = vmatpush1.bf16.msra.mxu0 %v3067_v16  ;;  %v3111_v16 = vld [vmem:[%s4252_s3 + $0x2b0] ss:$24 sps:$4 sm:$0xff]  }
 0x153   :  { %1992 = vmatprep.subr.bf16.mxu0 %v3072_v18  ;;  %2809 = vmatpush3.bf16.msra.mxu1 %v3100_v19  ;;  %v3118_v18 = vld [vmem:[%s4252_s3 + $0x2e4] ss:$24 sps:$4 sm:$0xff]   ;;  %v612_v19 = vadd.f32 %v3879_v46, %v121_v14 }
 0x154   :  { %2810 = vmatprep.subr.bf16.mxu1 %v3104_v20  ;;  %v3154_v20 = vld [vmem:[%s4254_s5 + $0xf8] sm:$0xff]  }
 0x155   :  { %v624_v46 = vmax.f32 %v612_v19, 0.0 }
 0x156   :  { %1993 = vmatpush1.bf16.msra.mxu0 %v3070_v23  ;;  %v3123_v23 = vld [vmem:[%s4252_s3 + $0x314] ss:$24 sps:$4 sm:$0xff]  }
 0x157   :  { %1994 = vmatprep.subr.bf16.mxu0 %v3075_v26  ;;  %2811 = vmatpush3.bf16.msra.mxu1 %v3105_v28  ;;  %v3121_v26 = vld [vmem:[%s4252_s3 + $0x310] ss:$24 sps:$4 sm:$0xff]   ;;  %v3128_v28 = vld [vmem:[%s4252_s3 + $0x344] ss:$24 sps:$4 sm:$0xff]  }
 0x158   :  { %2812 = vmatprep.subr.bf16.mxu1 %v3109_v29  ;;  %v632_v29 = vpack.c.bf16 %v624_v46, %v624_v46  ;;  %v2767_v46 = vld [vmem:[%s4257_s6] ss:$0 sm:$0xff] }
 0x15a   :  { %1995 = vmatpush1.bf16.msra.mxu0 %v3073_v33  ;;  %v3133_v33 = vld [vmem:[%s4252_s3 + $0x374] ss:$24 sps:$4 sm:$0xff]  }
 0x15b   :  { %1996 = vmatprep.subr.bf16.mxu0 %v3078_v36  ;;  %2813 = vmatpush3.bf16.msra.mxu1 %v3110_v37  ;;  %v3143_v36 = vld [vmem:[%s4252_s3 + $0x3d4] ss:$24 sps:$4 sm:$0xff]   ;;  %v3141_v37 = vld [vmem:[%s4252_s3 + $0x3d0] ss:$24 sps:$4 sm:$0xff]  }
 0x15c   :  { %2814 = vmatprep.subr.bf16.mxu1 %v3114_v38  ;;  %v3148_v38 = vld [vmem:[%s4252_s3 + $0x404] ss:$24 sps:$4 sm:$0xff]  }
 0x15e   :  { %1997 = vmatpush1.bf16.msra.mxu0 %v3076_v31  ;;  %v3153_v31 = vld [vmem:[%s4252_s3 + $0x434] ss:$24 sps:$4 sm:$0xff]  }
 0x15f   :  { %1998 = vmatprep.subr.bf16.mxu0 %v3083_v40  ;;  %2815 = vmatpush3.bf16.msra.mxu1 %v3115_v41  ;;  %v3158_v40 = vld [vmem:[%s4252_s3 + $0x464] ss:$24 sps:$4 sm:$0xff]   ;;  %v3156_v41 = vld [vmem:[%s4252_s3 + $0x460] ss:$24 sps:$4 sm:$0xff]  }
 0x160   :  { %2822 = vmatprep.subr.bf16.mxu1 %v3119_v42  ;;  %v3161_v42 = vld [vmem:[%s4252_s3 + $0x494] ss:$24 sps:$4 sm:$0xff]  }
 0x162   :  { %1999 = vmatpush1.bf16.msra.mxu0 %v3081_v44  ;;  %2360 = vmatmul.mubr.bf16.vlgmr.msra.gmra.mrb[16].mxu1 %v630_v45  ;;  %v3164_v44 = vld [vmem:[%s4252_s3 + $0x4c4] ss:$24 sps:$4 sm:$0xff]   ;;  %v3162_v45 = vld [vmem:[%s4252_s3 + $0x4c0] ss:$24 sps:$4 sm:$0xff]  }
 0x163   :  { %2000 = vmatprep.subr.bf16.mxu0 %v3088_v47  ;;  %2823 = vmatpush3.bf16.msra.mxu1 %v3120_v49  ;;  %v3167_v47 = vld [vmem:[%s4252_s3 + $0x4f4] ss:$24 sps:$4 sm:$0xff]   ;;  %v3165_v49 = vld [vmem:[%s4252_s3 + $0x4f0] ss:$24 sps:$4 sm:$0xff]  }
 0x164   :  { %2824 = vmatprep.subr.bf16.mxu1 %v3124_v50  ;;  %2399 = vmatprep.mubr.bf16.mxu1 %v633_v51  ;;  %v3170_v50 = vld [vmem:[%s4252_s3 + $0x524] ss:$24 sps:$4 sm:$0xff]   ;;  %v3168_v51 = vld [vmem:[%s4252_s3 + $0x520] ss:$24 sps:$4 sm:$0xff]  }
 0x166   :  { %2001 = vmatpush1.bf16.msra.mxu0 %v3086_v52  ;;  %v3173_v52 = vld [vmem:[%s4252_s3 + $0x554] ss:$24 sps:$4 sm:$0xff]  }
 0x167   :  { %2002 = vmatprep.subr.bf16.mxu0 %v3093_v32  ;;  %2825 = vmatpush3.bf16.msra.mxu1 %v3125_v53  ;;  %v3171_v32 = vld [vmem:[%s4252_s3 + $0x550] ss:$24 sps:$4 sm:$0xff]   ;;  %v3176_v53 = vld [vmem:[%s4252_s3 + $0x584] ss:$24 sps:$4 sm:$0xff]  }
 0x168   :  { %2826 = vmatprep.subr.bf16.mxu1 %v3129_v54  ;;  %v3174_v54 = vld [vmem:[%s4252_s3 + $0x580] ss:$24 sps:$4 sm:$0xff]  }
 0x16a   :  { %2003 = vmatpush1.bf16.msra.mxu0 %v3091_v55  ;;  %v3179_v55 = vld [vmem:[%s4252_s3 + $0x5b4] ss:$24 sps:$4 sm:$0xff]  }
 0x16b   :  { %2004 = vmatprep.subr.bf16.mxu0 %v3098_v57  ;;  %2827 = vmatpush3.bf16.msra.mxu1 %v3130_v58  ;;  %v3177_v57 = vld [vmem:[%s4252_s3 + $0x5b0] ss:$24 sps:$4 sm:$0xff]   ;;  %v3182_v58 = vld [vmem:[%s4252_s3 + $0x5e4] ss:$24 sps:$4 sm:$0xff]  }
 0x16c   :  { %2828 = vmatprep.subr.bf16.mxu1 %v3134_v59  ;;  %v3180_v59 = vld [vmem:[%s4252_s3 + $0x5e0] ss:$24 sps:$4 sm:$0xff]  }
 0x16e   :  { %2005 = vmatpush1.bf16.msra.mxu0 %v3096_v60  ;;  %v826_v60 = vld [vmem:[%s4256_s4] sm:$0x3f] }
 0x16f   :  { %2006 = vmatprep.subr.bf16.mxu0 %v3103_v61  ;;  %2829 = vmatpush3.bf16.msra.mxu1 %v3135_v62  ;;  %v831_v61 = vrot.slane %v826_v60, %v96_v8  ;;  %v835_v62 = vrot.slane %v826_v60, %v100_v10 }
 0x170   :  { %2830 = vmatprep.subr.bf16.mxu1 %v3139_v63 }
 0x172   :  { %2007 = vmatpush1.bf16.msra.mxu0 %v3101_v1  ;;  %v839_v1 = vrot.slane %v826_v60, %v104_v27 }
 0x173   :  { %2008 = vmatprep.subr.bf16.mxu0 %v3108_v2  ;;  %2831 = vmatpush3.bf16.msra.mxu1 %v3140_v21 }
 0x174   :  { %2832 = vmatprep.subr.bf16.mxu1 %v3144_v3 }
 0x176   :  { %2009 = vmatpush1.bf16.msra.mxu0 %v3106_v11 }
 0x177   :  { %2010 = vmatprep.subr.bf16.mxu0 %v3113_v12  ;;  %2833 = vmatpush3.bf16.msra.mxu1 %v3145_v13 }
 0x178   :  { %2834 = vmatprep.subr.bf16.mxu1 %v3149_v15 }
 0x17a   :  { %2011 = vmatpush1.bf16.msra.mxu0 %v3111_v16 }
 0x17b   :  { %2012 = vmatprep.subr.bf16.mxu0 %v3118_v18  ;;  %2835 = vmatpush3.bf16.msra.mxu1 %v3150_v9 }
 0x17c   :  { %2836 = vmatprep.subr.bf16.mxu1 %v3154_v20 }
 0x17e   :  { %2013 = vmatpush1.bf16.msra.mxu0 %v3116_v22 }
 0x17f   :  { %2023 = vmatprep.subr.bf16.mxu0 %v3123_v23  ;;  %2837 = vmatpush3.bf16.msra.mxu1 %v3155_v25 }
 0x181   :  { %2015 = vmatmul.mubr.bf16.vlgmr.msra.gmra.mrb[8].mxu0 %v3675_v24  ;;  %v3138_v24 = vld [vmem:[%s4252_s3 + $0x3a4] ss:$24 sps:$4 sm:$0xff]  }
 0x182   :  { %2024 = vmatpush1.bf16.msra.mxu0 %v3121_v26  ;;  %2055 = vmatprep.mubr.bf16.mxu0 %v3787_v5  ;;  %v3136_v5 = vld [vmem:[%s4252_s3 + $0x3a0] ss:$24 sps:$4 sm:$0xff]  }
 0x183   :  { %2025 = vmatprep.subr.bf16.mxu0 %v3128_v28  ;;  %2400 = vmatmul.mubr.bf16.vlgmr.msra.gmra.mrb[20].mxu1 %v632_v29 }
 0x186   :  { %2026 = vmatpush1.bf16.msra.mxu0 %v3126_v30 }
 0x187   :  { %2027 = vmatprep.subr.bf16.mxu0 %v3133_v33 }
 0x18a   :  { %2028 = vmatpush1.bf16.msra.mxu0 %v3131_v35  ;;  %v847_v35 = vrot.slane %v826_v60, %v112_v17 }
 0x18b   :  { %2029 = vmatprep.subr.bf16.mxu0 %v3138_v24  ;;  %v851_v24 = vrot.slane %v826_v60, %v116_v34 }
 0x18e   :  { %2030 = vmatpush1.bf16.msra.mxu0 %v3136_v5 }
 0x18f   :  { %2031 = vmatprep.subr.bf16.mxu0 %v3143_v36 }
 0x192   :  { %2032 = vmatpush1.bf16.msra.mxu0 %v3141_v37 }
 0x193   :  { %2033 = vmatprep.subr.bf16.mxu0 %v3148_v38 }
 0x196   :  { %2034 = vmatpush1.bf16.msra.mxu0 %v3146_v0 }
 0x197   :  { %2035 = vmatprep.subr.bf16.mxu0 %v3153_v31 }
 0x19a   :  { %2036 = vmatpush1.bf16.msra.mxu0 %v3151_v39 }
 0x19b   :  { %2037 = vmatprep.subr.bf16.mxu0 %v3158_v40 }
 0x19e   :  { %2038 = vmatpush1.bf16.msra.mxu0 %v3156_v41  ;;  %v2414_v41 = vand.u32 127, %v94_v6 }
 0x19f   :  { %2039 = vmatprep.subr.bf16.mxu0 %v3161_v42 }
 0x1a0   :  { %vm2415_vm0 = vcmp.lt.s32.totalorder %v2414_v41, 51 }
 0x1a2   :  { %2040 = vmatpush1.bf16.msra.mxu0 %v3159_v43 }
 0x1a3   :  { %2041 = vmatprep.subr.bf16.mxu0 %v3164_v44 }
 0x1a6   :  { %2042 = vmatpush1.bf16.msra.mxu0 %v3162_v45 }
 0x1a7   :  { %2043 = vmatprep.subr.bf16.mxu0 %v3167_v47 }
 0x1aa   :  { %2044 = vmatpush1.bf16.msra.mxu0 %v3165_v49 }
 0x1ab   :  { %2045 = vmatprep.subr.bf16.mxu0 %v3170_v50 }
 0x1ae   :  { %2046 = vmatpush1.bf16.msra.mxu0 %v3168_v51 }
 0x1af   :  { %2047 = vmatprep.subr.bf16.mxu0 %v3173_v52 }
 0x1b2   :  { %2048 = vmatpush1.bf16.msra.mxu0 %v3171_v32 }
 0x1b3   :  { %2049 = vmatprep.subr.bf16.mxu0 %v3176_v53 }
 0x1b6   :  { %2050 = vmatpush1.bf16.msra.mxu0 %v3174_v54 }
 0x1b7   :  { %2051 = vmatprep.subr.bf16.mxu0 %v3179_v55 }
 0x1ba   :  { %2052 = vmatpush1.bf16.msra.mxu0 %v3177_v57 }
 0x1bb   :  { %2053 = vmatprep.subr.bf16.mxu0 %v3182_v58 }
 0x1be   :  { %2054 = vmatpush1.bf16.msra.mxu0 %v3180_v59 }
 0x1c1   :  { %2056 = vmatmul.mubr.bf16.vlgmr.msra.gmra.mrb[8].mxu0 %v3895_v56  ;;  %v843_v56 = vrot.slane %v826_v60, %v108_v48 }
 0x214   :  { %v1893_v63 = vpop.f32.mrb[4].mxu0  ;;  %v1975_v2 = vpop.f32.mrb[12].mxu1 }
 0x215   :  { %v2844_v21 = vadd.f32 %v1893_v63, %v831_v61  ;;  %v1895_v4 = vpop.f32.mrb[5].mxu0  ;;  %v1977_v3 = vpop.f32.mrb[13].mxu1  ;;  %v2846_v8 = vadd.f32 %v1975_v2, %v839_v1 }
 0x216   :  { %v2845_v11 = vadd.f32 %v1895_v4, %v835_v62  ;;  %v1897_v12 = vpop.f32.mrb[6].mxu0  ;;  %v1979_v13 = vpop.f32.mrb[14].mxu1  ;;  %v2847_v18 = vadd.f32 %v1977_v3, %v843_v56 }
 0x217   :  { %v1898_v14 = vpop.f32.mrb[7].mxu0  ;;  %v1980_v15 = vpop.f32.mrb[15].mxu1 }
 0x218   :  { %v2407_v16 = vadd.f32 %v2845_v11, %v2844_v21 }
 0x21a   :  { %v2408_v10 = vadd.f32 %v2846_v8, %v2407_v16 }
 0x21c   :  { %v2409_v19 = vadd.f32 %v2847_v18, %v2408_v10 }
 0x235   :  { %v2816_v9 = vpop.f32.mrb[16].mxu1 }
 0x236   :  { %v2817_v20 = vpop.f32.mrb[17].mxu1 }
 0x237   :  { %v2818_v27 = vadd.f32 %v2817_v20, %v2816_v9  ;;  %v2819_v22 = vpop.f32.mrb[18].mxu1 }
 0x238   :  { %v2820_v23 = vpop.f32.mrb[19].mxu1 }
 0x239   :  { %v2362_v25 = vadd.f32 %v2818_v27, %v2767_v46 }
 0x256   :  { %v2838_v48 = vpop.f32.mrb[20].mxu1 }
 0x257   :  { %v2839_v26 = vpop.f32.mrb[21].mxu1 }
 0x258   :  { %v2840_v28 = vadd.f32 %v2839_v26, %v2838_v48  ;;  %v2841_v29 = vpop.f32.mrb[22].mxu1 }
 0x259   :  { %v2842_v30 = vpop.f32.mrb[23].mxu1 }
 0x25a   :  { %v2402_v33 = vadd.f32 %v2840_v28, %v2362_v25 }
 0x294   :  { %v2057_v5 = vpop.f32.mrb[8].mxu0 }
 0x295   :  { %v2848_v36 = vadd.f32 %v2057_v5, %v847_v35  ;;  %v2059_v37 = vpop.f32.mrb[9].mxu0 }
 0x296   :  { %v2849_v38 = vadd.f32 %v2059_v37, %v851_v24  ;;  %v2061_v0 = vpop.f32.mrb[10].mxu0 }
 0x297   :  { %v2410_v31 = vadd.f32 %v2848_v36, %v2409_v19  ;;  %v2062_v39 = vpop.f32.mrb[11].mxu0 }
 0x299   :  { %v2411_v40 = vadd.f32 %v2849_v38, %v2410_v31 }
 0x29b   :  { %v2412_v42 = vmul.f32 0.16666667, %v2411_v40 }
 0x29d   :  { %v2492_v43 = vsub.f32 %v2849_v38, %v2412_v42  ;;  %v2447_v44 = vsub.f32 %v2846_v8, %v2412_v42  ;;  %v2416_v45 = vsub.f32 %v2844_v21, %v2412_v42  ;;  %v2462_v47 = vsub.f32 %v2847_v18, %v2412_v42 }
 0x29e   :  { %v2432_v17 = vsub.f32 %v2845_v11, %v2412_v42  ;;  %v2477_v7 = vsub.f32 %v2848_v36, %v2412_v42 }
 0x29f   :  { %v2448_v34 = vadd.f32 %v2447_v44, %v2402_v33  ;;  %v2417_v49 = vadd.f32 %v2416_v45, %v2402_v33  ;;  %v2463_v50 = vadd.f32 %v2462_v47, %v2402_v33  ;;  %v2493_v51 = vadd.f32 %v2492_v43, %v2402_v33 }
 0x2a0   :  { %v2433_v52 = vadd.f32 %v2432_v17, %v2402_v33  ;;  %v2478_v32 = vadd.f32 %v2477_v7, %v2402_v33 }
 0x2a1   :  { %v2449_v53 = vsel %vm2415_vm0, %v2448_v34, -1e+30  ;;  %v2418_v54 = vsel %vm2415_vm0, %v2417_v49, -1e+30  ;;  %v2464_v57 = vsel %vm2415_vm0, %v2463_v50, -1e+30 }
 0x2a2   :  { %v2450_v6 = vsel %vm2419_vm1, %v2449_v53, -inf  ;;  %v2420_v55 = vsel %vm2419_vm1, %v2418_v54, -inf  ;;  %v2434_v58 = vsel %vm2415_vm0, %v2433_v52, -1e+30  ;;  %v2465_v59 = vsel %vm2419_vm1, %v2464_v57, -inf }
 0x2a3   :  { %2451 = vmax.xlane.f32.xlu1 %v2450_v6  ;;  %2421 = vmax.xlane.f32.xlu0 %v2420_v55  ;;  %v2435_v60 = vsel %vm2419_vm1, %v2434_v58, -inf  ;;  %v2494_v61 = vsel %vm2415_vm0, %v2493_v51, -1e+30  ;;  %v2479_v62 = vsel %vm2415_vm0, %v2478_v32, -1e+30 }
 0x2a4   :  { %v2495_v63 = vsel %vm2419_vm1, %v2494_v61, -inf  ;;  %v2480_v1 = vsel %vm2419_vm1, %v2479_v62, -inf }
 0x2a7   :  { %2466 = vmax.xlane.f32.xlu1 %v2465_v59  ;;  %2436 = vmax.xlane.f32.xlu0 %v2435_v60 }
 0x2ab   :  { %2496 = vmax.xlane.f32.xlu1 %v2495_v63  ;;  %2481 = vmax.xlane.f32.xlu0 %v2480_v1 }
 0x330   :  { %v2452_v2 = vpop.xlane.xlu1 %2451  ;;  %v2422_v21 = vpop.xlane.xlu0 %2421 }
 0x331   :  { %v2453_v4 = vsub.f32 %v2449_v53, %v2452_v2  ;;  %v2423_v3 = vsub.f32 %v2418_v54, %v2422_v21 }
 0x333   :  { %v2424_v11 = vmul.f32 1.442695, %v2423_v3  ;;  %v2454_v56 = vmul.f32 1.442695, %v2453_v4 }
 0x334   :  { %v2467_v12 = vpop.xlane.xlu1 %2466  ;;  %v2437_v13 = vpop.xlane.xlu0 %2436 }
 0x335   :  { %v2468_v14 = vsub.f32 %v2464_v57, %v2467_v12  ;;  %v2438_v15 = vsub.f32 %v2434_v58, %v2437_v13  ;;  %3183 = vpow2.f32 %v2424_v11 }
 0x336   :  { %3185 = vpow2.f32 %v2454_v56 }
 0x337   :  { %v2439_v8 = vmul.f32 1.442695, %v2438_v15  ;;  %v2469_v16 = vmul.f32 1.442695, %v2468_v14 }
 0x338   :  { %v2497_v18 = vpop.xlane.xlu1 %2496  ;;  %v2482_v10 = vpop.xlane.xlu0 %2481 }
 0x339   :  { %v2498_v19 = vsub.f32 %v2494_v61, %v2497_v18  ;;  %v2483_v9 = vsub.f32 %v2479_v62, %v2482_v10  ;;  %3187 = vpow2.f32 %v2439_v8 }
 0x33a   :  { %3189 = vpow2.f32 %v2469_v16 }
 0x33b   :  { %v2484_v20 = vmul.f32 1.442695, %v2483_v9  ;;  %v2499_v27 = vmul.f32 1.442695, %v2498_v19 }
 0x33d   :  { %3191 = vpow2.f32 %v2484_v20 }
 0x33e   :  { %3193 = vpow2.f32 %v2499_v27 }
 0x33f   :  { %v3184_v22 = vpop.eup %3183 }
 0x340   :  { %v2426_v23 = vsel %vm2419_vm1, %v3184_v22, 0.0  ;;  %v3186_v46 = vpop.eup %3185 }
 0x341   :  { %2427 = vadd.xlane.f32.xlu0 %v2426_v23  ;;  %v2456_v48 = vsel %vm2419_vm1, %v3186_v46, 0.0 }
 0x343   :  { %v3188_v25 = vpop.eup %3187 }
 0x344   :  { %v2441_v26 = vsel %vm2419_vm1, %v3188_v25, 0.0  ;;  %v3190_v28 = vpop.eup %3189 }
 0x345   :  { %2457 = vadd.xlane.f32.xlu0 %v2456_v48  ;;  %2442 = vadd.xlane.f32.xlu1 %v2441_v26  ;;  %v2471_v30 = vsel %vm2419_vm1, %v3190_v28, 0.0 }
 0x347   :  { %v3192_v29 = vpop.eup %3191 }
 0x348   :  { %v2486_v33 = vsel %vm2419_vm1, %v3192_v29, 0.0  ;;  %v3194_v35 = vpop.eup %3193 }
 0x349   :  { %2472 = vadd.xlane.f32.xlu1 %v2471_v30  ;;  %2487 = vadd.xlane.f32.xlu0 %v2486_v33  ;;  %v2501_v24 = vsel %vm2419_vm1, %v3194_v35, 0.0 }
 0x34d   :  { %2502 = vadd.xlane.f32.xlu1 %v2501_v24 }
 0x3ce   :  { %v2428_v5 = vpop.xlane.xlu0 %2427 }
 0x3cf   :  { %3195 = vrcp.f32 %v2428_v5 }
 0x3d2   :  { %v2443_v36 = vpop.xlane.xlu1 %2442  ;;  %v2458_v37 = vpop.xlane.xlu0 %2457 }
 0x3d3   :  { %3197 = vrcp.f32 %v2443_v36 }
 0x3d4   :  { %3199 = vrcp.f32 %v2458_v37 }
 0x3d6   :  { %v2473_v38 = vpop.xlane.xlu1 %2472  ;;  %v2488_v0 = vpop.xlane.xlu0 %2487 }
 0x3d7   :  { %3201 = vrcp.f32 %v2473_v38 }
 0x3d8   :  { %3203 = vrcp.f32 %v2488_v0 }
 0x3d9   :  { %v3196_v31 = vpop.eup %3195 }
 0x3da   :  { %v2430_v39 = vmul.f32 %v3196_v31, %v3184_v22  ;;  %v2503_v40 = vpop.xlane.xlu1 %2502 }
 0x3db   :  { %3205 = vrcp.f32 %v2503_v40 }
 0x3dc   :  { %2431 = vst [vmem:[%s4258_s7] sm:$0x3] %v2430_v39 }
 0x3dd   :  { %v3198_v41 = vpop.eup %3197 }
 0x3de   :  { %v3200_v42 = vpop.eup %3199  ;;  %v2445_v43 = vmul.f32 %v3198_v41, %v3188_v25 }
 0x3df   :  { %v2460_v44 = vmul.f32 %v3200_v42, %v3186_v46 }
 0x3e0   :  { %2446 = vst [vmem:[%s4258_s7 + $0x2] sm:$0x3] %v2445_v43 }
 0x3e1   :  { %v3202_v45 = vpop.eup %3201  ;;  %2461 = vst [vmem:[%s4258_s7 + $0x4] sm:$0x3] %v2460_v44 }
 0x3e2   :  { %v3204_v47 = vpop.eup %3203  ;;  %v2475_v17 = vmul.f32 %v3202_v45, %v3190_v28 }
 0x3e3   :  { %v2490_v7 = vmul.f32 %v3204_v47, %v3192_v29 }
 0x3e4   :  { %2476 = vst [vmem:[%s4258_s7 + $0x6] sm:$0x3] %v2475_v17 }
 0x3e5   :  { %v3206_v34 = vpop.eup %3205  ;;  %2491 = vst [vmem:[%s4258_s7 + $0x8] sm:$0x3] %v2490_v7 }
 0x3e6   :  { %v2505_v49 = vmul.f32 %v3206_v34, %v3194_v35 }
 0x3e8   :  { %2506 = vst [vmem:[%s4258_s7 + $0xa] sm:$0x3] %v2505_v49 }

</bundles_post_ra>
